<compile_context>
chip_gen: v6e
topology: v6e:2x2x1
jax: 0.10.0
libtpu: 0.0.40
codegen_flags: <defaults>
</compile_context>

<pallas_src>
import functools

import jax
import jax.numpy as jnp
from jax.experimental import pallas as pl
from jax.experimental.pallas import tpu as pltpu

NDF = 64
NZ = 100
LEAKY_SLOPE = 0.01          # nn.LeakyReLU default negative_slope
BN_EPS = 1e-5
VMEM_LIMIT = 48 * 1024 * 1024   # headroom below v7x's 64 MiB/TC


def _round_up(x, m):
    return (x + m - 1) // m * m


# ---------------------------------------------------------------------------
# Pallas kernels
# ---------------------------------------------------------------------------
def _mm_act_kernel(x_ref, w_ref, o_ref, *, act):
    """One M-tile: o = act(x @ w). bf16 inputs, f32 accumulate, f32 epilogue."""
    y = jnp.dot(x_ref[...], w_ref[...], preferred_element_type=jnp.float32)
    if act == "leaky":
        y = jnp.where(y >= 0, y, LEAKY_SLOPE * y)
    elif act == "tanh":
        y = jnp.tanh(y)
    o_ref[...] = y.astype(o_ref.dtype)


def _mm_bn_leaky_kernel(x_ref, w_ref, g_ref, b_ref, o_ref, acc_ref):
    """K-tiled matmul accumulation + fused BatchNorm (full-M stats) + LeakyReLU.

    Grid axis 0 iterates K tiles ("arbitrary"); the (M, Cout) output block and
    f32 accumulator stay resident in VMEM across the whole reduction, so the
    conv activations never round-trip through HBM before BN.
    """
    k = pl.program_id(0)

    @pl.when(k == 0)
    def _():
        acc_ref[...] = jnp.zeros_like(acc_ref)

    acc_ref[...] += jnp.dot(x_ref[...], w_ref[...],
                            preferred_element_type=jnp.float32)

    @pl.when(k == pl.num_programs(0) - 1)
    def _():
        y = acc_ref[...]
        # Training-mode BN over all rows (N*Ho*Wo) per channel; one-pass var.
        mean = jnp.mean(y, axis=0, keepdims=True)
        var = jnp.mean(y * y, axis=0, keepdims=True) - mean * mean
        yn = (y - mean) * jax.lax.rsqrt(var + BN_EPS)
        yn = yn * g_ref[...] + b_ref[...]
        o_ref[...] = jnp.where(yn >= 0, yn, LEAKY_SLOPE * yn).astype(o_ref.dtype)


# ---------------------------------------------------------------------------
# Kernel wrappers
# ---------------------------------------------------------------------------
def conv_matmul_act(cols, w_mat, act, out_dtype, tm=512):
    """act(cols @ w) with M tiled ('parallel'), lane-dense (128-mult) output."""
    M, K = cols.shape
    _, Cout = w_mat.shape
    cout_p = _round_up(Cout, 128)                 # lane-dense stores
    if cout_p != Cout:
        w_mat = jnp.pad(w_mat, ((0, 0), (0, cout_p - Cout)))
    tm_ = min(tm, _round_up(M, 8))
    m_p = _round_up(M, tm_)
    if m_p != M:
        cols = jnp.pad(cols, ((0, m_p - M), (0, 0)))
    cols = cols.astype(jnp.bfloat16)
    w_mat = w_mat.astype(jnp.bfloat16)

    out = pl.pallas_call(
        functools.partial(_mm_act_kernel, act=act),
        out_shape=jax.ShapeDtypeStruct((m_p, cout_p), out_dtype),
        grid_spec=pltpu.PrefetchScalarGridSpec(
            num_scalar_prefetch=0,
            grid=(m_p // tm_,),
            in_specs=[pl.BlockSpec((tm_, K), lambda i: (i, 0)),
                      pl.BlockSpec((K, cout_p), lambda i: (0, 0))],
            out_specs=pl.BlockSpec((tm_, cout_p), lambda i: (i, 0))),
        compiler_params=pltpu.CompilerParams(
            dimension_semantics=("parallel",),
            vmem_limit_bytes=VMEM_LIMIT),
    )(cols, w_mat)
    return out[:M, :Cout]


def conv_matmul_bn_leaky(cols, w_mat, gamma, beta, out_dtype, tk=512):
    """Fused conv-matmul + BatchNorm + LeakyReLU; K tiled as the reduction axis."""
    M, K = cols.shape
    _, Cout = w_mat.shape
    tk_ = tk if K % tk == 0 else K
    cols = cols.astype(jnp.bfloat16)
    w_mat = w_mat.astype(jnp.bfloat16)

    return pl.pallas_call(
        _mm_bn_leaky_kernel,
        out_shape=jax.ShapeDtypeStruct((M, Cout), out_dtype),
        grid_spec=pltpu.PrefetchScalarGridSpec(
            num_scalar_prefetch=0,
            grid=(K // tk_,),
            in_specs=[pl.BlockSpec((M, tk_), lambda k: (0, k)),
                      pl.BlockSpec((tk_, Cout), lambda k: (k, 0)),
                      pl.BlockSpec((1, Cout), lambda k: (0, 0)),
                      pl.BlockSpec((1, Cout), lambda k: (0, 0))],
            out_specs=pl.BlockSpec((M, Cout), lambda k: (0, 0)),
            scratch_shapes=[pltpu.VMEM((M, Cout), jnp.float32)]),
        compiler_params=pltpu.CompilerParams(
            dimension_semantics=("arbitrary",),
            vmem_limit_bytes=VMEM_LIMIT),
    )(cols, w_mat, gamma, beta)


# ---------------------------------------------------------------------------
# Glue: im2col, parameter init, forward pass
# ---------------------------------------------------------------------------
def im2col(x_nhwc, kh, kw, stride, pad):
    """x: (N, H, W, C) -> (N*Ho*Wo, kh*kw*C), feature order (kh, kw, cin)."""
    N, H, W, C = x_nhwc.shape
    xp = jnp.pad(x_nhwc, ((0, 0), (pad, pad), (pad, pad), (0, 0)))
    Ho = (H + 2 * pad - kh) // stride + 1
    Wo = (W + 2 * pad - kw) // stride + 1
    patches = []
    for i in range(kh):
        for j in range(kw):
            patches.append(xp[:, i:i + stride * Ho:stride,
                               j:j + stride * Wo:stride, :])
    cols = jnp.stack(patches, axis=3)                 # (N, Ho, Wo, kh*kw, C)
    return cols.reshape(N * Ho * Wo, kh * kw * C), (N, Ho, Wo)


def init_params(key, channels=1, nz=NZ, ndf=NDF):
    """Deterministic parameter init (DCGAN-style N(0, 0.02) conv weights)."""
    ks = jax.random.split(key, 5)

    def conv_w(k, kh, kw, cin, cout):
        # stored as (KH, KW, Cin, Cout) so reshape matches im2col feature order
        return 0.02 * jax.random.normal(k, (kh, kw, cin, cout), jnp.float32)

    p = {
        "w1": conv_w(ks[0], 4, 4, channels, ndf),
        "w2": conv_w(ks[1], 4, 4, ndf, ndf * 2),
        "w3": conv_w(ks[2], 4, 4, ndf * 2, ndf * 4),
        "w4": conv_w(ks[3], 4, 4, ndf * 4, ndf * 8),
        "w5": conv_w(ks[4], 1, 1, ndf * 8, nz),
    }
    for i, c in zip((2, 3, 4), (ndf * 2, ndf * 4, ndf * 8)):
        p[f"g{i}"] = jnp.ones((1, c), jnp.float32)    # BN weight (gamma) = 1
        p[f"b{i}"] = jnp.zeros((1, c), jnp.float32)   # BN bias   (beta)  = 0
    return p


def encoder_forward(x_nchw, p):
    x = jnp.transpose(x_nchw, (0, 2, 3, 1)).astype(jnp.bfloat16)   # NCHW -> NHWC

    # --- Conv1 + LeakyReLU (fused in the matmul kernel) ---
    cols, (N, Ho, Wo) = im2col(x, 4, 4, 2, 1)
    y = conv_matmul_act(cols, p["w1"].reshape(-1, p["w1"].shape[-1]),
                        act="leaky", out_dtype=jnp.bfloat16)
    x = y.reshape(N, Ho, Wo, -1)

    # --- Conv2..4 + BatchNorm + LeakyReLU, fully fused per layer ---
    for i in (2, 3, 4):
        w = p[f"w{i}"]
        cols, (N, Ho, Wo) = im2col(x, 4, 4, 2, 1)
        y = conv_matmul_bn_leaky(cols, w.reshape(-1, w.shape[-1]),
                                 p[f"g{i}"], p[f"b{i}"],
                                 out_dtype=jnp.bfloat16)
        x = y.reshape(N, Ho, Wo, -1)

    # --- Conv5 (1x1, stride 1) + Tanh: no im2col needed ---
    N, Ho, Wo, Cin = x.shape
    w5 = p["w5"].reshape(-1, p["w5"].shape[-1])
    y = conv_matmul_act(x.reshape(N * Ho * Wo, Cin), w5,
                        act="tanh", out_dtype=jnp.float32)
    x = y.reshape(N, Ho, Wo, -1)

    return jnp.transpose(x, (0, 3, 1, 2))             # back to NCHW


encoder_forward_jit = jax.jit(encoder_forward)


if __name__ == "__main__":
    key = jax.random.PRNGKey(0)
    k_in, k_par = jax.random.split(key)

    # Small but consistent: batch=2, channels=1, 32x32 input -> (2, 100, 2, 2) output.
    x = jax.random.normal(k_in, (2, 1, 32, 32), jnp.float32)
    params = init_params(k_par, channels=1)

    out = encoder_forward_jit(x, params)
    jax.block_until_ready(out)

    assert out.shape == (2, NZ, 2, 2), out.shape
    assert bool(jnp.all(jnp.isfinite(out)))
    assert bool(jnp.all(jnp.abs(out) <= 1.0 + 1e-6))   # tanh range
    print("KERNEL_OK")
</pallas_src>

<mosaic_0001>
module attributes {stable_mosaic.version = 11 : i64} {
  func.func @_mm_act_kernel(%arg0: i32, %arg1: memref<512x16xbf16, #tpu.memory_space<vmem>>, %arg2: memref<16x128xbf16, #tpu.memory_space<vmem>>, %arg3: memref<512x128xbf16, #tpu.memory_space<vmem>>) attributes {dimension_semantics = [#tpu.dimension_semantics<parallel>], iteration_bounds = array<i64: 1>, scalar_prefetch = 0 : i64, scratch_operands = 0 : i64, tpu.core_type = #tpu.core_type<tc>, window_params = [{transform_indices = @transform_0, window_bounds = array<i64: 512, 16>}, {pipeline_mode = #tpu.pipeline_mode<synchronous>, transform_indices = @transform_1, window_bounds = array<i64: 16, 128>}, {transform_indices = @transform_2, window_bounds = array<i64: 512, 128>}]} {
    %c0 = arith.constant 0 : index
    %c0_0 = arith.constant 0 : index
    %0 = vector.load %arg1[%c0, %c0_0] : memref<512x16xbf16, #tpu.memory_space<vmem>>, vector<512x16xbf16>
    %c0_1 = arith.constant 0 : index
    %c0_2 = arith.constant 0 : index
    %1 = vector.load %arg2[%c0_1, %c0_2] : memref<16x128xbf16, #tpu.memory_space<vmem>>, vector<16x128xbf16>
    %cst = arith.constant dense<0.000000e+00> : vector<512x128xf32>
    %2 = tpu.matmul %0, %1, %cst {dimension_numbers = #tpu.dot_dimension_numbers<[1], [0], [0], [1], [0, 0, 1, 1], [], []>} : vector<512x16xbf16>, vector<16x128xbf16>, vector<512x128xf32> -> vector<512x128xf32>
    %cst_3 = arith.constant 0.000000e+00 : f32
    %3 = vector.broadcast %cst_3 : f32 to vector<512x128xf32>
    %4 = arith.cmpf oge, %2, %3 : vector<512x128xf32>
    %cst_4 = arith.constant 0.00999999977 : f32
    %5 = vector.broadcast %cst_4 : f32 to vector<512x128xf32>
    %6 = arith.mulf %5, %2 : vector<512x128xf32>
    %7 = arith.select %4, %2, %6 : vector<512x128xi1>, vector<512x128xf32>
    %8 = arith.truncf %7 : vector<512x128xf32> to vector<512x128xbf16>
    %c0_5 = arith.constant 0 : index
    %c0_6 = arith.constant 0 : index
    %9 = vector.load %arg3[%c0_5, %c0_6] : memref<512x128xbf16, #tpu.memory_space<vmem>>, vector<512x128xbf16>
    tpu.vector_store %arg3[%c0_5, %c0_6], %8 {strides = array<i32>} : memref<512x128xbf16, #tpu.memory_space<vmem>>, vector<512x128xbf16>,
    return
  }
  func.func @transform_0(%arg0: i32) -> (i32, i32) {
    %c0_i32 = arith.constant 0 : i32
    %c0_i32_0 = arith.constant 0 : i32
    return %arg0, %c0_i32 : i32, i32
  }
  func.func @transform_1(%arg0: i32) -> (i32, i32) {
    %c0_i32 = arith.constant 0 : i32
    %c0_i32_0 = arith.constant 0 : i32
    %c0_i32_1 = arith.constant 0 : i32
    return %c0_i32, %c0_i32_0 : i32, i32
  }
  func.func @transform_2(%arg0: i32) -> (i32, i32) {
    %c0_i32 = arith.constant 0 : i32
    %c0_i32_0 = arith.constant 0 : i32
    return %arg0, %c0_i32 : i32, i32
  }
}

module attributes {stable_mosaic.version = 11 : i64} {
  func.func @_mm_bn_leaky_kernel(%arg0: i32, %arg1: memref<128x512xbf16, #tpu.memory_space<vmem>>, %arg2: memref<512x128xbf16, #tpu.memory_space<vmem>>, %arg3: memref<1x128xf32, #tpu.memory_space<vmem>>, %arg4: memref<1x128xf32, #tpu.memory_space<vmem>>, %arg5: memref<128x128xbf16, #tpu.memory_space<vmem>>, %arg6: memref<128x128xf32, #tpu.memory_space<vmem>>) attributes {dimension_semantics = [#tpu.dimension_semantics<arbitrary>], iteration_bounds = array<i64: 2>, scalar_prefetch = 0 : i64, scratch_operands = 1 : i64, tpu.core_type = #tpu.core_type<tc>, window_params = [{transform_indices = @transform_0, window_bounds = array<i64: 128, 512>}, {transform_indices = @transform_1, window_bounds = array<i64: 512, 128>}, {pipeline_mode = #tpu.pipeline_mode<synchronous>, transform_indices = @transform_2, window_bounds = array<i64: 1, 128>}, {pipeline_mode = #tpu.pipeline_mode<synchronous>, transform_indices = @transform_3, window_bounds = array<i64: 1, 128>}, {pipeline_mode = #tpu.pipeline_mode<synchronous>, transform_indices = @transform_4, window_bounds = array<i64: 128, 128>}]} {
    %c0_i32 = arith.constant 0 : i32
    %0 = arith.cmpi eq, %arg0, %c0_i32 : i32
    %1 = arith.extui %0 : i1 to i32
    %c0_i32_0 = arith.constant 0 : i32
    %2 = arith.cmpi ne, %1, %c0_i32_0 : i32
    scf.if %2 {
      %cst_9 = arith.constant 0.000000e+00 : f32
      %12 = vector.broadcast %cst_9 : f32 to vector<128x128xf32>
      %c0_10 = arith.constant 0 : index
      %c0_11 = arith.constant 0 : index
      %13 = vector.load %arg6[%c0_10, %c0_11] : memref<128x128xf32, #tpu.memory_space<vmem>>, vector<128x128xf32>
      tpu.vector_store %arg6[%c0_10, %c0_11], %12 {strides = array<i32>} : memref<128x128xf32, #tpu.memory_space<vmem>>, vector<128x128xf32>,
    } else {
    }
    %c0 = arith.constant 0 : index
    %c0_1 = arith.constant 0 : index
    %3 = vector.load %arg6[%c0, %c0_1] : memref<128x128xf32, #tpu.memory_space<vmem>>, vector<128x128xf32>
    %c0_2 = arith.constant 0 : index
    %c0_3 = arith.constant 0 : index
    %4 = vector.load %arg1[%c0_2, %c0_3] : memref<128x512xbf16, #tpu.memory_space<vmem>>, vector<128x512xbf16>
    %c0_4 = arith.constant 0 : index
    %c0_5 = arith.constant 0 : index
    %5 = vector.load %arg2[%c0_4, %c0_5] : memref<512x128xbf16, #tpu.memory_space<vmem>>, vector<512x128xbf16>
    %cst = arith.constant dense<0.000000e+00> : vector<128x128xf32>
    %6 = tpu.matmul %4, %5, %cst {dimension_numbers = #tpu.dot_dimension_numbers<[1], [0], [0], [1], [0, 0, 1, 1], [], []>} : vector<128x512xbf16>, vector<512x128xbf16>, vector<128x128xf32> -> vector<128x128xf32>
    %7 = arith.addf %3, %6 : vector<128x128xf32>
    %c0_6 = arith.constant 0 : index
    %c0_7 = arith.constant 0 : index
    %8 = vector.load %arg6[%c0_6, %c0_7] : memref<128x128xf32, #tpu.memory_space<vmem>>, vector<128x128xf32>
    tpu.vector_store %arg6[%c0_6, %c0_7], %7 {strides = array<i32>} : memref<128x128xf32, #tpu.memory_space<vmem>>, vector<128x128xf32>,
    %c1_i32 = arith.constant 1 : i32
    %9 = arith.cmpi eq, %arg0, %c1_i32 : i32
    %10 = arith.extui %9 : i1 to i32
    %c0_i32_8 = arith.constant 0 : i32
    %11 = arith.cmpi ne, %10, %c0_i32_8 : i32
    scf.if %11 {
      %c0_9 = arith.constant 0 : index
      %c0_10 = arith.constant 0 : index
      %12 = vector.load %arg6[%c0_9, %c0_10] : memref<128x128xf32, #tpu.memory_space<vmem>>, vector<128x128xf32>
      %cst_11 = arith.constant dense<0.000000e+00> : vector<128xf32>
      %13 = vector.multi_reduction <add>, %12, %cst_11 [0] : vector<128x128xf32> to vector<128xf32>
      %14 = vector.shape_cast %13 : vector<128xf32> to vector<1x128xf32>
      %cst_12 = arith.constant 1.280000e+02 : f32
      %15 = vector.broadcast %cst_12 : f32 to vector<1x128xf32>
      %16 = arith.divf %14, %15 : vector<1x128xf32>
      %17 = arith.mulf %12, %12 : vector<128x128xf32>
      %cst_13 = arith.constant dense<0.000000e+00> : vector<128xf32>
      %18 = vector.multi_reduction <add>, %17, %cst_13 [0] : vector<128x128xf32> to vector<128xf32>
      %19 = vector.shape_cast %18 : vector<128xf32> to vector<1x128xf32>
      %cst_14 = arith.constant 1.280000e+02 : f32
      %20 = vector.broadcast %cst_14 : f32 to vector<1x128xf32>
      %21 = arith.divf %19, %20 : vector<1x128xf32>
      %22 = arith.mulf %16, %16 : vector<1x128xf32>
      %23 = arith.subf %21, %22 : vector<1x128xf32>
      %24 = vector.broadcast %16 : vector<1x128xf32> to vector<128x128xf32>
      %25 = arith.subf %12, %24 : vector<128x128xf32>
      %cst_15 = arith.constant 9.99999974E-6 : f32
      %26 = vector.broadcast %cst_15 : f32 to vector<1x128xf32>
      %27 = arith.addf %23, %26 : vector<1x128xf32>
      %28 = math.rsqrt %27 : vector<1x128xf32>
      %29 = vector.broadcast %28 : vector<1x128xf32> to vector<128x128xf32>
      %30 = arith.mulf %25, %29 : vector<128x128xf32>
      %c0_16 = arith.constant 0 : index
      %c0_17 = arith.constant 0 : index
      %31 = vector.load %arg3[%c0_16, %c0_17] : memref<1x128xf32, #tpu.memory_space<vmem>>, vector<1x128xf32>
      %32 = vector.broadcast %31 : vector<1x128xf32> to vector<128x128xf32>
      %33 = arith.mulf %30, %32 : vector<128x128xf32>
      %c0_18 = arith.constant 0 : index
      %c0_19 = arith.constant 0 : index
      %34 = vector.load %arg4[%c0_18, %c0_19] : memref<1x128xf32, #tpu.memory_space<vmem>>, vector<1x128xf32>
      %35 = vector.broadcast %34 : vector<1x128xf32> to vector<128x128xf32>
      %36 = arith.addf %33, %35 : vector<128x128xf32>
      %cst_20 = arith.constant 0.000000e+00 : f32
      %37 = vector.broadcast %cst_20 : f32 to vector<128x128xf32>
      %38 = arith.cmpf oge, %36, %37 : vector<128x128xf32>
      %cst_21 = arith.constant 0.00999999977 : f32
      %39 = vector.broadcast %cst_21 : f32 to vector<128x128xf32>
      %40 = arith.mulf %39, %36 : vector<128x128xf32>
      %41 = arith.select %38, %36, %40 : vector<128x128xi1>, vector<128x128xf32>
      %42 = arith.truncf %41 : vector<128x128xf32> to vector<128x128xbf16>
      %c0_22 = arith.constant 0 : index
      %c0_23 = arith.constant 0 : index
      %43 = vector.load %arg5[%c0_22, %c0_23] : memref<128x128xbf16, #tpu.memory_space<vmem>>, vector<128x128xbf16>
      tpu.vector_store %arg5[%c0_22, %c0_23], %42 {strides = array<i32>} : memref<128x128xbf16, #tpu.memory_space<vmem>>, vector<128x128xbf16>,
    } else {
    }
    return
  }
  func.func @transform_0(%arg0: i32) -> (i32, i32) {
    %c0_i32 = arith.constant 0 : i32
    %c0_i32_0 = arith.constant 0 : i32
    return %c0_i32, %arg0 : i32, i32
  }
  func.func @transform_1(%arg0: i32) -> (i32, i32) {
    %c0_i32 = arith.constant 0 : i32
    %c0_i32_0 = arith.constant 0 : i32
    return %arg0, %c0_i32 : i32, i32
  }
  func.func @transform_2(%arg0: i32) -> (i32, i32) {
    %c0_i32 = arith.constant 0 : i32
    %c0_i32_0 = arith.constant 0 : i32
    %c0_i32_1 = arith.constant 0 : i32
    return %c0_i32, %c0_i32_0 : i32, i32
  }
  func.func @transform_3(%arg0: i32) -> (i32, i32) {
    %c0_i32 = arith.constant 0 : i32
    %c0_i32_0 = arith.constant 0 : i32
    %c0_i32_1 = arith.constant 0 : i32
    return %c0_i32, %c0_i32_0 : i32, i32
  }
  func.func @transform_4(%arg0: i32) -> (i32, i32) {
    %c0_i32 = arith.constant 0 : i32
    %c0_i32_0 = arith.constant 0 : i32
    %c0_i32_1 = arith.constant 0 : i32
    return %c0_i32, %c0_i32_0 : i32, i32
  }
}

module attributes {stable_mosaic.version = 11 : i64} {
  func.func @_mm_bn_leaky_kernel(%arg0: i32, %arg1: memref<32x512xbf16, #tpu.memory_space<vmem>>, %arg2: memref<512x256xbf16, #tpu.memory_space<vmem>>, %arg3: memref<1x256xf32, #tpu.memory_space<vmem>>, %arg4: memref<1x256xf32, #tpu.memory_space<vmem>>, %arg5: memref<32x256xbf16, #tpu.memory_space<vmem>>, %arg6: memref<32x256xf32, #tpu.memory_space<vmem>>) attributes {dimension_semantics = [#tpu.dimension_semantics<arbitrary>], iteration_bounds = array<i64: 4>, scalar_prefetch = 0 : i64, scratch_operands = 1 : i64, tpu.core_type = #tpu.core_type<tc>, window_params = [{transform_indices = @transform_0, window_bounds = array<i64: 32, 512>}, {transform_indices = @transform_1, window_bounds = array<i64: 512, 256>}, {pipeline_mode = #tpu.pipeline_mode<synchronous>, transform_indices = @transform_2, window_bounds = array<i64: 1, 256>}, {pipeline_mode = #tpu.pipeline_mode<synchronous>, transform_indices = @transform_3, window_bounds = array<i64: 1, 256>}, {pipeline_mode = #tpu.pipeline_mode<synchronous>, transform_indices = @transform_4, window_bounds = array<i64: 32, 256>}]} {
    %c0_i32 = arith.constant 0 : i32
    %0 = arith.cmpi eq, %arg0, %c0_i32 : i32
    %1 = arith.extui %0 : i1 to i32
    %c0_i32_0 = arith.constant 0 : i32
    %2 = arith.cmpi ne, %1, %c0_i32_0 : i32
    scf.if %2 {
      %cst_9 = arith.constant 0.000000e+00 : f32
      %12 = vector.broadcast %cst_9 : f32 to vector<32x256xf32>
      %c0_10 = arith.constant 0 : index
      %c0_11 = arith.constant 0 : index
      %13 = vector.load %arg6[%c0_10, %c0_11] : memref<32x256xf32, #tpu.memory_space<vmem>>, vector<32x256xf32>
      tpu.vector_store %arg6[%c0_10, %c0_11], %12 {strides = array<i32>} : memref<32x256xf32, #tpu.memory_space<vmem>>, vector<32x256xf32>,
    } else {
    }
    %c0 = arith.constant 0 : index
    %c0_1 = arith.constant 0 : index
    %3 = vector.load %arg6[%c0, %c0_1] : memref<32x256xf32, #tpu.memory_space<vmem>>, vector<32x256xf32>
    %c0_2 = arith.constant 0 : index
    %c0_3 = arith.constant 0 : index
    %4 = vector.load %arg1[%c0_2, %c0_3] : memref<32x512xbf16, #tpu.memory_space<vmem>>, vector<32x512xbf16>
    %c0_4 = arith.constant 0 : index
    %c0_5 = arith.constant 0 : index
    %5 = vector.load %arg2[%c0_4, %c0_5] : memref<512x256xbf16, #tpu.memory_space<vmem>>, vector<512x256xbf16>
    %cst = arith.constant dense<0.000000e+00> : vector<32x256xf32>
    %6 = tpu.matmul %4, %5, %cst {dimension_numbers = #tpu.dot_dimension_numbers<[1], [0], [0], [1], [0, 0, 1, 1], [], []>} : vector<32x512xbf16>, vector<512x256xbf16>, vector<32x256xf32> -> vector<32x256xf32>
    %7 = arith.addf %3, %6 : vector<32x256xf32>
    %c0_6 = arith.constant 0 : index
    %c0_7 = arith.constant 0 : index
    %8 = vector.load %arg6[%c0_6, %c0_7] : memref<32x256xf32, #tpu.memory_space<vmem>>, vector<32x256xf32>
    tpu.vector_store %arg6[%c0_6, %c0_7], %7 {strides = array<i32>} : memref<32x256xf32, #tpu.memory_space<vmem>>, vector<32x256xf32>,
    %c3_i32 = arith.constant 3 : i32
    %9 = arith.cmpi eq, %arg0, %c3_i32 : i32
    %10 = arith.extui %9 : i1 to i32
    %c0_i32_8 = arith.constant 0 : i32
    %11 = arith.cmpi ne, %10, %c0_i32_8 : i32
    scf.if %11 {
      %c0_9 = arith.constant 0 : index
      %c0_10 = arith.constant 0 : index
      %12 = vector.load %arg6[%c0_9, %c0_10] : memref<32x256xf32, #tpu.memory_space<vmem>>, vector<32x256xf32>
      %cst_11 = arith.constant dense<0.000000e+00> : vector<256xf32>
      %13 = vector.multi_reduction <add>, %12, %cst_11 [0] : vector<32x256xf32> to vector<256xf32>
      %14 = vector.shape_cast %13 : vector<256xf32> to vector<1x256xf32>
      %cst_12 = arith.constant 3.200000e+01 : f32
      %15 = vector.broadcast %cst_12 : f32 to vector<1x256xf32>
      %16 = arith.divf %14, %15 : vector<1x256xf32>
      %17 = arith.mulf %12, %12 : vector<32x256xf32>
      %cst_13 = arith.constant dense<0.000000e+00> : vector<256xf32>
      %18 = vector.multi_reduction <add>, %17, %cst_13 [0] : vector<32x256xf32> to vector<256xf32>
      %19 = vector.shape_cast %18 : vector<256xf32> to vector<1x256xf32>
      %cst_14 = arith.constant 3.200000e+01 : f32
      %20 = vector.broadcast %cst_14 : f32 to vector<1x256xf32>
      %21 = arith.divf %19, %20 : vector<1x256xf32>
      %22 = arith.mulf %16, %16 : vector<1x256xf32>
      %23 = arith.subf %21, %22 : vector<1x256xf32>
      %24 = vector.broadcast %16 : vector<1x256xf32> to vector<32x256xf32>
      %25 = arith.subf %12, %24 : vector<32x256xf32>
      %cst_15 = arith.constant 9.99999974E-6 : f32
      %26 = vector.broadcast %cst_15 : f32 to vector<1x256xf32>
      %27 = arith.addf %23, %26 : vector<1x256xf32>
      %28 = math.rsqrt %27 : vector<1x256xf32>
      %29 = vector.broadcast %28 : vector<1x256xf32> to vector<32x256xf32>
      %30 = arith.mulf %25, %29 : vector<32x256xf32>
      %c0_16 = arith.constant 0 : index
      %c0_17 = arith.constant 0 : index
      %31 = vector.load %arg3[%c0_16, %c0_17] : memref<1x256xf32, #tpu.memory_space<vmem>>, vector<1x256xf32>
      %32 = vector.broadcast %31 : vector<1x256xf32> to vector<32x256xf32>
      %33 = arith.mulf %30, %32 : vector<32x256xf32>
      %c0_18 = arith.constant 0 : index
      %c0_19 = arith.constant 0 : index
      %34 = vector.load %arg4[%c0_18, %c0_19] : memref<1x256xf32, #tpu.memory_space<vmem>>, vector<1x256xf32>
      %35 = vector.broadcast %34 : vector<1x256xf32> to vector<32x256xf32>
      %36 = arith.addf %33, %35 : vector<32x256xf32>
      %cst_20 = arith.constant 0.000000e+00 : f32
      %37 = vector.broadcast %cst_20 : f32 to vector<32x256xf32>
      %38 = arith.cmpf oge, %36, %37 : vector<32x256xf32>
      %cst_21 = arith.constant 0.00999999977 : f32
      %39 = vector.broadcast %cst_21 : f32 to vector<32x256xf32>
      %40 = arith.mulf %39, %36 : vector<32x256xf32>
      %41 = arith.select %38, %36, %40 : vector<32x256xi1>, vector<32x256xf32>
      %42 = arith.truncf %41 : vector<32x256xf32> to vector<32x256xbf16>
      %c0_22 = arith.constant 0 : index
      %c0_23 = arith.constant 0 : index
      %43 = vector.load %arg5[%c0_22, %c0_23] : memref<32x256xbf16, #tpu.memory_space<vmem>>, vector<32x256xbf16>
      tpu.vector_store %arg5[%c0_22, %c0_23], %42 {strides = array<i32>} : memref<32x256xbf16, #tpu.memory_space<vmem>>, vector<32x256xbf16>,
    } else {
    }
    return
  }
  func.func @transform_0(%arg0: i32) -> (i32, i32) {
    %c0_i32 = arith.constant 0 : i32
    %c0_i32_0 = arith.constant 0 : i32
    return %c0_i32, %arg0 : i32, i32
  }
  func.func @transform_1(%arg0: i32) -> (i32, i32) {
    %c0_i32 = arith.constant 0 : i32
    %c0_i32_0 = arith.constant 0 : i32
    return %arg0, %c0_i32 : i32, i32
  }
  func.func @transform_2(%arg0: i32) -> (i32, i32) {
    %c0_i32 = arith.constant 0 : i32
    %c0_i32_0 = arith.constant 0 : i32
    %c0_i32_1 = arith.constant 0 : i32
    return %c0_i32, %c0_i32_0 : i32, i32
  }
  func.func @transform_3(%arg0: i32) -> (i32, i32) {
    %c0_i32 = arith.constant 0 : i32
    %c0_i32_0 = arith.constant 0 : i32
    %c0_i32_1 = arith.constant 0 : i32
    return %c0_i32, %c0_i32_0 : i32, i32
  }
  func.func @transform_4(%arg0: i32) -> (i32, i32) {
    %c0_i32 = arith.constant 0 : i32
    %c0_i32_0 = arith.constant 0 : i32
    %c0_i32_1 = arith.constant 0 : i32
    return %c0_i32, %c0_i32_0 : i32, i32
  }
}

module attributes {stable_mosaic.version = 11 : i64} {
  func.func @_mm_bn_leaky_kernel(%arg0: i32, %arg1: memref<8x512xbf16, #tpu.memory_space<vmem>>, %arg2: memref<512x512xbf16, #tpu.memory_space<vmem>>, %arg3: memref<1x512xf32, #tpu.memory_space<vmem>>, %arg4: memref<1x512xf32, #tpu.memory_space<vmem>>, %arg5: memref<8x512xbf16, #tpu.memory_space<vmem>>, %arg6: memref<8x512xf32, #tpu.memory_space<vmem>>) attributes {dimension_semantics = [#tpu.dimension_semantics<arbitrary>], iteration_bounds = array<i64: 8>, scalar_prefetch = 0 : i64, scratch_operands = 1 : i64, tpu.core_type = #tpu.core_type<tc>, window_params = [{transform_indices = @transform_0, window_bounds = array<i64: 8, 512>}, {transform_indices = @transform_1, window_bounds = array<i64: 512, 512>}, {pipeline_mode = #tpu.pipeline_mode<synchronous>, transform_indices = @transform_2, window_bounds = array<i64: 1, 512>}, {pipeline_mode = #tpu.pipeline_mode<synchronous>, transform_indices = @transform_3, window_bounds = array<i64: 1, 512>}, {pipeline_mode = #tpu.pipeline_mode<synchronous>, transform_indices = @transform_4, window_bounds = array<i64: 8, 512>}]} {
    %c0_i32 = arith.constant 0 : i32
    %0 = arith.cmpi eq, %arg0, %c0_i32 : i32
    %1 = arith.extui %0 : i1 to i32
    %c0_i32_0 = arith.constant 0 : i32
    %2 = arith.cmpi ne, %1, %c0_i32_0 : i32
    scf.if %2 {
      %cst_9 = arith.constant 0.000000e+00 : f32
      %12 = vector.broadcast %cst_9 : f32 to vector<8x512xf32>
      %c0_10 = arith.constant 0 : index
      %c0_11 = arith.constant 0 : index
      %13 = vector.load %arg6[%c0_10, %c0_11] : memref<8x512xf32, #tpu.memory_space<vmem>>, vector<8x512xf32>
      tpu.vector_store %arg6[%c0_10, %c0_11], %12 {strides = array<i32>} : memref<8x512xf32, #tpu.memory_space<vmem>>, vector<8x512xf32>,
    } else {
    }
    %c0 = arith.constant 0 : index
    %c0_1 = arith.constant 0 : index
    %3 = vector.load %arg6[%c0, %c0_1] : memref<8x512xf32, #tpu.memory_space<vmem>>, vector<8x512xf32>
    %c0_2 = arith.constant 0 : index
    %c0_3 = arith.constant 0 : index
    %4 = vector.load %arg1[%c0_2, %c0_3] : memref<8x512xbf16, #tpu.memory_space<vmem>>, vector<8x512xbf16>
    %c0_4 = arith.constant 0 : index
    %c0_5 = arith.constant 0 : index
    %5 = vector.load %arg2[%c0_4, %c0_5] : memref<512x512xbf16, #tpu.memory_space<vmem>>, vector<512x512xbf16>
    %cst = arith.constant dense<0.000000e+00> : vector<8x512xf32>
    %6 = tpu.matmul %4, %5, %cst {dimension_numbers = #tpu.dot_dimension_numbers<[1], [0], [0], [1], [0, 0, 1, 1], [], []>} : vector<8x512xbf16>, vector<512x512xbf16>, vector<8x512xf32> -> vector<8x512xf32>
    %7 = arith.addf %3, %6 : vector<8x512xf32>
    %c0_6 = arith.constant 0 : index
    %c0_7 = arith.constant 0 : index
    %8 = vector.load %arg6[%c0_6, %c0_7] : memref<8x512xf32, #tpu.memory_space<vmem>>, vector<8x512xf32>
    tpu.vector_store %arg6[%c0_6, %c0_7], %7 {strides = array<i32>} : memref<8x512xf32, #tpu.memory_space<vmem>>, vector<8x512xf32>,
    %c7_i32 = arith.constant 7 : i32
    %9 = arith.cmpi eq, %arg0, %c7_i32 : i32
    %10 = arith.extui %9 : i1 to i32
    %c0_i32_8 = arith.constant 0 : i32
    %11 = arith.cmpi ne, %10, %c0_i32_8 : i32
    scf.if %11 {
      %c0_9 = arith.constant 0 : index
      %c0_10 = arith.constant 0 : index
      %12 = vector.load %arg6[%c0_9, %c0_10] : memref<8x512xf32, #tpu.memory_space<vmem>>, vector<8x512xf32>
      %cst_11 = arith.constant dense<0.000000e+00> : vector<512xf32>
      %13 = vector.multi_reduction <add>, %12, %cst_11 [0] : vector<8x512xf32> to vector<512xf32>
      %14 = vector.shape_cast %13 : vector<512xf32> to vector<1x512xf32>
      %cst_12 = arith.constant 8.000000e+00 : f32
      %15 = vector.broadcast %cst_12 : f32 to vector<1x512xf32>
      %16 = arith.divf %14, %15 : vector<1x512xf32>
      %17 = arith.mulf %12, %12 : vector<8x512xf32>
      %cst_13 = arith.constant dense<0.000000e+00> : vector<512xf32>
      %18 = vector.multi_reduction <add>, %17, %cst_13 [0] : vector<8x512xf32> to vector<512xf32>
      %19 = vector.shape_cast %18 : vector<512xf32> to vector<1x512xf32>
      %cst_14 = arith.constant 8.000000e+00 : f32
      %20 = vector.broadcast %cst_14 : f32 to vector<1x512xf32>
      %21 = arith.divf %19, %20 : vector<1x512xf32>
      %22 = arith.mulf %16, %16 : vector<1x512xf32>
      %23 = arith.subf %21, %22 : vector<1x512xf32>
      %24 = vector.broadcast %16 : vector<1x512xf32> to vector<8x512xf32>
      %25 = arith.subf %12, %24 : vector<8x512xf32>
      %cst_15 = arith.constant 9.99999974E-6 : f32
      %26 = vector.broadcast %cst_15 : f32 to vector<1x512xf32>
      %27 = arith.addf %23, %26 : vector<1x512xf32>
      %28 = math.rsqrt %27 : vector<1x512xf32>
      %29 = vector.broadcast %28 : vector<1x512xf32> to vector<8x512xf32>
      %30 = arith.mulf %25, %29 : vector<8x512xf32>
      %c0_16 = arith.constant 0 : index
      %c0_17 = arith.constant 0 : index
      %31 = vector.load %arg3[%c0_16, %c0_17] : memref<1x512xf32, #tpu.memory_space<vmem>>, vector<1x512xf32>
      %32 = vector.broadcast %31 : vector<1x512xf32> to vector<8x512xf32>
      %33 = arith.mulf %30, %32 : vector<8x512xf32>
      %c0_18 = arith.constant 0 : index
      %c0_19 = arith.constant 0 : index
      %34 = vector.load %arg4[%c0_18, %c0_19] : memref<1x512xf32, #tpu.memory_space<vmem>>, vector<1x512xf32>
      %35 = vector.broadcast %34 : vector<1x512xf32> to vector<8x512xf32>
      %36 = arith.addf %33, %35 : vector<8x512xf32>
      %cst_20 = arith.constant 0.000000e+00 : f32
      %37 = vector.broadcast %cst_20 : f32 to vector<8x512xf32>
      %38 = arith.cmpf oge, %36, %37 : vector<8x512xf32>
      %cst_21 = arith.constant 0.00999999977 : f32
      %39 = vector.broadcast %cst_21 : f32 to vector<8x512xf32>
      %40 = arith.mulf %39, %36 : vector<8x512xf32>
      %41 = arith.select %38, %36, %40 : vector<8x512xi1>, vector<8x512xf32>
      %42 = arith.truncf %41 : vector<8x512xf32> to vector<8x512xbf16>
      %c0_22 = arith.constant 0 : index
      %c0_23 = arith.constant 0 : index
      %43 = vector.load %arg5[%c0_22, %c0_23] : memref<8x512xbf16, #tpu.memory_space<vmem>>, vector<8x512xbf16>
      tpu.vector_store %arg5[%c0_22, %c0_23], %42 {strides = array<i32>} : memref<8x512xbf16, #tpu.memory_space<vmem>>, vector<8x512xbf16>,
    } else {
    }
    return
  }
  func.func @transform_0(%arg0: i32) -> (i32, i32) {
    %c0_i32 = arith.constant 0 : i32
    %c0_i32_0 = arith.constant 0 : i32
    return %c0_i32, %arg0 : i32, i32
  }
  func.func @transform_1(%arg0: i32) -> (i32, i32) {
    %c0_i32 = arith.constant 0 : i32
    %c0_i32_0 = arith.constant 0 : i32
    return %arg0, %c0_i32 : i32, i32
  }
  func.func @transform_2(%arg0: i32) -> (i32, i32) {
    %c0_i32 = arith.constant 0 : i32
    %c0_i32_0 = arith.constant 0 : i32
    %c0_i32_1 = arith.constant 0 : i32
    return %c0_i32, %c0_i32_0 : i32, i32
  }
  func.func @transform_3(%arg0: i32) -> (i32, i32) {
    %c0_i32 = arith.constant 0 : i32
    %c0_i32_0 = arith.constant 0 : i32
    %c0_i32_1 = arith.constant 0 : i32
    return %c0_i32, %c0_i32_0 : i32, i32
  }
  func.func @transform_4(%arg0: i32) -> (i32, i32) {
    %c0_i32 = arith.constant 0 : i32
    %c0_i32_0 = arith.constant 0 : i32
    %c0_i32_1 = arith.constant 0 : i32
    return %c0_i32, %c0_i32_0 : i32, i32
  }
}

module attributes {stable_mosaic.version = 11 : i64} {
  func.func @_mm_act_kernel(%arg0: i32, %arg1: memref<8x512xbf16, #tpu.memory_space<vmem>>, %arg2: memref<512x128xbf16, #tpu.memory_space<vmem>>, %arg3: memref<8x128xf32, #tpu.memory_space<vmem>>) attributes {dimension_semantics = [#tpu.dimension_semantics<parallel>], iteration_bounds = array<i64: 1>, scalar_prefetch = 0 : i64, scratch_operands = 0 : i64, tpu.core_type = #tpu.core_type<tc>, window_params = [{transform_indices = @transform_0, window_bounds = array<i64: 8, 512>}, {pipeline_mode = #tpu.pipeline_mode<synchronous>, transform_indices = @transform_1, window_bounds = array<i64: 512, 128>}, {transform_indices = @transform_2, window_bounds = array<i64: 8, 128>}]} {
    %c0 = arith.constant 0 : index
    %c0_0 = arith.constant 0 : index
    %0 = vector.load %arg1[%c0, %c0_0] : memref<8x512xbf16, #tpu.memory_space<vmem>>, vector<8x512xbf16>
    %c0_1 = arith.constant 0 : index
    %c0_2 = arith.constant 0 : index
    %1 = vector.load %arg2[%c0_1, %c0_2] : memref<512x128xbf16, #tpu.memory_space<vmem>>, vector<512x128xbf16>
    %cst = arith.constant dense<0.000000e+00> : vector<8x128xf32>
    %2 = tpu.matmul %0, %1, %cst {dimension_numbers = #tpu.dot_dimension_numbers<[1], [0], [0], [1], [0, 0, 1, 1], [], []>} : vector<8x512xbf16>, vector<512x128xbf16>, vector<8x128xf32> -> vector<8x128xf32>
    %3 = math.tanh %2 : vector<8x128xf32>
    %c0_3 = arith.constant 0 : index
    %c0_4 = arith.constant 0 : index
    %4 = vector.load %arg3[%c0_3, %c0_4] : memref<8x128xf32, #tpu.memory_space<vmem>>, vector<8x128xf32>
    tpu.vector_store %arg3[%c0_3, %c0_4], %3 {strides = array<i32>} : memref<8x128xf32, #tpu.memory_space<vmem>>, vector<8x128xf32>,
    return
  }
  func.func @transform_0(%arg0: i32) -> (i32, i32) {
    %c0_i32 = arith.constant 0 : i32
    %c0_i32_0 = arith.constant 0 : i32
    return %arg0, %c0_i32 : i32, i32
  }
  func.func @transform_1(%arg0: i32) -> (i32, i32) {
    %c0_i32 = arith.constant 0 : i32
    %c0_i32_0 = arith.constant 0 : i32
    %c0_i32_1 = arith.constant 0 : i32
    return %c0_i32, %c0_i32_0 : i32, i32
  }
  func.func @transform_2(%arg0: i32) -> (i32, i32) {
    %c0_i32 = arith.constant 0 : i32
    %c0_i32_0 = arith.constant 0 : i32
    return %arg0, %c0_i32 : i32, i32
  }
}

</mosaic_0001>

<bundles_post_ra>
// kernel: encoder_forward.5
= control target key start
LH: loop header
LB: loop body
LE: loop exit
PB: predicated region body
PF: predicated region fallthrough
CT: control target
= control target key end

     0   :  { %vm244_vm0 = vcmask 130048   ;;  %s1915_s1 = inlined_call_operand.vmem [shape: bf16[16,128], index: 1, kind: input, shape index: {}]   ;;  %s1916_s0 = inlined_call_operand.vmem [shape: bf16[512,16], index: 0, kind: input, shape index: {}]   ;;  %s1917_s2 = inlined_call_operand.vmem [shape: bf16[512,128], index: 2, kind: output, shape index: {}]  }
   0x1   :  { %v1631_v0 = vld [vmem:[%s1915_s1] sm:$0xff]   ;;  %v1634_v3 = vld [vmem:[%s1916_s0 + $0x8] sm:$0xff]   ;;  %v1636_v5 = vld [vmem:[%s1916_s0 + $0x10] sm:$0xff]  }
   0x2   :  { %v1632_v1 = vld [vmem:[%s1916_s0] sm:$0xff]   ;;  %1563 = vmatprep.subr.bf16.mxu0 %v1631_v0  ;;  %1629 = vmatprep.subr.bf16.mxu1 %v1631_v0  ;;  %v1635_v4 = vld [vmem:[%s1916_s0 + $0x88] sm:$0xff]   ;;  %v1637_v6 = vld [vmem:[%s1916_s0 + $0x90] sm:$0xff]  }
   0x3   :  { %v1633_v2 = vld [vmem:[%s1916_s0 + $0x80] sm:$0xff]   ;;  %1564 = vmatpush3.bf16.msra.mxu0 %v1631_v0  ;;  %1630 = vmatpush3.bf16.msra.mxu1 %v1631_v0  ;;  %v1638_v7 = vld [vmem:[%s1916_s0 + $0x18] sm:$0xff]   ;;  %v1642_v11 = vld [vmem:[%s1916_s0 + $0x28] sm:$0xff]  }
   0x4   :  { %1565 = vmatprep.mubr.msk.bf16.mxu0 %vm244_vm0, %v1632_v1  ;;  %1597 = vmatprep.mubr.msk.bf16.mxu1 %vm244_vm0, %v1633_v2  ;;  %v1639_v8 = vld [vmem:[%s1916_s0 + $0x98] sm:$0xff]   ;;  %v1640_v9 = vld [vmem:[%s1916_s0 + $0x20] sm:$0xff]   ;;  %v1643_v12 = vld [vmem:[%s1916_s0 + $0xa8] sm:$0xff]  }
   0x5   :  { %v1641_v10 = vld [vmem:[%s1916_s0 + $0xa0] sm:$0xff]   ;;  %v1644_v13 = vld [vmem:[%s1916_s0 + $0x30] sm:$0xff]   ;;  %v1646_v15 = vld [vmem:[%s1916_s0 + $0x38] sm:$0xff]  }
   0x6   :  { %1566 = vmatmul.mubr.msk.bf16.vlgmr.msra.gmra.mxu0 %vm244_vm0, %v1634_v3  ;;  %1598 = vmatmul.mubr.msk.bf16.vlgmr.msra.gmra.mxu1 %vm244_vm0, %v1635_v4  ;;  %v1645_v14 = vld [vmem:[%s1916_s0 + $0xb0] sm:$0xff]   ;;  %v1647_v16 = vld [vmem:[%s1916_s0 + $0xb8] sm:$0xff]   ;;  %v1648_v17 = vld [vmem:[%s1916_s0 + $0x40] sm:$0xff]  }
   0x7   :  { %1569 = vmatprep.mubr.msk.bf16.mxu0 %vm244_vm0, %v1636_v5  ;;  %1601 = vmatprep.mubr.msk.bf16.mxu1 %vm244_vm0, %v1637_v6  ;;  %v1649_v18 = vld [vmem:[%s1916_s0 + $0xc0] sm:$0xff]   ;;  %v1650_v19 = vld [vmem:[%s1916_s0 + $0x48] sm:$0xff]   ;;  %v1652_v21 = vld [vmem:[%s1916_s0 + $0x50] sm:$0xff]  }
   0x8   :  { %v1651_v20 = vld [vmem:[%s1916_s0 + $0xc8] sm:$0xff]   ;;  %v1653_v22 = vld [vmem:[%s1916_s0 + $0xd0] sm:$0xff]   ;;  %v1654_v23 = vld [vmem:[%s1916_s0 + $0x58] sm:$0xff]  }
   0x9   :  { %v1655_v24 = vld [vmem:[%s1916_s0 + $0xd8] sm:$0xff]   ;;  %v1656_v25 = vld [vmem:[%s1916_s0 + $0x60] sm:$0xff]   ;;  %v1658_v27 = vld [vmem:[%s1916_s0 + $0x68] sm:$0xff]  }
   0xa   :  { %v1657_v26 = vld [vmem:[%s1916_s0 + $0xe0] sm:$0xff]   ;;  %v1659_v28 = vld [vmem:[%s1916_s0 + $0xe8] sm:$0xff]   ;;  %v1660_v29 = vld [vmem:[%s1916_s0 + $0x70] sm:$0xff]  }
   0xb   :  { %v1661_v30 = vld [vmem:[%s1916_s0 + $0xf0] sm:$0xff]   ;;  %v1662_v31 = vld [vmem:[%s1916_s0 + $0x78] sm:$0xff]  }
   0xc   :  { %v1663_v32 = vld [vmem:[%s1916_s0 + $0xf8] sm:$0xff]  }
   0xe   :  { %1570 = vmatmul.mubr.msk.bf16.gmra.mxu0 %vm244_vm0, %v1638_v7  ;;  %1602 = vmatmul.mubr.msk.bf16.gmra.mxu1 %vm244_vm0, %v1639_v8 }
   0xf   :  { %1573 = vmatprep.mubr.msk.bf16.mxu0 %vm244_vm0, %v1640_v9  ;;  %1605 = vmatprep.mubr.msk.bf16.mxu1 %vm244_vm0, %v1641_v10 }
  0x16   :  { %1574 = vmatmul.mubr.msk.bf16.gmra.mxu0 %vm244_vm0, %v1642_v11  ;;  %1606 = vmatmul.mubr.msk.bf16.gmra.mxu1 %vm244_vm0, %v1643_v12 }
  0x17   :  { %1577 = vmatprep.mubr.msk.bf16.mxu0 %vm244_vm0, %v1644_v13  ;;  %1609 = vmatprep.mubr.msk.bf16.mxu1 %vm244_vm0, %v1645_v14 }
  0x1e   :  { %1578 = vmatmul.mubr.msk.bf16.gmra.mxu0 %vm244_vm0, %v1646_v15  ;;  %1610 = vmatmul.mubr.msk.bf16.gmra.mxu1 %vm244_vm0, %v1647_v16 }
  0x1f   :  { %1581 = vmatprep.mubr.msk.bf16.mxu0 %vm244_vm0, %v1648_v17  ;;  %1613 = vmatprep.mubr.msk.bf16.mxu1 %vm244_vm0, %v1649_v18 }
  0x26   :  { %1582 = vmatmul.mubr.msk.bf16.gmra.mxu0 %vm244_vm0, %v1650_v19  ;;  %1614 = vmatmul.mubr.msk.bf16.gmra.mxu1 %vm244_vm0, %v1651_v20 }
  0x27   :  { %1585 = vmatprep.mubr.msk.bf16.mxu0 %vm244_vm0, %v1652_v21  ;;  %1617 = vmatprep.mubr.msk.bf16.mxu1 %vm244_vm0, %v1653_v22 }
  0x2e   :  { %1586 = vmatmul.mubr.msk.bf16.gmra.mxu0 %vm244_vm0, %v1654_v23  ;;  %1618 = vmatmul.mubr.msk.bf16.gmra.mxu1 %vm244_vm0, %v1655_v24 }
  0x2f   :  { %1589 = vmatprep.mubr.msk.bf16.mxu0 %vm244_vm0, %v1656_v25  ;;  %1621 = vmatprep.mubr.msk.bf16.mxu1 %vm244_vm0, %v1657_v26 }
  0x36   :  { %1590 = vmatmul.mubr.msk.bf16.gmra.mxu0 %vm244_vm0, %v1658_v27  ;;  %1622 = vmatmul.mubr.msk.bf16.gmra.mxu1 %vm244_vm0, %v1659_v28 }
  0x37   :  { %1593 = vmatprep.mubr.msk.bf16.mxu0 %vm244_vm0, %v1660_v29  ;;  %1625 = vmatprep.mubr.msk.bf16.mxu1 %vm244_vm0, %v1661_v30 }
  0x3e   :  { %1594 = vmatmul.mubr.msk.bf16.gmra.mxu0 %vm244_vm0, %v1662_v31  ;;  %1626 = vmatmul.mubr.msk.bf16.gmra.mxu1 %vm244_vm0, %v1663_v32 }
  0xc6   :  { %v1567_v33 = vpop.f32.mrf.mxu0  ;;  %v1599_v34 = vpop.f32.mrf.mxu1 }
  0xc7   :  { %vm632_vm1 = vcmp.ge.f32.partialorder %v1567_v33, 0.0  ;;  %v696_v35 = vmul.f32 0.01, %v1567_v33  ;;  %v728_v36 = vmul.f32 0.01, %v1599_v34  ;;  %vm664_vm2 = vcmp.ge.f32.partialorder %v1599_v34, 0.0 }
  0xc8   :  { %v375_v37 = vpop.f32.mrf.mxu0  ;;  %v503_v38 = vpop.f32.mrf.mxu1 }
  0xc9   :  { %v760_v39 = vsel %vm632_vm1, %v1567_v33, %v696_v35  ;;  %v694_v40 = vmul.f32 0.01, %v375_v37  ;;  %vm630_vm3 = vcmp.ge.f32.partialorder %v375_v37, 0.0  ;;  %v792_v44 = vsel %vm664_vm2, %v1599_v34, %v728_v36 }
  0xca   :  { %v1568_v41 = vpop.f32.mrf.mxu0  ;;  %v1600_v42 = vpop.f32.mrf.mxu1  ;;  %vm662_vm6 = vcmp.ge.f32.partialorder %v503_v38, 0.0  ;;  %v726_v45 = vmul.f32 0.01, %v503_v38 }
  0xcb   :  { %vm633_vm4 = vcmp.ge.f32.partialorder %v1568_v41, 0.0  ;;  %v697_v43 = vmul.f32 0.01, %v1568_v41  ;;  %vm665_vm5 = vcmp.ge.f32.partialorder %v1600_v42, 0.0  ;;  %v729_v46 = vmul.f32 0.01, %v1600_v42 }
  0xcc   :  { %v378_v47 = vpop.f32.mrf.mxu0  ;;  %v506_v48 = vpop.f32.mrf.mxu1  ;;  %v758_v51 = vsel %vm630_vm3, %v375_v37, %v694_v40  ;;  %v790_v60 = vsel %vm662_vm6, %v503_v38, %v726_v45 }
  0xcd   :  { %v761_v49 = vsel %vm633_vm4, %v1568_v41, %v697_v43  ;;  %vm631_vm7 = vcmp.ge.f32.partialorder %v378_v47, 0.0  ;;  %v695_v50 = vmul.f32 0.01, %v378_v47  ;;  %vm663_vm8 = vcmp.ge.f32.partialorder %v506_v48, 0.0 }
  0xce   :  { %v1347_v52 = vpack.c.bf16 %v761_v49, %v760_v39  ;;  %v793_v53 = vsel %vm665_vm5, %v1600_v42, %v729_v46  ;;  %v727_v54 = vmul.f32 0.01, %v506_v48  ;;  %v1571_v55 = vpop.f32.mrf.mxu0  ;;  %v1603_v56 = vpop.f32.mrf.mxu1 }
  0xcf   :  { %v1427_v57 = vpack.c.bf16 %v793_v53, %v792_v44  ;;  %v759_v58 = vsel %vm631_vm7, %v378_v47, %v695_v50  ;;  %vm636_vm9 = vcmp.ge.f32.partialorder %v1571_v55, 0.0  ;;  %v700_v59 = vmul.f32 0.01, %v1571_v55 }
  0xd0   :  { %1499 = vst [vmem:[%s1917_s2 + $0x8] sm:$0xff] %v1347_v52   ;;  %v1342_v61 = vpack.c.bf16 %v759_v58, %v758_v51  ;;  %v791_v62 = vsel %vm663_vm8, %v506_v48, %v727_v54  ;;  %v732_v63 = vmul.f32 0.01, %v1603_v56  ;;  %v391_v0 = vpop.f32.mrf.mxu0  ;;  %v519_v1 = vpop.f32.mrf.mxu1  ;;  %vm668_vm10 = vcmp.ge.f32.partialorder %v1603_v56, 0.0 }
  0xd1   :  { %1515 = vst [vmem:[%s1917_s2 + $0x88] sm:$0xff] %v1427_v57   ;;  %v1422_v2 = vpack.c.bf16 %v791_v62, %v790_v60  ;;  %v764_v3 = vsel %vm636_vm9, %v1571_v55, %v700_v59  ;;  %v698_v4 = vmul.f32 0.01, %v391_v0  ;;  %vm634_vm11 = vcmp.ge.f32.partialorder %v391_v0, 0.0 }
  0xd2   :  { %1343 = vst [vmem:[%s1917_s2] sm:$0xff] %v1342_v61   ;;  %v1572_v5 = vpop.f32.mrf.mxu0  ;;  %v1604_v6 = vpop.f32.mrf.mxu1  ;;  %v796_v8 = vsel %vm668_vm10, %v1603_v56, %v732_v63  ;;  %vm666_vm14 = vcmp.ge.f32.partialorder %v519_v1, 0.0  ;;  %v730_v9 = vmul.f32 0.01, %v519_v1 }
  0xd3   :  { %1514 = vst [vmem:[%s1917_s2 + $0x80] sm:$0xff] %v1422_v2   ;;  %vm637_vm12 = vcmp.ge.f32.partialorder %v1572_v5, 0.0  ;;  %v701_v7 = vmul.f32 0.01, %v1572_v5  ;;  %vm669_vm13 = vcmp.ge.f32.partialorder %v1604_v6, 0.0  ;;  %v762_v15 = vsel %vm634_vm11, %v391_v0, %v698_v4 }
  0xd4   :  { %v733_v10 = vmul.f32 0.01, %v1604_v6  ;;  %v394_v11 = vpop.f32.mrf.mxu0  ;;  %v522_v12 = vpop.f32.mrf.mxu1  ;;  %v794_v24 = vsel %vm666_vm14, %v519_v1, %v730_v9 }
  0xd5   :  { %v765_v13 = vsel %vm637_vm12, %v1572_v5, %v701_v7  ;;  %vm635_vm15 = vcmp.ge.f32.partialorder %v394_v11, 0.0  ;;  %v699_v14 = vmul.f32 0.01, %v394_v11  ;;  %vm667_vm0 = vcmp.ge.f32.partialorder %v522_v12, 0.0 }
  0xd6   :  { %v1357_v16 = vpack.c.bf16 %v765_v13, %v764_v3  ;;  %v797_v17 = vsel %vm669_vm13, %v1604_v6, %v733_v10  ;;  %v731_v18 = vmul.f32 0.01, %v522_v12  ;;  %v1575_v19 = vpop.f32.mrf.mxu0  ;;  %v1607_v20 = vpop.f32.mrf.mxu1 }
  0xd7   :  { %v1437_v21 = vpack.c.bf16 %v797_v17, %v796_v8  ;;  %v763_v22 = vsel %vm635_vm15, %v394_v11, %v699_v14  ;;  %vm640_vm1 = vcmp.ge.f32.partialorder %v1575_v19, 0.0  ;;  %v704_v23 = vmul.f32 0.01, %v1575_v19 }
  0xd8   :  { %1501 = vst [vmem:[%s1917_s2 + $0x18] sm:$0xff] %v1357_v16   ;;  %v1352_v25 = vpack.c.bf16 %v763_v22, %v762_v15  ;;  %v795_v26 = vsel %vm667_vm0, %v522_v12, %v731_v18  ;;  %v736_v27 = vmul.f32 0.01, %v1607_v20  ;;  %v407_v28 = vpop.f32.mrf.mxu0  ;;  %v535_v29 = vpop.f32.mrf.mxu1  ;;  %vm672_vm2 = vcmp.ge.f32.partialorder %v1607_v20, 0.0 }
  0xd9   :  { %1517 = vst [vmem:[%s1917_s2 + $0x98] sm:$0xff] %v1437_v21   ;;  %v1432_v30 = vpack.c.bf16 %v795_v26, %v794_v24  ;;  %v768_v31 = vsel %vm640_vm1, %v1575_v19, %v704_v23  ;;  %v702_v32 = vmul.f32 0.01, %v407_v28  ;;  %vm638_vm3 = vcmp.ge.f32.partialorder %v407_v28, 0.0 }
  0xda   :  { %1500 = vst [vmem:[%s1917_s2 + $0x10] sm:$0xff] %v1352_v25   ;;  %v1576_v33 = vpop.f32.mrf.mxu0  ;;  %v1608_v34 = vpop.f32.mrf.mxu1  ;;  %v800_v36 = vsel %vm672_vm2, %v1607_v20, %v736_v27  ;;  %vm670_vm6 = vcmp.ge.f32.partialorder %v535_v29, 0.0  ;;  %v734_v37 = vmul.f32 0.01, %v535_v29 }
  0xdb   :  { %1516 = vst [vmem:[%s1917_s2 + $0x90] sm:$0xff] %v1432_v30   ;;  %vm641_vm4 = vcmp.ge.f32.partialorder %v1576_v33, 0.0  ;;  %v705_v35 = vmul.f32 0.01, %v1576_v33  ;;  %vm673_vm5 = vcmp.ge.f32.partialorder %v1608_v34, 0.0  ;;  %v766_v43 = vsel %vm638_vm3, %v407_v28, %v702_v32 }
  0xdc   :  { %v737_v38 = vmul.f32 0.01, %v1608_v34  ;;  %v410_v39 = vpop.f32.mrf.mxu0  ;;  %v538_v40 = vpop.f32.mrf.mxu1  ;;  %v798_v52 = vsel %vm670_vm6, %v535_v29, %v734_v37 }
  0xdd   :  { %v769_v41 = vsel %vm641_vm4, %v1576_v33, %v705_v35  ;;  %vm639_vm7 = vcmp.ge.f32.partialorder %v410_v39, 0.0  ;;  %v703_v42 = vmul.f32 0.01, %v410_v39  ;;  %vm671_vm8 = vcmp.ge.f32.partialorder %v538_v40, 0.0 }
  0xde   :  { %v1367_v44 = vpack.c.bf16 %v769_v41, %v768_v31  ;;  %v801_v45 = vsel %vm673_vm5, %v1608_v34, %v737_v38  ;;  %v735_v46 = vmul.f32 0.01, %v538_v40  ;;  %v1579_v47 = vpop.f32.mrf.mxu0  ;;  %v1611_v48 = vpop.f32.mrf.mxu1 }
  0xdf   :  { %v1447_v49 = vpack.c.bf16 %v801_v45, %v800_v36  ;;  %v767_v50 = vsel %vm639_vm7, %v410_v39, %v703_v42  ;;  %vm644_vm9 = vcmp.ge.f32.partialorder %v1579_v47, 0.0  ;;  %v708_v51 = vmul.f32 0.01, %v1579_v47 }
  0xe0   :  { %1503 = vst [vmem:[%s1917_s2 + $0x28] sm:$0xff] %v1367_v44   ;;  %v1362_v53 = vpack.c.bf16 %v767_v50, %v766_v43  ;;  %v799_v54 = vsel %vm671_vm8, %v538_v40, %v735_v46  ;;  %v740_v55 = vmul.f32 0.01, %v1611_v48  ;;  %v423_v56 = vpop.f32.mrf.mxu0  ;;  %v551_v57 = vpop.f32.mrf.mxu1  ;;  %vm676_vm10 = vcmp.ge.f32.partialorder %v1611_v48, 0.0 }
  0xe1   :  { %1519 = vst [vmem:[%s1917_s2 + $0xa8] sm:$0xff] %v1447_v49   ;;  %v1442_v58 = vpack.c.bf16 %v799_v54, %v798_v52  ;;  %v772_v59 = vsel %vm644_vm9, %v1579_v47, %v708_v51  ;;  %v706_v60 = vmul.f32 0.01, %v423_v56  ;;  %vm642_vm11 = vcmp.ge.f32.partialorder %v423_v56, 0.0 }
  0xe2   :  { %1502 = vst [vmem:[%s1917_s2 + $0x20] sm:$0xff] %v1362_v53   ;;  %v1580_v61 = vpop.f32.mrf.mxu0  ;;  %v1612_v62 = vpop.f32.mrf.mxu1  ;;  %v804_v0 = vsel %vm676_vm10, %v1611_v48, %v740_v55  ;;  %vm674_vm14 = vcmp.ge.f32.partialorder %v551_v57, 0.0  ;;  %v738_v1 = vmul.f32 0.01, %v551_v57 }
  0xe3   :  { %1518 = vst [vmem:[%s1917_s2 + $0xa0] sm:$0xff] %v1442_v58   ;;  %vm645_vm12 = vcmp.ge.f32.partialorder %v1580_v61, 0.0  ;;  %v709_v63 = vmul.f32 0.01, %v1580_v61  ;;  %vm677_vm13 = vcmp.ge.f32.partialorder %v1612_v62, 0.0  ;;  %v770_v7 = vsel %vm642_vm11, %v423_v56, %v706_v60 }
  0xe4   :  { %v741_v2 = vmul.f32 0.01, %v1612_v62  ;;  %v426_v3 = vpop.f32.mrf.mxu0  ;;  %v554_v4 = vpop.f32.mrf.mxu1  ;;  %v802_v16 = vsel %vm674_vm14, %v551_v57, %v738_v1 }
  0xe5   :  { %v773_v5 = vsel %vm645_vm12, %v1580_v61, %v709_v63  ;;  %vm643_vm15 = vcmp.ge.f32.partialorder %v426_v3, 0.0  ;;  %v707_v6 = vmul.f32 0.01, %v426_v3  ;;  %vm675_vm0 = vcmp.ge.f32.partialorder %v554_v4, 0.0 }
  0xe6   :  { %v1377_v8 = vpack.c.bf16 %v773_v5, %v772_v59  ;;  %v805_v9 = vsel %vm677_vm13, %v1612_v62, %v741_v2  ;;  %v739_v10 = vmul.f32 0.01, %v554_v4  ;;  %v1583_v11 = vpop.f32.mrf.mxu0  ;;  %v1615_v12 = vpop.f32.mrf.mxu1 }
  0xe7   :  { %v1457_v13 = vpack.c.bf16 %v805_v9, %v804_v0  ;;  %v771_v14 = vsel %vm643_vm15, %v426_v3, %v707_v6  ;;  %vm648_vm1 = vcmp.ge.f32.partialorder %v1583_v11, 0.0  ;;  %v712_v15 = vmul.f32 0.01, %v1583_v11 }
  0xe8   :  { %1505 = vst [vmem:[%s1917_s2 + $0x38] sm:$0xff] %v1377_v8   ;;  %v1372_v17 = vpack.c.bf16 %v771_v14, %v770_v7  ;;  %v803_v18 = vsel %vm675_vm0, %v554_v4, %v739_v10  ;;  %v744_v19 = vmul.f32 0.01, %v1615_v12  ;;  %v439_v20 = vpop.f32.mrf.mxu0  ;;  %v567_v21 = vpop.f32.mrf.mxu1  ;;  %vm680_vm2 = vcmp.ge.f32.partialorder %v1615_v12, 0.0 }
  0xe9   :  { %1521 = vst [vmem:[%s1917_s2 + $0xb8] sm:$0xff] %v1457_v13   ;;  %v1452_v22 = vpack.c.bf16 %v803_v18, %v802_v16  ;;  %v776_v23 = vsel %vm648_vm1, %v1583_v11, %v712_v15  ;;  %v710_v24 = vmul.f32 0.01, %v439_v20  ;;  %vm646_vm3 = vcmp.ge.f32.partialorder %v439_v20, 0.0 }
  0xea   :  { %1504 = vst [vmem:[%s1917_s2 + $0x30] sm:$0xff] %v1372_v17   ;;  %v1584_v25 = vpop.f32.mrf.mxu0  ;;  %v1616_v26 = vpop.f32.mrf.mxu1  ;;  %v808_v28 = vsel %vm680_vm2, %v1615_v12, %v744_v19  ;;  %vm678_vm6 = vcmp.ge.f32.partialorder %v567_v21, 0.0  ;;  %v742_v29 = vmul.f32 0.01, %v567_v21 }
  0xeb   :  { %1520 = vst [vmem:[%s1917_s2 + $0xb0] sm:$0xff] %v1452_v22   ;;  %vm649_vm4 = vcmp.ge.f32.partialorder %v1584_v25, 0.0  ;;  %v713_v27 = vmul.f32 0.01, %v1584_v25  ;;  %vm681_vm5 = vcmp.ge.f32.partialorder %v1616_v26, 0.0  ;;  %v774_v35 = vsel %vm646_vm3, %v439_v20, %v710_v24 }
  0xec   :  { %v745_v30 = vmul.f32 0.01, %v1616_v26  ;;  %v442_v31 = vpop.f32.mrf.mxu0  ;;  %v570_v32 = vpop.f32.mrf.mxu1  ;;  %v806_v44 = vsel %vm678_vm6, %v567_v21, %v742_v29 }
  0xed   :  { %v777_v33 = vsel %vm649_vm4, %v1584_v25, %v713_v27  ;;  %vm647_vm7 = vcmp.ge.f32.partialorder %v442_v31, 0.0  ;;  %v711_v34 = vmul.f32 0.01, %v442_v31  ;;  %vm679_vm8 = vcmp.ge.f32.partialorder %v570_v32, 0.0 }
  0xee   :  { %v1387_v36 = vpack.c.bf16 %v777_v33, %v776_v23  ;;  %v809_v37 = vsel %vm681_vm5, %v1616_v26, %v745_v30  ;;  %v743_v38 = vmul.f32 0.01, %v570_v32  ;;  %v1587_v39 = vpop.f32.mrf.mxu0  ;;  %v1619_v40 = vpop.f32.mrf.mxu1 }
  0xef   :  { %v1467_v41 = vpack.c.bf16 %v809_v37, %v808_v28  ;;  %v775_v42 = vsel %vm647_vm7, %v442_v31, %v711_v34  ;;  %vm652_vm9 = vcmp.ge.f32.partialorder %v1587_v39, 0.0  ;;  %v716_v43 = vmul.f32 0.01, %v1587_v39 }
  0xf0   :  { %1507 = vst [vmem:[%s1917_s2 + $0x48] sm:$0xff] %v1387_v36   ;;  %v1382_v45 = vpack.c.bf16 %v775_v42, %v774_v35  ;;  %v807_v46 = vsel %vm679_vm8, %v570_v32, %v743_v38  ;;  %v748_v47 = vmul.f32 0.01, %v1619_v40  ;;  %v455_v48 = vpop.f32.mrf.mxu0  ;;  %v583_v49 = vpop.f32.mrf.mxu1  ;;  %vm684_vm10 = vcmp.ge.f32.partialorder %v1619_v40, 0.0 }
  0xf1   :  { %1523 = vst [vmem:[%s1917_s2 + $0xc8] sm:$0xff] %v1467_v41   ;;  %v1462_v50 = vpack.c.bf16 %v807_v46, %v806_v44  ;;  %v780_v51 = vsel %vm652_vm9, %v1587_v39, %v716_v43  ;;  %v714_v52 = vmul.f32 0.01, %v455_v48  ;;  %vm650_vm11 = vcmp.ge.f32.partialorder %v455_v48, 0.0 }
  0xf2   :  { %1506 = vst [vmem:[%s1917_s2 + $0x40] sm:$0xff] %v1382_v45   ;;  %v1588_v53 = vpop.f32.mrf.mxu0  ;;  %v1620_v54 = vpop.f32.mrf.mxu1  ;;  %v812_v56 = vsel %vm684_vm10, %v1619_v40, %v748_v47  ;;  %vm682_vm14 = vcmp.ge.f32.partialorder %v583_v49, 0.0  ;;  %v746_v57 = vmul.f32 0.01, %v583_v49 }
  0xf3   :  { %1522 = vst [vmem:[%s1917_s2 + $0xc0] sm:$0xff] %v1462_v50   ;;  %vm653_vm12 = vcmp.ge.f32.partialorder %v1588_v53, 0.0  ;;  %v717_v55 = vmul.f32 0.01, %v1588_v53  ;;  %vm685_vm13 = vcmp.ge.f32.partialorder %v1620_v54, 0.0  ;;  %v778_v63 = vsel %vm650_vm11, %v455_v48, %v714_v52 }
  0xf4   :  { %v749_v58 = vmul.f32 0.01, %v1620_v54  ;;  %v458_v59 = vpop.f32.mrf.mxu0  ;;  %v586_v60 = vpop.f32.mrf.mxu1  ;;  %v810_v8 = vsel %vm682_vm14, %v583_v49, %v746_v57 }
  0xf5   :  { %v781_v61 = vsel %vm653_vm12, %v1588_v53, %v717_v55  ;;  %vm651_vm15 = vcmp.ge.f32.partialorder %v458_v59, 0.0  ;;  %v715_v62 = vmul.f32 0.01, %v458_v59  ;;  %vm683_vm0 = vcmp.ge.f32.partialorder %v586_v60, 0.0 }
  0xf6   :  { %v1397_v0 = vpack.c.bf16 %v781_v61, %v780_v51  ;;  %v813_v1 = vsel %vm685_vm13, %v1620_v54, %v749_v58  ;;  %v747_v2 = vmul.f32 0.01, %v586_v60  ;;  %v1591_v3 = vpop.f32.mrf.mxu0  ;;  %v1623_v4 = vpop.f32.mrf.mxu1 }
  0xf7   :  { %v1477_v5 = vpack.c.bf16 %v813_v1, %v812_v56  ;;  %v779_v6 = vsel %vm651_vm15, %v458_v59, %v715_v62  ;;  %vm656_vm1 = vcmp.ge.f32.partialorder %v1591_v3, 0.0  ;;  %v720_v7 = vmul.f32 0.01, %v1591_v3 }
  0xf8   :  { %1509 = vst [vmem:[%s1917_s2 + $0x58] sm:$0xff] %v1397_v0   ;;  %v1392_v9 = vpack.c.bf16 %v779_v6, %v778_v63  ;;  %v811_v10 = vsel %vm683_vm0, %v586_v60, %v747_v2  ;;  %v752_v11 = vmul.f32 0.01, %v1623_v4  ;;  %v471_v12 = vpop.f32.mrf.mxu0  ;;  %v599_v13 = vpop.f32.mrf.mxu1  ;;  %vm688_vm2 = vcmp.ge.f32.partialorder %v1623_v4, 0.0 }
  0xf9   :  { %1525 = vst [vmem:[%s1917_s2 + $0xd8] sm:$0xff] %v1477_v5   ;;  %v1472_v14 = vpack.c.bf16 %v811_v10, %v810_v8  ;;  %v784_v15 = vsel %vm656_vm1, %v1591_v3, %v720_v7  ;;  %v718_v16 = vmul.f32 0.01, %v471_v12  ;;  %vm654_vm3 = vcmp.ge.f32.partialorder %v471_v12, 0.0 }
  0xfa   :  { %1508 = vst [vmem:[%s1917_s2 + $0x50] sm:$0xff] %v1392_v9   ;;  %v1592_v17 = vpop.f32.mrf.mxu0  ;;  %v1624_v18 = vpop.f32.mrf.mxu1  ;;  %v816_v20 = vsel %vm688_vm2, %v1623_v4, %v752_v11  ;;  %vm686_vm6 = vcmp.ge.f32.partialorder %v599_v13, 0.0  ;;  %v750_v21 = vmul.f32 0.01, %v599_v13 }
  0xfb   :  { %1524 = vst [vmem:[%s1917_s2 + $0xd0] sm:$0xff] %v1472_v14   ;;  %vm657_vm4 = vcmp.ge.f32.partialorder %v1592_v17, 0.0  ;;  %v721_v19 = vmul.f32 0.01, %v1592_v17  ;;  %vm689_vm5 = vcmp.ge.f32.partialorder %v1624_v18, 0.0  ;;  %v782_v27 = vsel %vm654_vm3, %v471_v12, %v718_v16 }
  0xfc   :  { %v753_v22 = vmul.f32 0.01, %v1624_v18  ;;  %v474_v23 = vpop.f32.mrf.mxu0  ;;  %v602_v24 = vpop.f32.mrf.mxu1  ;;  %v814_v36 = vsel %vm686_vm6, %v599_v13, %v750_v21 }
  0xfd   :  { %v785_v25 = vsel %vm657_vm4, %v1592_v17, %v721_v19  ;;  %vm655_vm7 = vcmp.ge.f32.partialorder %v474_v23, 0.0  ;;  %v719_v26 = vmul.f32 0.01, %v474_v23  ;;  %vm687_vm8 = vcmp.ge.f32.partialorder %v602_v24, 0.0 }
  0xfe   :  { %v1407_v28 = vpack.c.bf16 %v785_v25, %v784_v15  ;;  %v817_v29 = vsel %vm689_vm5, %v1624_v18, %v753_v22  ;;  %v751_v30 = vmul.f32 0.01, %v602_v24  ;;  %v1595_v31 = vpop.f32.mrf.mxu0  ;;  %v1627_v32 = vpop.f32.mrf.mxu1 }
  0xff   :  { %v1487_v33 = vpack.c.bf16 %v817_v29, %v816_v20  ;;  %v783_v34 = vsel %vm655_vm7, %v474_v23, %v719_v26  ;;  %vm660_vm9 = vcmp.ge.f32.partialorder %v1595_v31, 0.0  ;;  %v724_v35 = vmul.f32 0.01, %v1595_v31 }
 0x100   :  { %1511 = vst [vmem:[%s1917_s2 + $0x68] sm:$0xff] %v1407_v28   ;;  %v1402_v37 = vpack.c.bf16 %v783_v34, %v782_v27  ;;  %v815_v38 = vsel %vm687_vm8, %v602_v24, %v751_v30  ;;  %v487_v39 = vpop.f32.mrf.mxu0  ;;  %v615_v40 = vpop.f32.mrf.mxu1  ;;  %vm692_vm10 = vcmp.ge.f32.partialorder %v1627_v32, 0.0  ;;  %v756_v43 = vmul.f32 0.01, %v1627_v32 }
 0x101   :  { %1527 = vst [vmem:[%s1917_s2 + $0xe8] sm:$0xff] %v1487_v33   ;;  %v1482_v41 = vpack.c.bf16 %v815_v38, %v814_v36  ;;  %v788_v42 = vsel %vm660_vm9, %v1595_v31, %v724_v35  ;;  %v722_v46 = vmul.f32 0.01, %v487_v39  ;;  %vm658_vm13 = vcmp.ge.f32.partialorder %v487_v39, 0.0 }
 0x102   :  { %1510 = vst [vmem:[%s1917_s2 + $0x60] sm:$0xff] %v1402_v37   ;;  %v1596_v44 = vpop.f32.mrf.mxu0  ;;  %v1628_v45 = vpop.f32.mrf.mxu1  ;;  %vm690_vm14 = vcmp.ge.f32.partialorder %v615_v40, 0.0  ;;  %v754_v48 = vmul.f32 0.01, %v615_v40  ;;  %v820_v54 = vsel %vm692_vm10, %v1627_v32, %v756_v43 }
 0x103   :  { %1526 = vst [vmem:[%s1917_s2 + $0xe0] sm:$0xff] %v1482_v41   ;;  %vm661_vm11 = vcmp.ge.f32.partialorder %v1596_v44, 0.0  ;;  %v725_v47 = vmul.f32 0.01, %v1596_v44  ;;  %vm693_vm12 = vcmp.ge.f32.partialorder %v1628_v45, 0.0  ;;  %v786_v58 = vsel %vm658_vm13, %v487_v39, %v722_v46 }
 0x104   :  { %v757_v49 = vmul.f32 0.01, %v1628_v45  ;;  %v490_v50 = vpop.f32.mrf.mxu0  ;;  %v618_v51 = vpop.f32.mrf.mxu1  ;;  %v818_v61 = vsel %vm690_vm14, %v615_v40, %v754_v48 }
 0x105   :  { %v789_v52 = vsel %vm661_vm11, %v1596_v44, %v725_v47  ;;  %vm659_vm15 = vcmp.ge.f32.partialorder %v490_v50, 0.0  ;;  %v723_v53 = vmul.f32 0.01, %v490_v50  ;;  %vm691_vm0 = vcmp.ge.f32.partialorder %v618_v51, 0.0 }
 0x106   :  { %v1417_v55 = vpack.c.bf16 %v789_v52, %v788_v42  ;;  %v821_v56 = vsel %vm693_vm12, %v1628_v45, %v757_v49  ;;  %v755_v57 = vmul.f32 0.01, %v618_v51 }
 0x107   :  { %v1497_v59 = vpack.c.bf16 %v821_v56, %v820_v54  ;;  %v787_v60 = vsel %vm659_vm15, %v490_v50, %v723_v53 }
 0x108   :  { %1513 = vst [vmem:[%s1917_s2 + $0x78] sm:$0xff] %v1417_v55   ;;  %v1412_v62 = vpack.c.bf16 %v787_v60, %v786_v58  ;;  %v819_v63 = vsel %vm691_vm0, %v618_v51, %v755_v57 }
 0x109   :  { %1529 = vst [vmem:[%s1917_s2 + $0xf8] sm:$0xff] %v1497_v59   ;;  %v1492_v0 = vpack.c.bf16 %v819_v63, %v818_v61 }
 0x10a   :  { %1512 = vst [vmem:[%s1917_s2 + $0x70] sm:$0xff] %v1412_v62  }
 0x10b   :  { %1528 = vst [vmem:[%s1917_s2 + $0xf0] sm:$0xff] %v1492_v0  }

// kernel: encoder_forward.6
= control target key start
LH: loop header
LB: loop body
LE: loop exit
PB: predicated region body
PF: predicated region fallthrough
CT: control target
= control target key end

     0   :  { %s1781_s15 = smov 0   ;;  %s1783_s16 = smov 0   ;;  %s2184_s0 = inlined_call_operand.vmem [shape: bf16[128,1024], index: 0, kind: input, shape index: {}]   ;;  %s2185_s1 = inlined_call_operand.vmem [shape: bf16[1024,128], index: 1, kind: input, shape index: {}]   ;;  %s2186_s2 = inlined_call_operand.vmem [shape: f32[1,128], index: 2, kind: input, shape index: {}]   ;;  %s2187_s3 = inlined_call_operand.vmem [shape: f32[1,128], index: 3, kind: input, shape index: {}]   ;;  %s2188_s4 = inlined_call_operand.vmem [shape: bf16[128,128], index: 4, kind: output, shape index: {}]  }
   0x1   :  { %s1785_s17 = smov 0  }
   0x2 LB: > { %s1797_s18 = sadd.s32 4294967295, %s1753_s17   ;;  %s1800_s19 = sadd.s32 1, %s1753_s17   ;;  %s1753_s17 = sphi %s1785_s17, %s2191_s17   ;;  %s1749_s16 = sphi %s1783_s16, %s2190_s16   ;;  %s1745_s15 = sphi %s1781_s15, %s2189_s15  }
   0x3   : > { %s18_s20 = ssub.s32 %s1753_s17, %s1800_s19  ;;  %s21_s21 = sadd.s32 1, %s1749_s16 }
   0x4   : > { %p19_p0 = scmp.eq.s32.totalorder %s18_s20, 0  ;;  %p28_p1 = scmp.ne.s32.totalorder %s1749_s16, %s1745_s15 }
   0x5   : > { %p29_p2 = scmp.eq.s32.totalorder %s1753_s17, 0  ;;  %p1338_p4 = scmp.ge.s32.totalorder %s1753_s17, 2 }
   0x6   : > { %s1809_s22 = scalar_select %p19_p0, %s1749_s16, %s21_s21  }
   0x7   : > { %p30_p3 = por %p29_p2, %p28_p1  ;;  %149 = sbr.rel (%p1338_p4) target bundleno = 32 (0x20), region = 24 }
   0xc   : > { %152 = sbr.rel (!%p30_p3) target bundleno = 32 (0x20), region = 28  ;;  %s154_s23 = sand.u32 (%p30_p3), 1, %s1749_s16  }
   0xd   : > { %s1432_s24 = sshll.u32 (%p30_p3), %s1753_s17, 4  ;;  %s1339_s25 = sshll.u32 (%p30_p3), %s154_s23, 8 }
   0xe   : > { %s1817_s28 = scalar_lea.vmem (%p30_p3), %s2184_s0, %s1432_s24  ;;  %s1822_s29 = scalar_lea.vmem (%p30_p3), [#allocation3], %s1339_s25 }
   0xf   : > { %v172_v0 = vld [vmem:[%s1817_s28] sm:$0xff] (%p30_p3)  ;;  %v174_v1 = vld [vmem:[%s1817_s28 + $0x8] sm:$0xff] (%p30_p3) }
  0x10   : > { %v176_v2 = vld [vmem:[%s1817_s28 + $0x20] sm:$0xff] (%p30_p3)  ;;  %173 = vst [vmem:[%s1822_s29] sm:$0xff] (%p30_p3), %v172_v0  ;;  %175 = vst [vmem:[%s1822_s29 + $0x8] sm:$0xff] (%p30_p3), %v174_v1  ;;  %v178_v3 = vld [vmem:[%s1817_s28 + $0x28] sm:$0xff] (%p30_p3) }
  0x11   : > { %177 = vst [vmem:[%s1822_s29 + $0x10] sm:$0xff] %v176_v2  ;;  %v180_v4 = vld [vmem:[%s1817_s28 + $0x40] sm:$0xff]  ;;  %v182_v5 = vld [vmem:[%s1817_s28 + $0x48] sm:$0xff]  ;;  %179 = vst [vmem:[%s1822_s29 + $0x18] sm:$0xff] %v178_v3 }
  0x12   : > { %181 = vst [vmem:[%s1822_s29 + $0x20] sm:$0xff] %v180_v4  ;;  %183 = vst [vmem:[%s1822_s29 + $0x28] sm:$0xff] %v182_v5  ;;  %v184_v6 = vld [vmem:[%s1817_s28 + $0x60] sm:$0xff]  ;;  %v186_v7 = vld [vmem:[%s1817_s28 + $0x68] sm:$0xff] }
  0x13   : > { %v188_v8 = vld [vmem:[%s1817_s28 + $0x80] sm:$0xff]  ;;  %185 = vst [vmem:[%s1822_s29 + $0x30] sm:$0xff] %v184_v6  ;;  %187 = vst [vmem:[%s1822_s29 + $0x38] sm:$0xff] %v186_v7  ;;  %v190_v9 = vld [vmem:[%s1817_s28 + $0x88] sm:$0xff] }
  0x14   : > { %189 = vst [vmem:[%s1822_s29 + $0x40] sm:$0xff] %v188_v8  ;;  %v192_v10 = vld [vmem:[%s1817_s28 + $0xa0] sm:$0xff]  ;;  %v194_v11 = vld [vmem:[%s1817_s28 + $0xa8] sm:$0xff]  ;;  %191 = vst [vmem:[%s1822_s29 + $0x48] sm:$0xff] %v190_v9 }
  0x15   : > { %193 = vst [vmem:[%s1822_s29 + $0x50] sm:$0xff] %v192_v10  ;;  %195 = vst [vmem:[%s1822_s29 + $0x58] sm:$0xff] %v194_v11  ;;  %v196_v12 = vld [vmem:[%s1817_s28 + $0xc0] sm:$0xff]  ;;  %v198_v13 = vld [vmem:[%s1817_s28 + $0xc8] sm:$0xff] }
  0x16   : > { %v200_v14 = vld [vmem:[%s1817_s28 + $0xe0] sm:$0xff]  ;;  %197 = vst [vmem:[%s1822_s29 + $0x60] sm:$0xff] %v196_v12  ;;  %199 = vst [vmem:[%s1822_s29 + $0x68] sm:$0xff] %v198_v13  ;;  %v202_v15 = vld [vmem:[%s1817_s28 + $0xe8] sm:$0xff] }
  0x17   : > { %201 = vst [vmem:[%s1822_s29 + $0x70] sm:$0xff] %v200_v14  ;;  %v204_v16 = vld [vmem:[%s1817_s28 + $0x100] sm:$0xff]  ;;  %v206_v17 = vld [vmem:[%s1817_s28 + $0x108] sm:$0xff]  ;;  %203 = vst [vmem:[%s1822_s29 + $0x78] sm:$0xff] %v202_v15 }
  0x18   : > { %205 = vst [vmem:[%s1822_s29 + $0x80] sm:$0xff] %v204_v16  ;;  %207 = vst [vmem:[%s1822_s29 + $0x88] sm:$0xff] %v206_v17  ;;  %v208_v18 = vld [vmem:[%s1817_s28 + $0x120] sm:$0xff]  ;;  %v210_v19 = vld [vmem:[%s1817_s28 + $0x128] sm:$0xff] }
  0x19   : > { %v212_v20 = vld [vmem:[%s1817_s28 + $0x140] sm:$0xff]  ;;  %209 = vst [vmem:[%s1822_s29 + $0x90] sm:$0xff] %v208_v18  ;;  %211 = vst [vmem:[%s1822_s29 + $0x98] sm:$0xff] %v210_v19  ;;  %v214_v21 = vld [vmem:[%s1817_s28 + $0x148] sm:$0xff] }
  0x1a   : > { %213 = vst [vmem:[%s1822_s29 + $0xa0] sm:$0xff] %v212_v20  ;;  %v216_v22 = vld [vmem:[%s1817_s28 + $0x160] sm:$0xff]  ;;  %v218_v23 = vld [vmem:[%s1817_s28 + $0x168] sm:$0xff]  ;;  %215 = vst [vmem:[%s1822_s29 + $0xa8] sm:$0xff] %v214_v21 }
  0x1b   : > { %217 = vst [vmem:[%s1822_s29 + $0xb0] sm:$0xff] %v216_v22  ;;  %219 = vst [vmem:[%s1822_s29 + $0xb8] sm:$0xff] %v218_v23  ;;  %v220_v24 = vld [vmem:[%s1817_s28 + $0x180] sm:$0xff]  ;;  %v222_v25 = vld [vmem:[%s1817_s28 + $0x188] sm:$0xff] }
  0x1c   : > { %v224_v26 = vld [vmem:[%s1817_s28 + $0x1a0] sm:$0xff]  ;;  %221 = vst [vmem:[%s1822_s29 + $0xc0] sm:$0xff] %v220_v24  ;;  %223 = vst [vmem:[%s1822_s29 + $0xc8] sm:$0xff] %v222_v25  ;;  %v226_v27 = vld [vmem:[%s1817_s28 + $0x1a8] sm:$0xff] }
  0x1d   : > { %225 = vst [vmem:[%s1822_s29 + $0xd0] sm:$0xff] %v224_v26  ;;  %v228_v28 = vld [vmem:[%s1817_s28 + $0x1c0] sm:$0xff]  ;;  %v230_v29 = vld [vmem:[%s1817_s28 + $0x1c8] sm:$0xff]  ;;  %227 = vst [vmem:[%s1822_s29 + $0xd8] sm:$0xff] %v226_v27 }
  0x1e   : > { %229 = vst [vmem:[%s1822_s29 + $0xe0] sm:$0xff] %v228_v28  ;;  %231 = vst [vmem:[%s1822_s29 + $0xe8] sm:$0xff] %v230_v29  ;;  %v232_v30 = vld [vmem:[%s1817_s28 + $0x1e0] sm:$0xff]  ;;  %v234_v31 = vld [vmem:[%s1817_s28 + $0x1e8] sm:$0xff] }
  0x1f   : > { %233 = vst [vmem:[%s1822_s29 + $0xf0] sm:$0xff] %v232_v30  ;;  %235 = vst [vmem:[%s1822_s29 + $0xf8] sm:$0xff] %v234_v31 }
  0x20 PF: > { %p1342_p5 = scmp.ge.s32.totalorder %s1753_s17, 1  ;;  %p249_p6 = scmp.lt.s32.totalorder %s1753_s17, 3 }
  0x22   : > { %p250_p7 = pnand %p1342_p5, %p249_p6 }
  0x23   : > { %s256_s30 = sand.u32 (!%p250_p7), 1, %s1745_s15   ;;  %s1344_s5 = sshll.u32 (!%p250_p7), %s1797_s18, 6 }
  0x24   : > { %253 = sbr.rel (%p250_p7) target bundleno = 449 (0x1c1), region = 55  ;;  %s1343_s6 = sshll.u32 (!%p250_p7), %s256_s30, 8 }
  0x25   : > { %p283_p8 = scmp.lt.s32.totalorder (!%p250_p7), %s1344_s5, 127  ;;  %s1894_s11 = scalar_lea.vmem (!%p250_p7), [#allocation3], %s1343_s6 }
  0x26   : > { %p1346_p9 = scmp.ne.s32.totalorder (!%p250_p7), %s1797_s18, 0 }
  0x29   : > { %s2193_s5 = smov (!%p283_p8, %s1344_s5), 127  ;;  %292 = sbr.rel (%p1346_p9) target bundleno = 55 (0x37), region = 63 }
  0x2a   : > { %s1345_s7 = sshll.u32 %s2193_s5, 2 }
  0x2b   : > { %s1892_s10 = scalar_lea.vmem %s2185_s1, %s1345_s7 }
  0x2e   : > { %v1755_v32 = vmov 0.0  }
  0x2f   : > { %293 = vst [vmem:[#allocation2 + $0x30] sm:$0xff] %v1755_v32  ;;  %294 = vst [vmem:[#allocation2] sm:$0xff] %v1755_v32 }
  0x30   : > { %295 = vst [vmem:[#allocation2 + $0x58] sm:$0xff] %v1755_v32  ;;  %296 = vst [vmem:[#allocation2 + $0x18] sm:$0xff] %v1755_v32 }
  0x31   : > { %297 = vst [vmem:[#allocation2 + $0x50] sm:$0xff] %v1755_v32  ;;  %298 = vst [vmem:[#allocation2 + $0x68] sm:$0xff] %v1755_v32 }
  0x32   : > { %299 = vst [vmem:[#allocation2 + $0x8] sm:$0xff] %v1755_v32  ;;  %300 = vst [vmem:[#allocation2 + $0x48] sm:$0xff] %v1755_v32 }
  0x33   : > { %301 = vst [vmem:[#allocation2 + $0x40] sm:$0xff] %v1755_v32  ;;  %302 = vst [vmem:[#allocation2 + $0x20] sm:$0xff] %v1755_v32 }
  0x34   : > { %303 = vst [vmem:[#allocation2 + $0x10] sm:$0xff] %v1755_v32  ;;  %304 = vst [vmem:[#allocation2 + $0x38] sm:$0xff] %v1755_v32 }
  0x35   : > { %305 = vst [vmem:[#allocation2 + $0x60] sm:$0xff] %v1755_v32  ;;  %306 = vst [vmem:[#allocation2 + $0x70] sm:$0xff] %v1755_v32 }
  0x36   : > { %307 = vst [vmem:[#allocation2 + $0x78] sm:$0xff] %v1755_v32  ;;  %308 = vst [vmem:[#allocation2 + $0x28] sm:$0xff] %v1755_v32 }
  0x37 PF: > { %v1649_v33 = vld [vmem:[%s1892_s10 + $0x78] sm:$0xff]   ;;  %v1653_v37 = vld [vmem:[%s1892_s10 + $0x70] sm:$0xff]   ;;  %v1657_v41 = vld [vmem:[%s1892_s10 + $0x68] sm:$0xff]   ;;  %p1411_p10 = scmp.ne.s32.totalorder %s1797_s18, 1 }
  0x38   : > { %v1650_v34 = vld [vmem:[%s1892_s10 + $0xf8] sm:$0xff]   ;;  %1496 = vmatprep.subr.bf16.mxu0 %v1649_v33  ;;  %v1654_v38 = vld [vmem:[%s1892_s10 + $0xf0] sm:$0xff]   ;;  %v1658_v42 = vld [vmem:[%s1892_s10 + $0xe8] sm:$0xff]  }
  0x39   : > { %v1651_v35 = vld [vmem:[%s1892_s10 + $0x38] sm:$0xff]   ;;  %1560 = vmatprep.subr.bf16.mxu1 %v1650_v34  ;;  %v1655_v39 = vld [vmem:[%s1892_s10 + $0x30] sm:$0xff]   ;;  %v1659_v43 = vld [vmem:[%s1892_s10 + $0x28] sm:$0xff]  }
  0x3a   : > { %v1652_v36 = vld [vmem:[%s1892_s10 + $0xb8] sm:$0xff]   ;;  %1497 = vmatpush3.bf16.msra.mxu0 %v1651_v35  ;;  %v1656_v40 = vld [vmem:[%s1892_s10 + $0xb0] sm:$0xff]   ;;  %v1660_v44 = vld [vmem:[%s1892_s10 + $0xa8] sm:$0xff]  }
  0x3b   : > { %1561 = vmatpush3.bf16.msra.mxu1 %v1652_v36  ;;  %1498 = vmatprep.subr.bf16.mxu0 %v1653_v37  ;;  %v1661_v45 = vld [vmem:[%s1892_s10 + $0x60] sm:$0xff]   ;;  %v1665_v49 = vld [vmem:[%s1892_s10 + $0x58] sm:$0xff]   ;;  %v1669_v53 = vld [vmem:[%s1892_s10 + $0x50] sm:$0xff]  }
  0x3c   : > { %1562 = vmatprep.subr.bf16.mxu1 %v1654_v38  ;;  %v1662_v46 = vld [vmem:[%s1892_s10 + $0xe0] sm:$0xff]   ;;  %v1666_v50 = vld [vmem:[%s1892_s10 + $0xd8] sm:$0xff]   ;;  %v1670_v54 = vld [vmem:[%s1892_s10 + $0xd0] sm:$0xff]  }
  0x3d   : > { %v1663_v47 = vld [vmem:[%s1892_s10 + $0x20] sm:$0xff]   ;;  %v1667_v51 = vld [vmem:[%s1892_s10 + $0x18] sm:$0xff]   ;;  %v1671_v55 = vld [vmem:[%s1892_s10 + $0x10] sm:$0xff]  }
  0x3e   : > { %1499 = vmatpush3.bf16.msra.mxu0 %v1655_v39  ;;  %v1664_v48 = vld [vmem:[%s1892_s10 + $0xa0] sm:$0xff]   ;;  %v1668_v52 = vld [vmem:[%s1892_s10 + $0x98] sm:$0xff]   ;;  %v1672_v56 = vld [vmem:[%s1892_s10 + $0x90] sm:$0xff]  }
  0x3f   : > { %1563 = vmatpush3.bf16.msra.mxu1 %v1656_v40  ;;  %1500 = vmatprep.subr.bf16.mxu0 %v1657_v41  ;;  %v1673_v57 = vld [vmem:[%s1892_s10 + $0x48] sm:$0xff]   ;;  %v1677_v61 = vld [vmem:[%s1892_s10 + $0x40] sm:$0xff]   ;;  %v309_v40 = vld [vmem:[#allocation2 + $0x30] sm:$0xff] }
  0x40   : > { %1564 = vmatprep.subr.bf16.mxu1 %v1658_v42  ;;  %v1674_v58 = vld [vmem:[%s1892_s10 + $0xc8] sm:$0xff]   ;;  %v1678_v62 = vld [vmem:[%s1892_s10 + $0xc0] sm:$0xff]  }
  0x41   : > { %v1675_v59 = vld [vmem:[%s1892_s10 + $0x8] sm:$0xff]   ;;  %v1679_v63 = vld [vmem:[%s1892_s10] sm:$0xff]  }
  0x42   : > { %1501 = vmatpush3.bf16.msra.mxu0 %v1659_v43  ;;  %v1676_v60 = vld [vmem:[%s1892_s10 + $0x88] sm:$0xff]   ;;  %v1680_v0 = vld [vmem:[%s1892_s10 + $0x80] sm:$0xff]  }
  0x43   : > { %1565 = vmatpush3.bf16.msra.mxu1 %v1660_v44  ;;  %1502 = vmatprep.subr.bf16.mxu0 %v1661_v45  ;;  %v1681_v1 = vld [vmem:[%s1894_s11] ss:$16 sps:$4 sm:$0xff]   ;;  %v1683_v2 = vld [vmem:[%s1894_s11 + $0x4] ss:$16 sps:$4 sm:$0xff]   ;;  %v1684_v3 = vld [vmem:[%s1894_s11 + $0x8] ss:$16 sps:$4 sm:$0xff]  }
  0x44   : > { %1566 = vmatprep.subr.bf16.mxu1 %v1662_v46  ;;  %v1686_v4 = vld [vmem:[%s1894_s11 + $0xc] ss:$16 sps:$4 sm:$0xff]   ;;  %805 = vmatprep.mubr.bf16.mxu0 %v1683_v2  ;;  %v1687_v5 = vld [vmem:[%s1894_s11 + $0x24] ss:$16 sps:$4 sm:$0xff]   ;;  %v1691_v7 = vld [vmem:[%s1894_s11 + $0x20] ss:$16 sps:$4 sm:$0xff]  }
  0x45   : > { %902 = vmatprep.mubr.bf16.mxu1 %v1686_v4  ;;  %v1689_v6 = vld [vmem:[%s1894_s11 + $0x2c] ss:$16 sps:$4 sm:$0xff]   ;;  %v1692_v8 = vld [vmem:[%s1894_s11 + $0x28] ss:$16 sps:$4 sm:$0xff]   ;;  %v1693_v9 = vld [vmem:[%s1894_s11 + $0x44] ss:$16 sps:$4 sm:$0xff]  }
  0x46   : > { %1503 = vmatpush3.bf16.msra.mxu0 %v1663_v47  ;;  %v1695_v10 = vld [vmem:[%s1894_s11 + $0x4c] ss:$16 sps:$4 sm:$0xff]   ;;  %v1697_v11 = vld [vmem:[%s1894_s11 + $0x40] ss:$16 sps:$4 sm:$0xff]   ;;  %v1698_v12 = vld [vmem:[%s1894_s11 + $0x48] ss:$16 sps:$4 sm:$0xff]  }
  0x47   : > { %1567 = vmatpush3.bf16.msra.mxu1 %v1664_v48  ;;  %1504 = vmatprep.subr.bf16.mxu0 %v1665_v49  ;;  %v1699_v13 = vld [vmem:[%s1894_s11 + $0x64] ss:$16 sps:$4 sm:$0xff]   ;;  %v1701_v14 = vld [vmem:[%s1894_s11 + $0x6c] ss:$16 sps:$4 sm:$0xff]   ;;  %v1703_v15 = vld [vmem:[%s1894_s11 + $0x60] ss:$16 sps:$4 sm:$0xff]  }
  0x48   : > { %1568 = vmatprep.subr.bf16.mxu1 %v1666_v50  ;;  %v1704_v16 = vld [vmem:[%s1894_s11 + $0x68] ss:$16 sps:$4 sm:$0xff]   ;;  %v1705_v17 = vld [vmem:[%s1894_s11 + $0x84] ss:$16 sps:$4 sm:$0xff]   ;;  %v1707_v18 = vld [vmem:[%s1894_s11 + $0x8c] ss:$16 sps:$4 sm:$0xff]  }
  0x49   : > { %v1709_v19 = vld [vmem:[%s1894_s11 + $0x80] ss:$16 sps:$4 sm:$0xff]   ;;  %v1710_v20 = vld [vmem:[%s1894_s11 + $0x88] ss:$16 sps:$4 sm:$0xff]   ;;  %v1711_v21 = vld [vmem:[%s1894_s11 + $0xa4] ss:$16 sps:$4 sm:$0xff]  }
  0x4a   : > { %1505 = vmatpush3.bf16.msra.mxu0 %v1667_v51  ;;  %v1713_v22 = vld [vmem:[%s1894_s11 + $0xac] ss:$16 sps:$4 sm:$0xff]   ;;  %v1715_v23 = vld [vmem:[%s1894_s11 + $0xa0] ss:$16 sps:$4 sm:$0xff]   ;;  %v1716_v24 = vld [vmem:[%s1894_s11 + $0xa8] ss:$16 sps:$4 sm:$0xff]  }
  0x4b   : > { %1569 = vmatpush3.bf16.msra.mxu1 %v1668_v52  ;;  %1506 = vmatprep.subr.bf16.mxu0 %v1669_v53  ;;  %v1717_v25 = vld [vmem:[%s1894_s11 + $0xc4] ss:$16 sps:$4 sm:$0xff]   ;;  %v1719_v26 = vld [vmem:[%s1894_s11 + $0xcc] ss:$16 sps:$4 sm:$0xff]   ;;  %v1721_v27 = vld [vmem:[%s1894_s11 + $0xc0] ss:$16 sps:$4 sm:$0xff]  }
  0x4c   : > { %1570 = vmatprep.subr.bf16.mxu1 %v1670_v54  ;;  %v1722_v28 = vld [vmem:[%s1894_s11 + $0xc8] ss:$16 sps:$4 sm:$0xff]   ;;  %v1723_v29 = vld [vmem:[%s1894_s11 + $0xe4] ss:$16 sps:$4 sm:$0xff]   ;;  %v1725_v30 = vld [vmem:[%s1894_s11 + $0xec] ss:$16 sps:$4 sm:$0xff]  }
  0x4d   : > { %v1727_v31 = vld [vmem:[%s1894_s11 + $0xe0] ss:$16 sps:$4 sm:$0xff]   ;;  %v1728_v32 = vld [vmem:[%s1894_s11 + $0xe8] ss:$16 sps:$4 sm:$0xff]  }
  0x4e   : > { %1507 = vmatpush3.bf16.msra.mxu0 %v1671_v55  ;;  %v310_v49 = vld [vmem:[#allocation2] sm:$0xff] }
  0x4f   : > { %1571 = vmatpush3.bf16.msra.mxu1 %v1672_v56  ;;  %1508 = vmatprep.subr.bf16.mxu0 %v1673_v57 }
  0x50   : > { %1572 = vmatprep.subr.bf16.mxu1 %v1674_v58  ;;  %v311_v58 = vld [vmem:[#allocation2 + $0x58] sm:$0xff] }
  0x52   : > { %1509 = vmatpush3.bf16.msra.mxu0 %v1675_v59 }
  0x53   : > { %1573 = vmatpush3.bf16.msra.mxu1 %v1676_v60  ;;  %1510 = vmatprep.subr.bf16.mxu0 %v1677_v61 }
  0x54   : > { %1574 = vmatprep.subr.bf16.mxu1 %v1678_v62 }
  0x56   : > { %1511 = vmatpush3.bf16.msra.mxu0 %v1679_v63 }
  0x57   : > { %1575 = vmatpush3.bf16.msra.mxu1 %v1680_v0 }
  0x59   : > { %806 = vmatmul.mubr.bf16.vlgmr.msra.gmra.mxu0 %v1681_v1 }
  0x5a   : > { %903 = vmatmul.mubr.bf16.vlgmr.msra.gmra.mxu1 %v1684_v3  ;;  %813 = vmatprep.mubr.bf16.mxu0 %v1687_v5  ;;  %v312_v3 = vld [vmem:[#allocation2 + $0x18] sm:$0xff] }
  0x5b   : > { %910 = vmatprep.mubr.bf16.mxu1 %v1689_v6 }
  0x61   : > { %814 = vmatmul.mubr.bf16.gmra.mxu0 %v1691_v7 }
  0x62   : > { %911 = vmatmul.mubr.bf16.gmra.mxu1 %v1692_v8  ;;  %821 = vmatprep.mubr.bf16.mxu0 %v1693_v9 }
  0x63   : > { %918 = vmatprep.mubr.bf16.mxu1 %v1695_v10 }
  0x69   : > { %822 = vmatmul.mubr.bf16.gmra.mxu0 %v1697_v11 }
  0x6a   : > { %919 = vmatmul.mubr.bf16.gmra.mxu1 %v1698_v12  ;;  %829 = vmatprep.mubr.bf16.mxu0 %v1699_v13  ;;  %v313_v12 = vld [vmem:[#allocation2 + $0x50] sm:$0xff] }
  0x6b   : > { %926 = vmatprep.mubr.bf16.mxu1 %v1701_v14 }
  0x71   : > { %830 = vmatmul.mubr.bf16.gmra.mxu0 %v1703_v15 }
  0x72   : > { %927 = vmatmul.mubr.bf16.gmra.mxu1 %v1704_v16  ;;  %837 = vmatprep.mubr.bf16.mxu0 %v1705_v17 }
  0x73   : > { %934 = vmatprep.mubr.bf16.mxu1 %v1707_v18 }
  0x79   : > { %838 = vmatmul.mubr.bf16.gmra.mxu0 %v1709_v19 }
  0x7a   : > { %935 = vmatmul.mubr.bf16.gmra.mxu1 %v1710_v20  ;;  %845 = vmatprep.mubr.bf16.mxu0 %v1711_v21  ;;  %v314_v21 = vld [vmem:[#allocation2 + $0x68] sm:$0xff] }
  0x7b   : > { %942 = vmatprep.mubr.bf16.mxu1 %v1713_v22 }
  0x81   : > { %846 = vmatmul.mubr.bf16.gmra.mxu0 %v1715_v23 }
  0x82   : > { %943 = vmatmul.mubr.bf16.gmra.mxu1 %v1716_v24  ;;  %853 = vmatprep.mubr.bf16.mxu0 %v1717_v25 }
  0x83   : > { %950 = vmatprep.mubr.bf16.mxu1 %v1719_v26 }
  0x89   : > { %854 = vmatmul.mubr.bf16.gmra.mxu0 %v1721_v27 }
  0x8a   : > { %951 = vmatmul.mubr.bf16.gmra.mxu1 %v1722_v28  ;;  %861 = vmatprep.mubr.bf16.mxu0 %v1723_v29 }
  0x8b   : > { %958 = vmatprep.mubr.bf16.mxu1 %v1725_v30  ;;  %v315_v30 = vld [vmem:[#allocation2 + $0x8] sm:$0xff] }
  0x91   : > { %862 = vmatmul.mubr.bf16.gmra.mxu0 %v1727_v31 }
  0x92   : > { %959 = vmatmul.mubr.bf16.gmra.mxu1 %v1728_v32 }
 0x119   : > { %v1512_v33 = vpop.f32.mrf.mxu0 }
 0x11a   : > { %v1576_v34 = vpop.f32.mrf.mxu1 }
 0x11b   : > { %v1513_v35 = vpop.f32.mrf.mxu0 }
 0x11c   : > { %v1514_v36 = vadd.f32 %v1513_v35, %v1512_v33  ;;  %v1577_v37 = vpop.f32.mrf.mxu1 }
 0x11d   : > { %v1578_v38 = vadd.f32 %v1577_v37, %v1576_v34  ;;  %v1515_v39 = vpop.f32.mrf.mxu0 }
 0x11e   : > { %v1579_v41 = vpop.f32.mrf.mxu1 }
 0x11f   : > { %v905_v42 = vadd.f32 %v1578_v38, %v1514_v36  ;;  %v1516_v43 = vpop.f32.mrf.mxu0 }
 0x120   : > { %v1517_v44 = vadd.f32 %v1516_v43, %v1515_v39  ;;  %v1580_v45 = vpop.f32.mrf.mxu1  ;;  %v316_v39 = vld [vmem:[#allocation2 + $0x48] sm:$0xff] }
 0x121   : > { %v967_v46 = vadd.f32 %v905_v42, %v309_v40  ;;  %v1581_v47 = vadd.f32 %v1580_v45, %v1579_v41  ;;  %v1518_v48 = vpop.f32.mrf.mxu0 }
 0x122   : > { %v1582_v50 = vpop.f32.mrf.mxu1 }
 0x123   : > { %983 = vst [vmem:[#allocation2 + $0x30] sm:$0xff] %v967_v46  ;;  %v908_v51 = vadd.f32 %v1581_v47, %v1517_v44  ;;  %v1519_v52 = vpop.f32.mrf.mxu0 }
 0x124   : > { %v1520_v53 = vadd.f32 %v1519_v52, %v1518_v48  ;;  %v1583_v54 = vpop.f32.mrf.mxu1  ;;  %v317_v48 = vld [vmem:[#allocation2 + $0x40] sm:$0xff] }
 0x125   : > { %v968_v55 = vadd.f32 %v908_v51, %v310_v49  ;;  %v1584_v56 = vadd.f32 %v1583_v54, %v1582_v50  ;;  %v1521_v57 = vpop.f32.mrf.mxu0 }
 0x126   : > { %v1585_v59 = vpop.f32.mrf.mxu1 }
 0x127   : > { %984 = vst [vmem:[#allocation2] sm:$0xff] %v968_v55  ;;  %v913_v60 = vadd.f32 %v1584_v56, %v1520_v53  ;;  %v1522_v61 = vpop.f32.mrf.mxu0 }
 0x128   : > { %v1523_v62 = vadd.f32 %v1522_v61, %v1521_v57  ;;  %v1586_v63 = vpop.f32.mrf.mxu1  ;;  %v318_v57 = vld [vmem:[#allocation2 + $0x20] sm:$0xff] }
 0x129   : > { %v969_v0 = vadd.f32 %v913_v60, %v311_v58  ;;  %v1587_v1 = vadd.f32 %v1586_v63, %v1585_v59  ;;  %v1524_v2 = vpop.f32.mrf.mxu0 }
 0x12a   : > { %v1588_v4 = vpop.f32.mrf.mxu1 }
 0x12b   : > { %985 = vst [vmem:[#allocation2 + $0x58] sm:$0xff] %v969_v0  ;;  %v916_v5 = vadd.f32 %v1587_v1, %v1523_v62  ;;  %v1525_v6 = vpop.f32.mrf.mxu0 }
 0x12c   : > { %v1526_v7 = vadd.f32 %v1525_v6, %v1524_v2  ;;  %v1589_v8 = vpop.f32.mrf.mxu1  ;;  %v319_v2 = vld [vmem:[#allocation2 + $0x10] sm:$0xff] }
 0x12d   : > { %v970_v9 = vadd.f32 %v916_v5, %v312_v3  ;;  %v1590_v10 = vadd.f32 %v1589_v8, %v1588_v4  ;;  %v1527_v11 = vpop.f32.mrf.mxu0 }
 0x12e   : > { %v1591_v13 = vpop.f32.mrf.mxu1 }
 0x12f   : > { %986 = vst [vmem:[#allocation2 + $0x18] sm:$0xff] %v970_v9  ;;  %v921_v14 = vadd.f32 %v1590_v10, %v1526_v7  ;;  %v1528_v15 = vpop.f32.mrf.mxu0 }
 0x130   : > { %v1529_v16 = vadd.f32 %v1528_v15, %v1527_v11  ;;  %v1592_v17 = vpop.f32.mrf.mxu1  ;;  %v320_v11 = vld [vmem:[#allocation2 + $0x38] sm:$0xff] }
 0x131   : > { %v971_v18 = vadd.f32 %v921_v14, %v313_v12  ;;  %v1593_v19 = vadd.f32 %v1592_v17, %v1591_v13  ;;  %v1530_v20 = vpop.f32.mrf.mxu0 }
 0x132   : > { %v1594_v22 = vpop.f32.mrf.mxu1 }
 0x133   : > { %987 = vst [vmem:[#allocation2 + $0x50] sm:$0xff] %v971_v18  ;;  %v924_v23 = vadd.f32 %v1593_v19, %v1529_v16  ;;  %v1531_v24 = vpop.f32.mrf.mxu0 }
 0x134   : > { %v1532_v25 = vadd.f32 %v1531_v24, %v1530_v20  ;;  %v1595_v26 = vpop.f32.mrf.mxu1  ;;  %v321_v20 = vld [vmem:[#allocation2 + $0x60] sm:$0xff] }
 0x135   : > { %v972_v27 = vadd.f32 %v924_v23, %v314_v21  ;;  %v1596_v28 = vadd.f32 %v1595_v26, %v1594_v22  ;;  %v1533_v29 = vpop.f32.mrf.mxu0 }
 0x136   : > { %v1597_v31 = vpop.f32.mrf.mxu1 }
 0x137   : > { %988 = vst [vmem:[#allocation2 + $0x68] sm:$0xff] %v972_v27  ;;  %v929_v32 = vadd.f32 %v1596_v28, %v1532_v25  ;;  %v1534_v33 = vpop.f32.mrf.mxu0 }
 0x138   : > { %v1535_v34 = vadd.f32 %v1534_v33, %v1533_v29  ;;  %v1598_v35 = vpop.f32.mrf.mxu1  ;;  %v322_v29 = vld [vmem:[#allocation2 + $0x70] sm:$0xff] }
 0x139   : > { %v973_v36 = vadd.f32 %v929_v32, %v315_v30  ;;  %v1599_v37 = vadd.f32 %v1598_v35, %v1597_v31  ;;  %v1536_v38 = vpop.f32.mrf.mxu0 }
 0x13a   : > { %v1600_v40 = vpop.f32.mrf.mxu1 }
 0x13b   : > { %989 = vst [vmem:[#allocation2 + $0x8] sm:$0xff] %v973_v36  ;;  %v932_v41 = vadd.f32 %v1599_v37, %v1535_v34  ;;  %v1537_v42 = vpop.f32.mrf.mxu0 }
 0x13c   : > { %v1538_v43 = vadd.f32 %v1537_v42, %v1536_v38  ;;  %v1601_v44 = vpop.f32.mrf.mxu1  ;;  %v323_v38 = vld [vmem:[#allocation2 + $0x78] sm:$0xff] }
 0x13d   : > { %v974_v45 = vadd.f32 %v932_v41, %v316_v39  ;;  %v1602_v46 = vadd.f32 %v1601_v44, %v1600_v40  ;;  %v1539_v47 = vpop.f32.mrf.mxu0 }
 0x13e   : > { %v1603_v49 = vpop.f32.mrf.mxu1 }
 0x13f   : > { %990 = vst [vmem:[#allocation2 + $0x48] sm:$0xff] %v974_v45  ;;  %v937_v50 = vadd.f32 %v1602_v46, %v1538_v43  ;;  %v1540_v51 = vpop.f32.mrf.mxu0  ;;  %v324_v46 = vld [vmem:[#allocation2 + $0x28] sm:$0xff] }
 0x140   : > { %v1541_v52 = vadd.f32 %v1540_v51, %v1539_v47  ;;  %v1604_v53 = vpop.f32.mrf.mxu1 }
 0x141   : > { %v975_v54 = vadd.f32 %v937_v50, %v317_v48  ;;  %v1605_v55 = vadd.f32 %v1604_v53, %v1603_v49  ;;  %v1542_v56 = vpop.f32.mrf.mxu0 }
 0x142   : > { %v1606_v58 = vpop.f32.mrf.mxu1 }
 0x143   : > { %991 = vst [vmem:[#allocation2 + $0x40] sm:$0xff] %v975_v54  ;;  %v940_v59 = vadd.f32 %v1605_v55, %v1541_v52  ;;  %v1543_v60 = vpop.f32.mrf.mxu0 }
 0x144   : > { %v1544_v61 = vadd.f32 %v1543_v60, %v1542_v56  ;;  %v1607_v62 = vpop.f32.mrf.mxu1 }
 0x145   : > { %v976_v63 = vadd.f32 %v940_v59, %v318_v57  ;;  %v1608_v0 = vadd.f32 %v1607_v62, %v1606_v58  ;;  %v1545_v1 = vpop.f32.mrf.mxu0 }
 0x146   : > { %v1609_v3 = vpop.f32.mrf.mxu1 }
 0x147   : > { %992 = vst [vmem:[#allocation2 + $0x20] sm:$0xff] %v976_v63  ;;  %v945_v4 = vadd.f32 %v1608_v0, %v1544_v61  ;;  %v1546_v5 = vpop.f32.mrf.mxu0 }
 0x148   : > { %v1547_v6 = vadd.f32 %v1546_v5, %v1545_v1  ;;  %v1610_v7 = vpop.f32.mrf.mxu1 }
 0x149   : > { %v977_v8 = vadd.f32 %v945_v4, %v319_v2  ;;  %v1611_v9 = vadd.f32 %v1610_v7, %v1609_v3  ;;  %v1548_v10 = vpop.f32.mrf.mxu0 }
 0x14a   : > { %v1612_v12 = vpop.f32.mrf.mxu1 }
 0x14b   : > { %993 = vst [vmem:[#allocation2 + $0x10] sm:$0xff] %v977_v8  ;;  %v948_v13 = vadd.f32 %v1611_v9, %v1547_v6  ;;  %v1549_v14 = vpop.f32.mrf.mxu0 }
 0x14c   : > { %v1550_v15 = vadd.f32 %v1549_v14, %v1548_v10  ;;  %v1613_v16 = vpop.f32.mrf.mxu1 }
 0x14d   : > { %v978_v17 = vadd.f32 %v948_v13, %v320_v11  ;;  %v1614_v18 = vadd.f32 %v1613_v16, %v1612_v12  ;;  %v1551_v19 = vpop.f32.mrf.mxu0 }
 0x14e   : > { %v1615_v21 = vpop.f32.mrf.mxu1 }
 0x14f   : > { %994 = vst [vmem:[#allocation2 + $0x38] sm:$0xff] %v978_v17  ;;  %v953_v22 = vadd.f32 %v1614_v18, %v1550_v15  ;;  %v1552_v23 = vpop.f32.mrf.mxu0 }
 0x150   : > { %v1553_v24 = vadd.f32 %v1552_v23, %v1551_v19  ;;  %v1616_v25 = vpop.f32.mrf.mxu1 }
 0x151   : > { %v979_v26 = vadd.f32 %v953_v22, %v321_v20  ;;  %v1617_v27 = vadd.f32 %v1616_v25, %v1615_v21  ;;  %v1554_v28 = vpop.f32.mrf.mxu0 }
 0x152   : > { %v1618_v30 = vpop.f32.mrf.mxu1 }
 0x153   : > { %995 = vst [vmem:[#allocation2 + $0x60] sm:$0xff] %v979_v26  ;;  %v956_v31 = vadd.f32 %v1617_v27, %v1553_v24  ;;  %v1555_v32 = vpop.f32.mrf.mxu0 }
 0x154   : > { %v1556_v33 = vadd.f32 %v1555_v32, %v1554_v28  ;;  %v1619_v34 = vpop.f32.mrf.mxu1 }
 0x155   : > { %v980_v35 = vadd.f32 %v956_v31, %v322_v29  ;;  %v1620_v36 = vadd.f32 %v1619_v34, %v1618_v30  ;;  %v1557_v37 = vpop.f32.mrf.mxu0 }
 0x156   : > { %v1621_v39 = vpop.f32.mrf.mxu1 }
 0x157   : > { %996 = vst [vmem:[#allocation2 + $0x70] sm:$0xff] %v980_v35  ;;  %v961_v40 = vadd.f32 %v1620_v36, %v1556_v33  ;;  %v1558_v41 = vpop.f32.mrf.mxu0 }
 0x158   : > { %v1559_v42 = vadd.f32 %v1558_v41, %v1557_v37  ;;  %v1622_v43 = vpop.f32.mrf.mxu1 }
 0x159   : > { %v981_v44 = vadd.f32 %v961_v40, %v323_v38  ;;  %v1623_v45 = vadd.f32 %v1622_v43, %v1621_v39 }
 0x15b   : > { %997 = vst [vmem:[#allocation2 + $0x78] sm:$0xff] %v981_v44  ;;  %v964_v47 = vadd.f32 %v1623_v45, %v1559_v42  ;;  %1002 = sbr.rel (%p1411_p10) target bundleno = 449 (0x1c1), region = 67 }
 0x15d   : > { %v982_v48 = vadd.f32 %v964_v47, %v324_v46 }
 0x15f   : > { %998 = vst [vmem:[#allocation2 + $0x28] sm:$0xff] %v982_v48 }
 0x160   : > { %v1962_v49 = vld [vmem:[#allocation2 + $0x30] sm:$0xff]  ;;  %v1964_v50 = vld [vmem:[#allocation2] sm:$0xff]  ;;  %v1966_v51 = vld [vmem:[#allocation2 + $0x58] sm:$0xff] }
 0x161   : > { %v1968_v52 = vld [vmem:[#allocation2 + $0x18] sm:$0xff]  ;;  %v1019_v53 = vadd.f32 %v1964_v50, %v1962_v49  ;;  %v1042_v54 = vmul.f32 %v1962_v49, %v1962_v49  ;;  %v1043_v55 = vmul.f32 %v1964_v50, %v1964_v50  ;;  %v1044_v56 = vmul.f32 %v1966_v51, %v1966_v51  ;;  %v1978_v57 = vld [vmem:[#allocation2 + $0x50] sm:$0xff]  ;;  %v1983_v61 = vld [vmem:[#allocation2 + $0x68] sm:$0xff] }
 0x162   : > { %v1045_v59 = vmul.f32 %v1968_v52, %v1968_v52  ;;  %v1046_v63 = vmul.f32 %v1978_v57, %v1978_v57  ;;  %v1988_v1 = vld [vmem:[#allocation2 + $0x8] sm:$0xff]  ;;  %v1047_v3 = vmul.f32 %v1983_v61, %v1983_v61  ;;  %v1998_v9 = vld [vmem:[#allocation2 + $0x40] sm:$0xff]  ;;  %v2008_v17 = vld [vmem:[#allocation2 + $0x10] sm:$0xff] }
 0x163   : > { %v1020_v58 = vadd.f32 %v1019_v53, %v1966_v51  ;;  %v1058_v60 = vadd.f32 %v1043_v55, %v1042_v54  ;;  %v1993_v5 = vld [vmem:[#allocation2 + $0x48] sm:$0xff]  ;;  %v1048_v7 = vmul.f32 %v1988_v1, %v1988_v1  ;;  %v2003_v13 = vld [vmem:[#allocation2 + $0x20] sm:$0xff]  ;;  %v1050_v15 = vmul.f32 %v1998_v9, %v1998_v9  ;;  %v2013_v21 = vld [vmem:[#allocation2 + $0x38] sm:$0xff] }
 0x164   : > { %v1049_v11 = vmul.f32 %v1993_v5, %v1993_v5  ;;  %v1051_v19 = vmul.f32 %v2003_v13, %v2003_v13  ;;  %v1052_v23 = vmul.f32 %v2008_v17, %v2008_v17  ;;  %v2018_v25 = vld [vmem:[#allocation2 + $0x60] sm:$0xff]  ;;  %v1053_v27 = vmul.f32 %v2013_v21, %v2013_v21  ;;  %v2023_v29 = vld [vmem:[#allocation2 + $0x70] sm:$0xff]  ;;  %v2028_v33 = vld [vmem:[#allocation2 + $0x78] sm:$0xff] }
 0x165   : > { %v1021_v62 = vadd.f32 %v1020_v58, %v1968_v52  ;;  %v1059_v0 = vadd.f32 %v1058_v60, %v1044_v56  ;;  %v1054_v31 = vmul.f32 %v2018_v25, %v2018_v25  ;;  %v1055_v35 = vmul.f32 %v2023_v29, %v2023_v29 }
 0x166   : > { %v2033_v37 = vld [vmem:[#allocation2 + $0x28] sm:$0xff]  ;;  %v1056_v39 = vmul.f32 %v2028_v33, %v2028_v33 }
 0x167   : > { %v1022_v2 = vadd.f32 %v1021_v62, %v1978_v57  ;;  %v1060_v4 = vadd.f32 %v1059_v0, %v1045_v59  ;;  %v1057_v42 = vmul.f32 %v2033_v37, %v2033_v37 }
 0x169   : > { %v1023_v6 = vadd.f32 %v1022_v2, %v1983_v61  ;;  %v1061_v8 = vadd.f32 %v1060_v4, %v1046_v63 }
 0x16b   : > { %v1024_v10 = vadd.f32 %v1023_v6, %v1988_v1  ;;  %v1062_v12 = vadd.f32 %v1061_v8, %v1047_v3 }
 0x16d   : > { %v1025_v14 = vadd.f32 %v1024_v10, %v1993_v5  ;;  %v1063_v16 = vadd.f32 %v1062_v12, %v1048_v7 }
 0x16f   : > { %v1026_v18 = vadd.f32 %v1025_v14, %v1998_v9  ;;  %v1064_v20 = vadd.f32 %v1063_v16, %v1049_v11 }
 0x171   : > { %v1027_v22 = vadd.f32 %v1026_v18, %v2003_v13  ;;  %v1065_v24 = vadd.f32 %v1064_v20, %v1050_v15 }
 0x173   : > { %v1028_v26 = vadd.f32 %v1027_v22, %v2008_v17  ;;  %v1066_v28 = vadd.f32 %v1065_v24, %v1051_v19  ;;  %v2092_v22 = vld [vmem:[%s2187_s3] ss:$0 sm:$0xff] }
 0x175   : > { %v1029_v30 = vadd.f32 %v1028_v26, %v2013_v21  ;;  %v1067_v32 = vadd.f32 %v1066_v28, %v1052_v23 }
 0x177   : > { %v1030_v34 = vadd.f32 %v1029_v30, %v2018_v25  ;;  %v1068_v36 = vadd.f32 %v1067_v32, %v1053_v27 }
 0x179   : > { %v1031_v38 = vadd.f32 %v1030_v34, %v2023_v29  ;;  %v1069_v40 = vadd.f32 %v1068_v36, %v1054_v31 }
 0x17b   : > { %v1032_v41 = vadd.f32 %v1031_v38, %v2028_v33  ;;  %v1070_v43 = vadd.f32 %v1069_v40, %v1055_v35 }
 0x17d   : > { %v1033_v44 = vadd.f32 %v1032_v41, %v2033_v37  ;;  %v1071_v45 = vadd.f32 %v1070_v43, %v1056_v39 }
 0x17f   : > { %v1034_v46 = vrot.slane %v1033_v44, 4  ;;  %v1072_v47 = vadd.f32 %v1071_v45, %v1057_v42 }
 0x181   : > { %v1035_v48 = vadd.f32 %v1034_v46, %v1033_v44  ;;  %v1073_v53 = vrot.slane %v1072_v47, 4 }
 0x183   : > { %v1036_v54 = vrot.slane %v1035_v48, 2  ;;  %v1074_v55 = vadd.f32 %v1073_v53, %v1072_v47 }
 0x185   : > { %v1037_v56 = vadd.f32 %v1036_v54, %v1035_v48  ;;  %v1075_v58 = vrot.slane %v1074_v55, 2 }
 0x187   : > { %v1038_v59 = vrot.slane %v1037_v56, 1  ;;  %v1076_v60 = vadd.f32 %v1075_v58, %v1074_v55 }
 0x189   : > { %v1039_v62 = vadd.f32 %v1038_v59, %v1037_v56  ;;  %v1077_v63 = vrot.slane %v1076_v60, 1 }
 0x18b   : > { %v2042_v0 = vmul.f32 0.0078125, %v1039_v62  ;;  %v1078_v2 = vadd.f32 %v1077_v63, %v1076_v60 }
 0x18d   : > { %v1080_v3 = vmul.f32 %v2042_v0, %v2042_v0  ;;  %v1079_v4 = vmul.f32 0.0078125, %v1078_v2  ;;  %v1082_v8 = vsub.f32 %v1962_v49, %v2042_v0  ;;  %v1083_v10 = vsub.f32 %v1964_v50, %v2042_v0 }
 0x18e   : > { %v1084_v11 = vsub.f32 %v1966_v51, %v2042_v0  ;;  %v1085_v12 = vsub.f32 %v1968_v52, %v2042_v0  ;;  %v1086_v14 = vsub.f32 %v1978_v57, %v2042_v0  ;;  %v1087_v15 = vsub.f32 %v1983_v61, %v2042_v0  ;;  %v2075_v61 = vld [vmem:[%s2186_s2] ss:$0 sm:$0xff] }
 0x18f   : > { %v1081_v6 = vsub.f32 %v1079_v4, %v1080_v3  ;;  %v1088_v16 = vsub.f32 %v1988_v1, %v2042_v0  ;;  %v1089_v49 = vsub.f32 %v1993_v5, %v2042_v0  ;;  %v1090_v50 = vsub.f32 %v1998_v9, %v2042_v0 }
 0x190   : > { %v1091_v51 = vsub.f32 %v2003_v13, %v2042_v0  ;;  %v1092_v52 = vsub.f32 %v2008_v17, %v2042_v0  ;;  %v1093_v57 = vsub.f32 %v2013_v21, %v2042_v0  ;;  %v1094_v1 = vsub.f32 %v2018_v25, %v2042_v0 }
 0x191   : > { %v1098_v7 = vadd.f32 1e-05, %v1081_v6  ;;  %v1095_v5 = vsub.f32 %v2023_v29, %v2042_v0  ;;  %v1096_v9 = vsub.f32 %v2028_v33, %v2042_v0  ;;  %v1097_v13 = vsub.f32 %v2033_v37, %v2042_v0 }
 0x193   : > { %1729 = vrsqrt.f32 %v1098_v7 }
 0x1a0   : > { %v2070_v18 = vpop.eup %1729 }
 0x1a1   : > { %v1100_v17 = vmul.f32 %v2070_v18, %v1082_v8  ;;  %v1101_v19 = vmul.f32 %v2070_v18, %v1083_v10  ;;  %v1102_v20 = vmul.f32 %v2070_v18, %v1084_v11  ;;  %v1103_v21 = vmul.f32 %v2070_v18, %v1085_v12 }
 0x1a2   : > { %v1104_v23 = vmul.f32 %v2070_v18, %v1086_v14  ;;  %v1105_v24 = vmul.f32 %v2070_v18, %v1087_v15  ;;  %v1106_v26 = vmul.f32 %v2070_v18, %v1088_v16  ;;  %v1107_v27 = vmul.f32 %v2070_v18, %v1089_v49 }
 0x1a3   : > { %v1123_v28 = vmul.f32 %v2075_v61, %v1100_v17  ;;  %v1124_v30 = vmul.f32 %v2075_v61, %v1101_v19  ;;  %v1125_v31 = vmul.f32 %v2075_v61, %v1102_v20  ;;  %v1126_v32 = vmul.f32 %v2075_v61, %v1103_v21 }
 0x1a4   : > { %v1127_v34 = vmul.f32 %v2075_v61, %v1104_v23  ;;  %v1128_v35 = vmul.f32 %v2075_v61, %v1105_v24  ;;  %v1129_v36 = vmul.f32 %v2075_v61, %v1106_v26  ;;  %v1130_v38 = vmul.f32 %v2075_v61, %v1107_v27 }
 0x1a5   : > { %v1146_v39 = vadd.f32 %v2092_v22, %v1123_v28  ;;  %v1147_v40 = vadd.f32 %v2092_v22, %v1124_v30  ;;  %v1148_v41 = vadd.f32 %v2092_v22, %v1125_v31  ;;  %v1149_v42 = vadd.f32 %v2092_v22, %v1126_v32 }
 0x1a6   : > { %v1150_v43 = vadd.f32 %v2092_v22, %v1127_v34  ;;  %v1151_v44 = vadd.f32 %v2092_v22, %v1128_v35  ;;  %v1152_v45 = vadd.f32 %v2092_v22, %v1129_v36  ;;  %v1153_v46 = vadd.f32 %v2092_v22, %v1130_v38 }
 0x1a7   : > { %vm1162_vm0 = vcmp.ge.f32.partialorder %v1146_v39, 0.0  ;;  %vm1163_vm1 = vcmp.ge.f32.partialorder %v1147_v40, 0.0  ;;  %v1178_v47 = vmul.f32 0.01, %v1146_v39  ;;  %v1179_v48 = vmul.f32 0.01, %v1147_v40 }
 0x1a8   : > { %vm1164_vm2 = vcmp.ge.f32.partialorder %v1148_v41, 0.0  ;;  %vm1165_vm3 = vcmp.ge.f32.partialorder %v1149_v42, 0.0  ;;  %v1180_v53 = vmul.f32 0.01, %v1148_v41  ;;  %v1181_v54 = vmul.f32 0.01, %v1149_v42 }
 0x1a9   : > { %v1194_v55 = vsel %vm1162_vm0, %v1146_v39, %v1178_v47  ;;  %v1195_v56 = vsel %vm1163_vm1, %v1147_v40, %v1179_v48  ;;  %vm1166_vm4 = vcmp.ge.f32.partialorder %v1150_v43, 0.0  ;;  %vm1167_vm5 = vcmp.ge.f32.partialorder %v1151_v44, 0.0 }
 0x1aa   : > { %v1452_v58 = vpack.c.bf16 %v1195_v56, %v1194_v55  ;;  %v1196_v59 = vsel %vm1164_vm2, %v1148_v41, %v1180_v53  ;;  %v1197_v60 = vsel %vm1165_vm3, %v1149_v42, %v1181_v54  ;;  %v1182_v62 = vmul.f32 0.01, %v1150_v43 }
 0x1ab   : > { %v1457_v63 = vpack.c.bf16 %v1197_v60, %v1196_v59  ;;  %v1183_v2 = vmul.f32 0.01, %v1151_v44  ;;  %vm1168_vm6 = vcmp.ge.f32.partialorder %v1152_v45, 0.0  ;;  %vm1169_vm7 = vcmp.ge.f32.partialorder %v1153_v46, 0.0 }
 0x1ac   : > { %1453 = vst [vmem:[%s2188_s4] sm:$0xff] %v1452_v58   ;;  %v1198_v3 = vsel %vm1166_vm4, %v1150_v43, %v1182_v62  ;;  %v1184_v4 = vmul.f32 0.01, %v1152_v45  ;;  %v1185_v6 = vmul.f32 0.01, %v1153_v46  ;;  %v1108_v7 = vmul.f32 %v2070_v18, %v1090_v50 }
 0x1ad   : > { %1489 = vst [vmem:[%s2188_s4 + $0x8] sm:$0xff] %v1457_v63   ;;  %v1199_v8 = vsel %vm1167_vm5, %v1151_v44, %v1183_v2  ;;  %v1109_v10 = vmul.f32 %v2070_v18, %v1091_v51  ;;  %v1110_v11 = vmul.f32 %v2070_v18, %v1092_v52  ;;  %v1111_v12 = vmul.f32 %v2070_v18, %v1093_v57 }
 0x1ae   : > { %v1462_v14 = vpack.c.bf16 %v1199_v8, %v1198_v3  ;;  %v1200_v15 = vsel %vm1168_vm6, %v1152_v45, %v1184_v4  ;;  %v1201_v16 = vsel %vm1169_vm7, %v1153_v46, %v1185_v6  ;;  %v1131_v49 = vmul.f32 %v2075_v61, %v1108_v7 }
 0x1af   : > { %v1467_v17 = vpack.c.bf16 %v1201_v16, %v1200_v15  ;;  %v1132_v19 = vmul.f32 %v2075_v61, %v1109_v10  ;;  %v1133_v50 = vmul.f32 %v2075_v61, %v1110_v11  ;;  %v1134_v20 = vmul.f32 %v2075_v61, %v1111_v12 }
 0x1b0   : > { %1490 = vst [vmem:[%s2188_s4 + $0x10] sm:$0xff] %v1462_v14   ;;  %v1154_v51 = vadd.f32 %v2092_v22, %v1131_v49  ;;  %v1112_v52 = vmul.f32 %v2070_v18, %v1094_v1  ;;  %v1113_v57 = vmul.f32 %v2070_v18, %v1095_v5  ;;  %v1114_v21 = vmul.f32 %v2070_v18, %v1096_v9 }
 0x1b1   : > { %1491 = vst [vmem:[%s2188_s4 + $0x18] sm:$0xff] %v1467_v17   ;;  %v1155_v23 = vadd.f32 %v2092_v22, %v1132_v19  ;;  %v1156_v25 = vadd.f32 %v2092_v22, %v1133_v50  ;;  %v1157_v1 = vadd.f32 %v2092_v22, %v1134_v20  ;;  %v1115_v29 = vmul.f32 %v2070_v18, %v1097_v13 }
 0x1b2   : > { %vm1170_vm8 = vcmp.ge.f32.partialorder %v1154_v51, 0.0  ;;  %v1186_v5 = vmul.f32 0.01, %v1154_v51  ;;  %v1135_v33 = vmul.f32 %v2075_v61, %v1112_v52  ;;  %v1136_v9 = vmul.f32 %v2075_v61, %v1113_v57 }
 0x1b3   : > { %vm1171_vm9 = vcmp.ge.f32.partialorder %v1155_v23, 0.0  ;;  %v1187_v24 = vmul.f32 0.01, %v1155_v23  ;;  %vm1172_vm10 = vcmp.ge.f32.partialorder %v1156_v25, 0.0  ;;  %vm1173_vm11 = vcmp.ge.f32.partialorder %v1157_v1, 0.0 }
 0x1b4   : > { %v1202_v26 = vsel %vm1170_vm8, %v1154_v51, %v1186_v5  ;;  %v1188_v27 = vmul.f32 0.01, %v1156_v25  ;;  %v1189_v28 = vmul.f32 0.01, %v1157_v1  ;;  %v1158_v30 = vadd.f32 %v2092_v22, %v1135_v33 }
 0x1b5   : > { %v1203_v31 = vsel %vm1171_vm9, %v1155_v23, %v1187_v24  ;;  %v1159_v37 = vadd.f32 %v2092_v22, %v1136_v9  ;;  %v1137_v0 = vmul.f32 %v2075_v61, %v1114_v21  ;;  %v1138_v18 = vmul.f32 %v2075_v61, %v1115_v29 }
 0x1b6   : > { %v1472_v13 = vpack.c.bf16 %v1203_v31, %v1202_v26  ;;  %v1204_v32 = vsel %vm1172_vm10, %v1156_v25, %v1188_v27  ;;  %v1205_v34 = vsel %vm1173_vm11, %v1157_v1, %v1189_v28  ;;  %vm1174_vm12 = vcmp.ge.f32.partialorder %v1158_v30, 0.0 }
 0x1b7   : > { %v1477_v35 = vpack.c.bf16 %v1205_v34, %v1204_v32  ;;  %vm1175_vm13 = vcmp.ge.f32.partialorder %v1159_v37, 0.0  ;;  %v1190_v36 = vmul.f32 0.01, %v1158_v30  ;;  %v1191_v38 = vmul.f32 0.01, %v1159_v37 }
 0x1b8   : > { %1492 = vst [vmem:[%s2188_s4 + $0x20] sm:$0xff] %v1472_v13   ;;  %v1160_v39 = vadd.f32 %v2092_v22, %v1137_v0  ;;  %v1161_v40 = vadd.f32 %v2092_v22, %v1138_v18 }
 0x1b9   : > { %1493 = vst [vmem:[%s2188_s4 + $0x28] sm:$0xff] %v1477_v35   ;;  %v1206_v61 = vsel %vm1174_vm12, %v1158_v30, %v1190_v36  ;;  %v1207_v41 = vsel %vm1175_vm13, %v1159_v37, %v1191_v38 }
 0x1ba   : > { %v1482_v42 = vpack.c.bf16 %v1207_v41, %v1206_v61  ;;  %vm1176_vm14 = vcmp.ge.f32.partialorder %v1160_v39, 0.0  ;;  %vm1177_vm15 = vcmp.ge.f32.partialorder %v1161_v40, 0.0  ;;  %v1192_v43 = vmul.f32 0.01, %v1160_v39 }
 0x1bb   : > { %v1193_v44 = vmul.f32 0.01, %v1161_v40 }
 0x1bc   : > { %1494 = vst [vmem:[%s2188_s4 + $0x30] sm:$0xff] %v1482_v42   ;;  %v1208_v45 = vsel %vm1176_vm14, %v1160_v39, %v1192_v43 }
 0x1bd   : > { %v1209_v46 = vsel %vm1177_vm15, %v1161_v40, %v1193_v44 }
 0x1be   : > { %v1487_v47 = vpack.c.bf16 %v1209_v46, %v1208_v45 }
 0x1c0   : > { %1495 = vst [vmem:[%s2188_s4 + $0x38] sm:$0xff] %v1487_v47  }
 0x1c1 PF: > { %p11_p11 = scmp.ge.s32.totalorder %s1800_s19, 4   ;;  %s2189_s15 = smov %s1749_s16 }
 0x1c2   : > { %s2190_s16 = smov %s1809_s22  ;;  %s2191_s17 = smov %s1800_s19 }
 0x1c3   :  { %13 = sbr.rel (!%p11_p11) target bundleno = 2 (0x2), region = 101 }

// kernel: encoder_forward.7
= control target key start
LH: loop header
LB: loop body
LE: loop exit
PB: predicated region body
PF: predicated region fallthrough
CT: control target
= control target key end

     0   :  { %s1324_s15 = smov 0   ;;  %s1326_s16 = smov 0   ;;  %s1521_s0 = inlined_call_operand.vmem [shape: bf16[32,2048], index: 0, kind: input, shape index: {}]   ;;  %s1522_s1 = inlined_call_operand.vmem [shape: bf16[2048,256], index: 1, kind: input, shape index: {}]   ;;  %s1523_s2 = inlined_call_operand.vmem [shape: f32[1,256], index: 2, kind: input, shape index: {}]   ;;  %s1524_s3 = inlined_call_operand.vmem [shape: f32[1,256], index: 3, kind: input, shape index: {}]   ;;  %s1525_s4 = inlined_call_operand.vmem [shape: bf16[32,256], index: 4, kind: output, shape index: {}]  }
   0x1   :  { %s1328_s17 = smov 0  }
   0x2 LB: > { %s1340_s18 = sadd.s32 4294967295, %s1296_s17   ;;  %s1343_s19 = sadd.s32 1, %s1296_s17   ;;  %s1296_s17 = sphi %s1328_s17, %s1528_s17   ;;  %s1292_s16 = sphi %s1326_s16, %s1527_s16   ;;  %s1288_s15 = sphi %s1324_s15, %s1526_s15  }
   0x3   : > { %s18_s20 = ssub.s32 %s1296_s17, %s1343_s19  ;;  %s21_s21 = sadd.s32 1, %s1292_s16 }
   0x4   : > { %p19_p0 = scmp.eq.s32.totalorder %s18_s20, 0  ;;  %p28_p1 = scmp.ne.s32.totalorder %s1292_s16, %s1288_s15 }
   0x5   : > { %p29_p2 = scmp.eq.s32.totalorder %s1296_s17, 0  ;;  %p1042_p4 = scmp.ge.s32.totalorder %s1296_s17, 4 }
   0x6   : > { %s1352_s22 = scalar_select %p19_p0, %s1292_s16, %s21_s21  }
   0x7   : > { %p30_p3 = por %p29_p2, %p28_p1  ;;  %149 = sbr.rel (%p1042_p4) target bundleno = 20 (0x14), region = 24 }
   0xc   : > { %152 = sbr.rel (!%p30_p3) target bundleno = 20 (0x14), region = 28  ;;  %s154_s23 = sand.u32 (%p30_p3), 1, %s1292_s16  }
   0xd   : > { %s1131_s24 = sshll.u32 (%p30_p3), %s1296_s17, 4  ;;  %s1043_s25 = sshll.u32 (%p30_p3), %s154_s23, 6 }
   0xe   : > { %s159_s28 = scalar_lea.vmem (%p30_p3), %s1521_s0, %s1131_s24  ;;  %s156_s29 = scalar_lea.vmem (%p30_p3), [#allocation3], %s1043_s25 }
   0xf   : > { %v172_v0 = vld [vmem:[%s159_s28] sm:$0xff] (%p30_p3)  ;;  %v174_v1 = vld [vmem:[%s159_s28 + $0x8] sm:$0xff] (%p30_p3) }
  0x10   : > { %v176_v2 = vld [vmem:[%s159_s28 + $0x40] sm:$0xff] (%p30_p3)  ;;  %173 = vst [vmem:[%s156_s29] sm:$0xff] (%p30_p3), %v172_v0  ;;  %175 = vst [vmem:[%s156_s29 + $0x8] sm:$0xff] (%p30_p3), %v174_v1  ;;  %v178_v3 = vld [vmem:[%s159_s28 + $0x48] sm:$0xff] (%p30_p3) }
  0x11   : > { %177 = vst [vmem:[%s156_s29 + $0x10] sm:$0xff] %v176_v2  ;;  %v180_v4 = vld [vmem:[%s159_s28 + $0x80] sm:$0xff]  ;;  %v182_v5 = vld [vmem:[%s159_s28 + $0x88] sm:$0xff]  ;;  %179 = vst [vmem:[%s156_s29 + $0x18] sm:$0xff] %v178_v3 }
  0x12   : > { %181 = vst [vmem:[%s156_s29 + $0x20] sm:$0xff] %v180_v4  ;;  %183 = vst [vmem:[%s156_s29 + $0x28] sm:$0xff] %v182_v5  ;;  %v184_v6 = vld [vmem:[%s159_s28 + $0xc0] sm:$0xff]  ;;  %v186_v7 = vld [vmem:[%s159_s28 + $0xc8] sm:$0xff] }
  0x13   : > { %185 = vst [vmem:[%s156_s29 + $0x30] sm:$0xff] %v184_v6  ;;  %187 = vst [vmem:[%s156_s29 + $0x38] sm:$0xff] %v186_v7 }
  0x14 PF: > { %p1046_p5 = scmp.ge.s32.totalorder %s1296_s17, 1  ;;  %p202_p6 = scmp.lt.s32.totalorder %s1296_s17, 5 }
  0x16   : > { %p203_p7 = pnand %p1046_p5, %p202_p6 }
  0x17   : > { %s209_s30 = sand.u32 (!%p203_p7), 1, %s1288_s15   ;;  %s1048_s5 = sshll.u32 (!%p203_p7), %s1340_s18, 6 }
  0x18   : > { %206 = sbr.rel (%p203_p7) target bundleno = 376 (0x178), region = 55  ;;  %s1047_s6 = sshll.u32 (!%p203_p7), %s209_s30, 6 }
  0x19   : > { %p237_p8 = scmp.lt.s32.totalorder (!%p203_p7), %s1048_s5, 255  ;;  %s1369_s11 = scalar_lea.vmem (!%p203_p7), [#allocation3], %s1047_s6 }
  0x1a   : > { %p1051_p9 = scmp.ne.s32.totalorder (!%p203_p7), %s1340_s18, 0 }
  0x1d   : > { %s1530_s5 = smov (!%p237_p8, %s1048_s5), 255  ;;  %246 = sbr.rel (%p1051_p9) target bundleno = 39 (0x27), region = 63 }
  0x1e   : > { %s1132_s7 = sshll.u32 %s1530_s5, 3 }
  0x1f   : > { %s1367_s10 = scalar_lea.vmem %s1522_s1, %s1132_s7 }
  0x22   : > { %v1298_v8 = vmov 0.0  }
  0x23   : > { %247 = vst [vmem:[#allocation2 + $0x30] sm:$0xff] %v1298_v8  ;;  %248 = vst [vmem:[#allocation2] sm:$0xff] %v1298_v8 }
  0x24   : > { %249 = vst [vmem:[#allocation2 + $0x18] sm:$0xff] %v1298_v8  ;;  %250 = vst [vmem:[#allocation2 + $0x10] sm:$0xff] %v1298_v8 }
  0x25   : > { %251 = vst [vmem:[#allocation2 + $0x8] sm:$0xff] %v1298_v8  ;;  %252 = vst [vmem:[#allocation2 + $0x20] sm:$0xff] %v1298_v8 }
  0x26   : > { %253 = vst [vmem:[#allocation2 + $0x28] sm:$0xff] %v1298_v8  ;;  %254 = vst [vmem:[#allocation2 + $0x38] sm:$0xff] %v1298_v8 }
  0x27 PF: > { %v1162_v9 = vld [vmem:[%s1367_s10 + $0x74] ss:$8 sps:$4 sm:$0xff]   ;;  %v1166_v11 = vld [vmem:[%s1367_s10 + $0x70] ss:$8 sps:$4 sm:$0xff]   ;;  %v1168_v13 = vld [vmem:[%s1367_s10 + $0x64] ss:$8 sps:$4 sm:$0xff]  }
  0x28   : > { %v1164_v10 = vld [vmem:[%s1367_s10 + $0x174] ss:$8 sps:$4 sm:$0xff]   ;;  %695 = vmatprep.subr.bf16.mxu0 %v1162_v9  ;;  %v1167_v12 = vld [vmem:[%s1367_s10 + $0x170] ss:$8 sps:$4 sm:$0xff]   ;;  %v1170_v14 = vld [vmem:[%s1367_s10 + $0x164] ss:$8 sps:$4 sm:$0xff]  }
  0x29   : > { %748 = vmatprep.subr.bf16.mxu1 %v1164_v10  ;;  %696 = vmatpush1.bf16.msra.mxu0 %v1166_v11  ;;  %v1172_v15 = vld [vmem:[%s1367_s10 + $0x60] ss:$8 sps:$4 sm:$0xff]   ;;  %v1174_v17 = vld [vmem:[%s1367_s10 + $0x54] ss:$8 sps:$4 sm:$0xff]   ;;  %v1178_v19 = vld [vmem:[%s1367_s10 + $0x50] ss:$8 sps:$4 sm:$0xff]  }
  0x2a   : > { %749 = vmatpush1.bf16.msra.mxu1 %v1167_v12  ;;  %697 = vmatprep.subr.bf16.mxu0 %v1168_v13  ;;  %v1173_v16 = vld [vmem:[%s1367_s10 + $0x160] ss:$8 sps:$4 sm:$0xff]   ;;  %v1176_v18 = vld [vmem:[%s1367_s10 + $0x154] ss:$8 sps:$4 sm:$0xff]   ;;  %v1179_v20 = vld [vmem:[%s1367_s10 + $0x150] ss:$8 sps:$4 sm:$0xff]  }
  0x2b   : > { %750 = vmatprep.subr.bf16.mxu1 %v1170_v14  ;;  %v1180_v21 = vld [vmem:[%s1367_s10 + $0x44] ss:$8 sps:$4 sm:$0xff]   ;;  %v1184_v23 = vld [vmem:[%s1367_s10 + $0x40] ss:$8 sps:$4 sm:$0xff]   ;;  %v1186_v25 = vld [vmem:[%s1367_s10 + $0x34] ss:$8 sps:$4 sm:$0xff]  }
  0x2c   : > { %v1182_v22 = vld [vmem:[%s1367_s10 + $0x144] ss:$8 sps:$4 sm:$0xff]   ;;  %v1185_v24 = vld [vmem:[%s1367_s10 + $0x140] ss:$8 sps:$4 sm:$0xff]   ;;  %v1188_v26 = vld [vmem:[%s1367_s10 + $0x134] ss:$8 sps:$4 sm:$0xff]  }
  0x2d   : > { %698 = vmatpush1.bf16.msra.mxu0 %v1172_v15  ;;  %v1190_v27 = vld [vmem:[%s1367_s10 + $0x30] ss:$8 sps:$4 sm:$0xff]   ;;  %v1192_v29 = vld [vmem:[%s1367_s10 + $0x24] ss:$8 sps:$4 sm:$0xff]   ;;  %v1196_v31 = vld [vmem:[%s1367_s10 + $0x20] ss:$8 sps:$4 sm:$0xff]  }
  0x2e   : > { %751 = vmatpush1.bf16.msra.mxu1 %v1173_v16  ;;  %699 = vmatprep.subr.bf16.mxu0 %v1174_v17  ;;  %v1191_v28 = vld [vmem:[%s1367_s10 + $0x130] ss:$8 sps:$4 sm:$0xff]   ;;  %v1194_v30 = vld [vmem:[%s1367_s10 + $0x124] ss:$8 sps:$4 sm:$0xff]   ;;  %v1197_v32 = vld [vmem:[%s1367_s10 + $0x120] ss:$8 sps:$4 sm:$0xff]  }
  0x2f   : > { %752 = vmatprep.subr.bf16.mxu1 %v1176_v18  ;;  %v1198_v33 = vld [vmem:[%s1367_s10 + $0x14] ss:$8 sps:$4 sm:$0xff]   ;;  %v1202_v35 = vld [vmem:[%s1367_s10 + $0x10] ss:$8 sps:$4 sm:$0xff]   ;;  %v1204_v37 = vld [vmem:[%s1367_s10 + $0x4] ss:$8 sps:$4 sm:$0xff]  }
  0x30   : > { %v1200_v34 = vld [vmem:[%s1367_s10 + $0x114] ss:$8 sps:$4 sm:$0xff]   ;;  %v1203_v36 = vld [vmem:[%s1367_s10 + $0x110] ss:$8 sps:$4 sm:$0xff]   ;;  %v1206_v38 = vld [vmem:[%s1367_s10 + $0x104] ss:$8 sps:$4 sm:$0xff]  }
  0x31   : > { %700 = vmatpush1.bf16.msra.mxu0 %v1178_v19  ;;  %v1208_v39 = vld [vmem:[%s1367_s10] ss:$8 sps:$4 sm:$0xff]   ;;  %v1210_v41 = vld [vmem:[%s1367_s10 + $0xf4] ss:$8 sps:$4 sm:$0xff]   ;;  %v1214_v43 = vld [vmem:[%s1367_s10 + $0xf0] ss:$8 sps:$4 sm:$0xff]  }
  0x32   : > { %753 = vmatpush1.bf16.msra.mxu1 %v1179_v20  ;;  %701 = vmatprep.subr.bf16.mxu0 %v1180_v21  ;;  %v1209_v40 = vld [vmem:[%s1367_s10 + $0x100] ss:$8 sps:$4 sm:$0xff]   ;;  %v1212_v42 = vld [vmem:[%s1367_s10 + $0x1f4] ss:$8 sps:$4 sm:$0xff]   ;;  %v1215_v44 = vld [vmem:[%s1367_s10 + $0x1f0] ss:$8 sps:$4 sm:$0xff]  }
  0x33   : > { %754 = vmatprep.subr.bf16.mxu1 %v1182_v22  ;;  %v1216_v45 = vld [vmem:[%s1367_s10 + $0xe4] ss:$8 sps:$4 sm:$0xff]   ;;  %v1220_v47 = vld [vmem:[%s1367_s10 + $0xe0] ss:$8 sps:$4 sm:$0xff]   ;;  %v1222_v49 = vld [vmem:[%s1367_s10 + $0xd4] ss:$8 sps:$4 sm:$0xff]  }
  0x34   : > { %v1218_v46 = vld [vmem:[%s1367_s10 + $0x1e4] ss:$8 sps:$4 sm:$0xff]   ;;  %v1221_v48 = vld [vmem:[%s1367_s10 + $0x1e0] ss:$8 sps:$4 sm:$0xff]   ;;  %v1224_v50 = vld [vmem:[%s1367_s10 + $0x1d4] ss:$8 sps:$4 sm:$0xff]  }
  0x35   : > { %702 = vmatpush1.bf16.msra.mxu0 %v1184_v23  ;;  %v1226_v51 = vld [vmem:[%s1367_s10 + $0xd0] ss:$8 sps:$4 sm:$0xff]   ;;  %v1228_v53 = vld [vmem:[%s1367_s10 + $0xc4] ss:$8 sps:$4 sm:$0xff]   ;;  %v1232_v55 = vld [vmem:[%s1367_s10 + $0xc0] ss:$8 sps:$4 sm:$0xff]  }
  0x36   : > { %755 = vmatpush1.bf16.msra.mxu1 %v1185_v24  ;;  %703 = vmatprep.subr.bf16.mxu0 %v1186_v25  ;;  %v1227_v52 = vld [vmem:[%s1367_s10 + $0x1d0] ss:$8 sps:$4 sm:$0xff]   ;;  %v1230_v54 = vld [vmem:[%s1367_s10 + $0x1c4] ss:$8 sps:$4 sm:$0xff]   ;;  %v1233_v56 = vld [vmem:[%s1367_s10 + $0x1c0] ss:$8 sps:$4 sm:$0xff]  }
  0x37   : > { %756 = vmatprep.subr.bf16.mxu1 %v1188_v26  ;;  %v1234_v57 = vld [vmem:[%s1367_s10 + $0xb4] ss:$8 sps:$4 sm:$0xff]   ;;  %v1238_v61 = vld [vmem:[%s1367_s10 + $0xb0] ss:$8 sps:$4 sm:$0xff]   ;;  %v1240_v63 = vld [vmem:[%s1367_s10 + $0xa4] ss:$8 sps:$4 sm:$0xff]  }
  0x38   : > { %v1260_v58 = vld [vmem:[%s1369_s11 + $0x4] ss:$16 sps:$4 sm:$0xff]   ;;  %v1263_v60 = vld [vmem:[%s1369_s11 + $0xc] ss:$16 sps:$4 sm:$0xff]   ;;  %v1239_v62 = vld [vmem:[%s1367_s10 + $0x1b0] ss:$8 sps:$4 sm:$0xff]  }
  0x39   : > { %704 = vmatpush1.bf16.msra.mxu0 %v1190_v27  ;;  %v1236_v59 = vld [vmem:[%s1367_s10 + $0x1b4] ss:$8 sps:$4 sm:$0xff]   ;;  %727 = vmatprep.mubr.bf16.mxu0 %v1260_v58  ;;  %v1242_v0 = vld [vmem:[%s1367_s10 + $0x1a4] ss:$8 sps:$4 sm:$0xff]   ;;  %v1244_v1 = vld [vmem:[%s1367_s10 + $0xa0] ss:$8 sps:$4 sm:$0xff]  }
  0x3a   : > { %757 = vmatpush1.bf16.msra.mxu1 %v1191_v28  ;;  %705 = vmatprep.subr.bf16.mxu0 %v1192_v29  ;;  %v1245_v2 = vld [vmem:[%s1367_s10 + $0x1a0] ss:$8 sps:$4 sm:$0xff]   ;;  %v1246_v3 = vld [vmem:[%s1367_s10 + $0x94] ss:$8 sps:$4 sm:$0xff]   ;;  %v1250_v5 = vld [vmem:[%s1367_s10 + $0x90] ss:$8 sps:$4 sm:$0xff]  }
  0x3b   : > { %758 = vmatprep.subr.bf16.mxu1 %v1194_v30  ;;  %780 = vmatprep.mubr.bf16.mxu1 %v1263_v60  ;;  %v1248_v4 = vld [vmem:[%s1367_s10 + $0x194] ss:$8 sps:$4 sm:$0xff]   ;;  %v1251_v6 = vld [vmem:[%s1367_s10 + $0x190] ss:$8 sps:$4 sm:$0xff]   ;;  %v1252_v7 = vld [vmem:[%s1367_s10 + $0x84] ss:$8 sps:$4 sm:$0xff]  }
  0x3c   : > { %v1254_v8 = vld [vmem:[%s1367_s10 + $0x184] ss:$8 sps:$4 sm:$0xff]   ;;  %v1256_v9 = vld [vmem:[%s1367_s10 + $0x80] ss:$8 sps:$4 sm:$0xff]   ;;  %v255_v18 = vld [vmem:[#allocation2 + $0x30] sm:$0xff]  ;;  %p1124_p10 = scmp.ne.s32.totalorder %s1340_s18, 3 }
  0x3d   : > { %706 = vmatpush1.bf16.msra.mxu0 %v1196_v31  ;;  %v1257_v10 = vld [vmem:[%s1367_s10 + $0x180] ss:$8 sps:$4 sm:$0xff]   ;;  %v1264_v13 = vld [vmem:[%s1369_s11 + $0x24] ss:$16 sps:$4 sm:$0xff]   ;;  %v1266_v14 = vld [vmem:[%s1369_s11 + $0x2c] ss:$16 sps:$4 sm:$0xff]  }
  0x3e   : > { %759 = vmatpush1.bf16.msra.mxu1 %v1197_v32  ;;  %707 = vmatprep.subr.bf16.mxu0 %v1198_v33  ;;  %v1258_v11 = vld [vmem:[%s1369_s11] ss:$16 sps:$4 sm:$0xff]   ;;  %v1261_v12 = vld [vmem:[%s1369_s11 + $0x8] ss:$16 sps:$4 sm:$0xff]  }
  0x3f   : > { %760 = vmatprep.subr.bf16.mxu1 %v1200_v34  ;;  %v1268_v15 = vld [vmem:[%s1369_s11 + $0x20] ss:$16 sps:$4 sm:$0xff]   ;;  %v1269_v16 = vld [vmem:[%s1369_s11 + $0x28] ss:$16 sps:$4 sm:$0xff]  }
  0x40   : > { %v256_v22 = vld [vmem:[#allocation2] sm:$0xff]  ;;  %v257_v27 = vld [vmem:[#allocation2 + $0x18] sm:$0xff]  ;;  %v258_v32 = vld [vmem:[#allocation2 + $0x10] sm:$0xff] }
  0x41   : > { %708 = vmatpush1.bf16.msra.mxu0 %v1202_v35 }
  0x42   : > { %761 = vmatpush1.bf16.msra.mxu1 %v1203_v36  ;;  %709 = vmatprep.subr.bf16.mxu0 %v1204_v37  ;;  %v259_v37 = vld [vmem:[#allocation2 + $0x8] sm:$0xff] }
  0x43   : > { %762 = vmatprep.subr.bf16.mxu1 %v1206_v38 }
  0x45   : > { %710 = vmatpush1.bf16.msra.mxu0 %v1208_v39 }
  0x46   : > { %763 = vmatpush1.bf16.msra.mxu1 %v1209_v40  ;;  %711 = vmatprep.subr.bf16.mxu0 %v1210_v41 }
  0x47   : > { %764 = vmatprep.subr.bf16.mxu1 %v1212_v42  ;;  %v260_v42 = vld [vmem:[#allocation2 + $0x20] sm:$0xff] }
  0x49   : > { %712 = vmatpush2.bf16.msra.mxu0 %v1214_v43 }
  0x4a   : > { %765 = vmatpush2.bf16.msra.mxu1 %v1215_v44  ;;  %713 = vmatprep.subr.bf16.mxu0 %v1216_v45 }
  0x4b   : > { %766 = vmatprep.subr.bf16.mxu1 %v1218_v46 }
  0x4d   : > { %714 = vmatpush2.bf16.msra.mxu0 %v1220_v47  ;;  %v261_v47 = vld [vmem:[#allocation2 + $0x28] sm:$0xff] }
  0x4e   : > { %767 = vmatpush2.bf16.msra.mxu1 %v1221_v48  ;;  %715 = vmatprep.subr.bf16.mxu0 %v1222_v49 }
  0x4f   : > { %768 = vmatprep.subr.bf16.mxu1 %v1224_v50 }
  0x51   : > { %716 = vmatpush2.bf16.msra.mxu0 %v1226_v51 }
  0x52   : > { %769 = vmatpush2.bf16.msra.mxu1 %v1227_v52  ;;  %717 = vmatprep.subr.bf16.mxu0 %v1228_v53  ;;  %v262_v52 = vld [vmem:[#allocation2 + $0x38] sm:$0xff] }
  0x53   : > { %770 = vmatprep.subr.bf16.mxu1 %v1230_v54 }
  0x55   : > { %718 = vmatpush2.bf16.msra.mxu0 %v1232_v55 }
  0x56   : > { %771 = vmatpush2.bf16.msra.mxu1 %v1233_v56  ;;  %719 = vmatprep.subr.bf16.mxu0 %v1234_v57 }
  0x57   : > { %772 = vmatprep.subr.bf16.mxu1 %v1236_v59 }
  0x59   : > { %720 = vmatpush2.bf16.msra.mxu0 %v1238_v61 }
  0x5a   : > { %773 = vmatpush2.bf16.msra.mxu1 %v1239_v62  ;;  %721 = vmatprep.subr.bf16.mxu0 %v1240_v63 }
  0x5b   : > { %774 = vmatprep.subr.bf16.mxu1 %v1242_v0 }
  0x5d   : > { %722 = vmatpush2.bf16.msra.mxu0 %v1244_v1 }
  0x5e   : > { %775 = vmatpush2.bf16.msra.mxu1 %v1245_v2  ;;  %723 = vmatprep.subr.bf16.mxu0 %v1246_v3 }
  0x5f   : > { %776 = vmatprep.subr.bf16.mxu1 %v1248_v4 }
  0x61   : > { %724 = vmatpush2.bf16.msra.mxu0 %v1250_v5 }
  0x62   : > { %777 = vmatpush2.bf16.msra.mxu1 %v1251_v6  ;;  %725 = vmatprep.subr.bf16.mxu0 %v1252_v7 }
  0x63   : > { %778 = vmatprep.subr.bf16.mxu1 %v1254_v8 }
  0x65   : > { %726 = vmatpush2.bf16.msra.mxu0 %v1256_v9 }
  0x66   : > { %779 = vmatpush2.bf16.msra.mxu1 %v1257_v10 }
  0x68   : > { %728 = vmatmul.mubr.bf16.vlgmr.msra.gmra.mxu0 %v1258_v11 }
  0x69   : > { %781 = vmatmul.mubr.bf16.vlgmr.msra.gmra.mxu1 %v1261_v12  ;;  %737 = vmatprep.mubr.bf16.mxu0 %v1264_v13 }
  0x6a   : > { %790 = vmatprep.mubr.bf16.mxu1 %v1266_v14 }
  0x70   : > { %738 = vmatmul.mubr.bf16.gmra.mxu0 %v1268_v15 }
  0x71   : > { %791 = vmatmul.mubr.bf16.gmra.mxu1 %v1269_v16 }
 0x128   : > { %v729_v17 = vpop.f32.mrf.mxu0 }
 0x129   : > { %v782_v19 = vpop.f32.mrf.mxu1 }
 0x12a   : > { %v783_v20 = vadd.f32 %v782_v19, %v729_v17  ;;  %v731_v21 = vpop.f32.mrf.mxu0 }
 0x12b   : > { %v784_v23 = vpop.f32.mrf.mxu1 }
 0x12c   : > { %v801_v24 = vadd.f32 %v783_v20, %v255_v18  ;;  %v785_v25 = vadd.f32 %v784_v23, %v731_v21  ;;  %v733_v26 = vpop.f32.mrf.mxu0 }
 0x12d   : > { %v786_v28 = vpop.f32.mrf.mxu1 }
 0x12e   : > { %809 = vst [vmem:[#allocation2 + $0x30] sm:$0xff] %v801_v24  ;;  %v802_v29 = vadd.f32 %v785_v25, %v256_v22  ;;  %v787_v30 = vadd.f32 %v786_v28, %v733_v26  ;;  %v735_v31 = vpop.f32.mrf.mxu0 }
 0x12f   : > { %v788_v33 = vpop.f32.mrf.mxu1 }
 0x130   : > { %810 = vst [vmem:[#allocation2] sm:$0xff] %v802_v29  ;;  %v803_v34 = vadd.f32 %v787_v30, %v257_v27  ;;  %v789_v35 = vadd.f32 %v788_v33, %v735_v31  ;;  %v739_v36 = vpop.f32.mrf.mxu0 }
 0x131   : > { %v792_v38 = vpop.f32.mrf.mxu1 }
 0x132   : > { %811 = vst [vmem:[#allocation2 + $0x18] sm:$0xff] %v803_v34  ;;  %v804_v39 = vadd.f32 %v789_v35, %v258_v32  ;;  %v793_v40 = vadd.f32 %v792_v38, %v739_v36  ;;  %v741_v41 = vpop.f32.mrf.mxu0 }
 0x133   : > { %v794_v43 = vpop.f32.mrf.mxu1 }
 0x134   : > { %812 = vst [vmem:[#allocation2 + $0x10] sm:$0xff] %v804_v39  ;;  %v805_v44 = vadd.f32 %v793_v40, %v259_v37  ;;  %v795_v45 = vadd.f32 %v794_v43, %v741_v41  ;;  %v743_v46 = vpop.f32.mrf.mxu0 }
 0x135   : > { %v796_v48 = vpop.f32.mrf.mxu1 }
 0x136   : > { %813 = vst [vmem:[#allocation2 + $0x8] sm:$0xff] %v805_v44  ;;  %v806_v49 = vadd.f32 %v795_v45, %v260_v42  ;;  %v797_v50 = vadd.f32 %v796_v48, %v743_v46  ;;  %v745_v51 = vpop.f32.mrf.mxu0 }
 0x137   : > { %v798_v53 = vpop.f32.mrf.mxu1 }
 0x138   : > { %814 = vst [vmem:[#allocation2 + $0x20] sm:$0xff] %v806_v49  ;;  %v807_v54 = vadd.f32 %v797_v50, %v261_v47  ;;  %v799_v55 = vadd.f32 %v798_v53, %v745_v51  ;;  %820 = sbr.rel (%p1124_p10) target bundleno = 376 (0x178), region = 67 }
 0x13a   : > { %815 = vst [vmem:[#allocation2 + $0x28] sm:$0xff] %v807_v54  ;;  %v808_v56 = vadd.f32 %v799_v55, %v262_v52 }
 0x13c   : > { %816 = vst [vmem:[#allocation2 + $0x38] sm:$0xff] %v808_v56 }
 0x13d   : > { %v1445_v57 = vld [vmem:[#allocation2 + $0x30] sm:$0xff]  ;;  %v1447_v58 = vld [vmem:[#allocation2] sm:$0xff]  ;;  %v1449_v59 = vld [vmem:[#allocation2 + $0x18] sm:$0xff]  ;;  %v904_v55 = vlaneseq }
 0x13e   : > { %v1451_v60 = vld [vmem:[#allocation2 + $0x10] sm:$0xff]  ;;  %v1453_v61 = vld [vmem:[#allocation2 + $0x8] sm:$0xff]  ;;  %v829_v63 = vadd.f32 %v1449_v59, %v1445_v57  ;;  %v850_v0 = vmul.f32 %v1445_v57, %v1445_v57  ;;  %v851_v1 = vmul.f32 %v1447_v58, %v1447_v58  ;;  %v852_v2 = vmul.f32 %v1449_v59, %v1449_v59 }
 0x13f   : > { %v1455_v62 = vld [vmem:[#allocation2 + $0x20] sm:$0xff]  ;;  %v838_v5 = vadd.f32 %v1451_v60, %v1447_v58  ;;  %v853_v6 = vmul.f32 %v1451_v60, %v1451_v60  ;;  %v854_v7 = vmul.f32 %v1453_v61, %v1453_v61  ;;  %v905_v56 = vshrl.u32 %v904_v55, 7 }
 0x140   : > { %v855_v8 = vmul.f32 %v1455_v62, %v1455_v62  ;;  %v830_v9 = vadd.f32 %v829_v63, %v1453_v61  ;;  %v858_v11 = vadd.f32 %v852_v2, %v850_v0  ;;  %v902_v0 = vld [vmem:[%s1523_s2] sm:$0x3] }
 0x141   : > { %v1465_v3 = vld [vmem:[#allocation2 + $0x28] sm:$0xff]  ;;  %v839_v12 = vadd.f32 %v838_v5, %v1455_v62  ;;  %v867_v14 = vadd.f32 %v853_v6, %v851_v1  ;;  %v906_v63 = vsub.s32 0, %v905_v56  ;;  %v910_v1 = vsub.s32 1, %v905_v56  ;;  %v922_v5 = vld [vmem:[%s1524_s3] sm:$0x3] }
 0x142   : > { %v856_v10 = vmul.f32 %v1465_v3, %v1465_v3  ;;  %v831_v15 = vadd.f32 %v830_v9, %v1465_v3  ;;  %v859_v16 = vadd.f32 %v858_v11, %v854_v7 }
 0x143   : > { %v1467_v4 = vld [vmem:[#allocation2 + $0x38] sm:$0xff]  ;;  %v868_v18 = vadd.f32 %v867_v14, %v855_v8  ;;  %v911_v14 = vrot.slane %v902_v0, %v910_v1 }
 0x144   : > { %v857_v13 = vmul.f32 %v1467_v4, %v1467_v4  ;;  %v840_v17 = vadd.f32 %v839_v12, %v1467_v4  ;;  %v832_v19 = vrot.slane %v831_v15, 4  ;;  %v860_v20 = vadd.f32 %v859_v16, %v856_v10 }
 0x145   : > { %v931_v16 = vrot.slane %v922_v5, %v910_v1 }
 0x146   : > { %v841_v21 = vrot.slane %v840_v17, 4  ;;  %v869_v22 = vadd.f32 %v868_v18, %v857_v13  ;;  %v833_v23 = vadd.f32 %v832_v19, %v831_v15  ;;  %v861_v24 = vrot.slane %v860_v20, 4 }
 0x147   : > { %v907_v13 = vrot.slane %v902_v0, %v906_v63  ;;  %v927_v15 = vrot.slane %v922_v5, %v906_v63 }
 0x148   : > { %v842_v25 = vadd.f32 %v841_v21, %v840_v17  ;;  %v870_v26 = vrot.slane %v869_v22, 4  ;;  %v834_v27 = vrot.slane %v833_v23, 2  ;;  %v862_v28 = vadd.f32 %v861_v24, %v860_v20 }
 0x14a   : > { %v843_v29 = vrot.slane %v842_v25, 2  ;;  %v871_v30 = vadd.f32 %v870_v26, %v869_v22  ;;  %v835_v31 = vadd.f32 %v834_v27, %v833_v23  ;;  %v863_v32 = vrot.slane %v862_v28, 2 }
 0x14c   : > { %v844_v33 = vadd.f32 %v843_v29, %v842_v25  ;;  %v872_v34 = vrot.slane %v871_v30, 2  ;;  %v836_v35 = vrot.slane %v835_v31, 1  ;;  %v864_v36 = vadd.f32 %v863_v32, %v862_v28 }
 0x14e   : > { %v845_v37 = vrot.slane %v844_v33, 1  ;;  %v873_v38 = vadd.f32 %v872_v34, %v871_v30  ;;  %v837_v39 = vadd.f32 %v836_v35, %v835_v31  ;;  %v865_v40 = vrot.slane %v864_v36, 1 }
 0x150   : > { %v846_v41 = vadd.f32 %v845_v37, %v844_v33  ;;  %v874_v42 = vrot.slane %v873_v38, 1  ;;  %v848_v43 = vmul.f32 0.03125, %v837_v39  ;;  %v866_v44 = vadd.f32 %v865_v40, %v864_v36 }
 0x152   : > { %v849_v45 = vmul.f32 0.03125, %v846_v41  ;;  %v875_v46 = vadd.f32 %v874_v42, %v873_v38  ;;  %v876_v47 = vmul.f32 0.03125, %v866_v44  ;;  %v878_v48 = vmul.f32 %v848_v43, %v848_v43 }
 0x153   : > { %v882_v2 = vsub.f32 %v1445_v57, %v848_v43  ;;  %v884_v6 = vsub.f32 %v1449_v59, %v848_v43  ;;  %v886_v7 = vsub.f32 %v1453_v61, %v848_v43  ;;  %v888_v8 = vsub.f32 %v1465_v3, %v848_v43 }
 0x154   : > { %v877_v49 = vmul.f32 0.03125, %v875_v46  ;;  %v879_v50 = vmul.f32 %v849_v45, %v849_v45  ;;  %v880_v51 = vsub.f32 %v876_v47, %v878_v48  ;;  %v883_v9 = vsub.f32 %v1447_v58, %v849_v45 }
 0x155   : > { %v885_v10 = vsub.f32 %v1451_v60, %v849_v45  ;;  %v887_v11 = vsub.f32 %v1455_v62, %v849_v45  ;;  %v889_v12 = vsub.f32 %v1467_v4, %v849_v45 }
 0x156   : > { %v881_v52 = vsub.f32 %v877_v49, %v879_v50  ;;  %v890_v53 = vadd.f32 1e-05, %v880_v51 }
 0x158   : > { %v891_v54 = vadd.f32 1e-05, %v881_v52  ;;  %1270 = vrsqrt.f32 %v890_v53 }
 0x15a   : > { %1272 = vrsqrt.f32 %v891_v54 }
 0x165   : > { %v1271_v57 = vpop.eup %1270 }
 0x166   : > { %v894_v18 = vmul.f32 %v1271_v57, %v882_v2  ;;  %v896_v59 = vmul.f32 %v1271_v57, %v884_v6  ;;  %v898_v19 = vmul.f32 %v1271_v57, %v886_v7  ;;  %v900_v61 = vmul.f32 %v1271_v57, %v888_v8 }
 0x167   : > { %v1273_v17 = vpop.eup %1272 }
 0x168   : > { %v895_v20 = vmul.f32 %v1273_v17, %v883_v9  ;;  %v897_v3 = vmul.f32 %v1273_v17, %v885_v10  ;;  %v899_v21 = vmul.f32 %v1273_v17, %v887_v11  ;;  %v901_v58 = vmul.f32 %v1273_v17, %v889_v12 }
 0x169   : > { %v914_v22 = vmul.f32 %v907_v13, %v894_v18  ;;  %v916_v60 = vmul.f32 %v907_v13, %v896_v59  ;;  %v918_v23 = vmul.f32 %v907_v13, %v898_v19  ;;  %v920_v62 = vmul.f32 %v907_v13, %v900_v61 }
 0x16a   : > { %v915_v24 = vmul.f32 %v911_v14, %v895_v20  ;;  %v917_v4 = vmul.f32 %v911_v14, %v897_v3  ;;  %v919_v25 = vmul.f32 %v911_v14, %v899_v21  ;;  %v921_v26 = vmul.f32 %v911_v14, %v901_v58 }
 0x16b   : > { %v934_v27 = vadd.f32 %v927_v15, %v914_v22  ;;  %v936_v28 = vadd.f32 %v927_v15, %v916_v60  ;;  %v938_v29 = vadd.f32 %v927_v15, %v918_v23  ;;  %v940_v30 = vadd.f32 %v927_v15, %v920_v62 }
 0x16c   : > { %v935_v31 = vadd.f32 %v931_v16, %v915_v24  ;;  %v937_v32 = vadd.f32 %v931_v16, %v917_v4  ;;  %v939_v33 = vadd.f32 %v931_v16, %v919_v25  ;;  %v941_v34 = vadd.f32 %v931_v16, %v921_v26 }
 0x16d   : > { %vm942_vm0 = vcmp.ge.f32.partialorder %v934_v27, 0.0  ;;  %v950_v35 = vmul.f32 0.01, %v934_v27  ;;  %vm944_vm1 = vcmp.ge.f32.partialorder %v936_v28, 0.0  ;;  %v952_v36 = vmul.f32 0.01, %v936_v28 }
 0x16e   : > { %vm943_vm2 = vcmp.ge.f32.partialorder %v935_v31, 0.0  ;;  %v951_v37 = vmul.f32 0.01, %v935_v31  ;;  %vm945_vm3 = vcmp.ge.f32.partialorder %v937_v32, 0.0  ;;  %v953_v38 = vmul.f32 0.01, %v937_v32 }
 0x16f   : > { %v958_v39 = vsel %vm942_vm0, %v934_v27, %v950_v35  ;;  %v960_v40 = vsel %vm944_vm1, %v936_v28, %v952_v36  ;;  %vm946_vm4 = vcmp.ge.f32.partialorder %v938_v29, 0.0  ;;  %vm947_vm5 = vcmp.ge.f32.partialorder %v939_v33, 0.0 }
 0x170   : > { %v959_v41 = vsel %vm943_vm2, %v935_v31, %v951_v37  ;;  %v961_v42 = vsel %vm945_vm3, %v937_v32, %v953_v38  ;;  %v954_v43 = vmul.f32 0.01, %v938_v29  ;;  %v955_v44 = vmul.f32 0.01, %v939_v33 }
 0x171   : > { %v1133_v45 = vpack.c.bf16 %v959_v41, %v958_v39  ;;  %v1134_v46 = vpack.c.bf16 %v961_v42, %v960_v40  ;;  %vm948_vm6 = vcmp.ge.f32.partialorder %v940_v30, 0.0  ;;  %vm949_vm7 = vcmp.ge.f32.partialorder %v941_v34, 0.0 }
 0x172   : > { %v962_v47 = vsel %vm946_vm4, %v938_v29, %v954_v43  ;;  %v963_v48 = vsel %vm947_vm5, %v939_v33, %v955_v44  ;;  %v956_v49 = vmul.f32 0.01, %v940_v30  ;;  %v957_v50 = vmul.f32 0.01, %v941_v34 }
 0x173   : > { %990 = vst [vmem:[%s1525_s4] sm:$0xff] %v1133_v45  ;;  %991 = vst [vmem:[%s1525_s4 + $0x8] sm:$0xff] %v1134_v46  ;;  %v1135_v51 = vpack.c.bf16 %v963_v48, %v962_v47 }
 0x174   : > { %v964_v52 = vsel %vm948_vm6, %v940_v30, %v956_v49  ;;  %v965_v53 = vsel %vm949_vm7, %v941_v34, %v957_v50 }
 0x175   : > { %992 = vst [vmem:[%s1525_s4 + $0x10] sm:$0xff] %v1135_v51  ;;  %v1136_v54 = vpack.c.bf16 %v965_v53, %v964_v52 }
 0x177   : > { %993 = vst [vmem:[%s1525_s4 + $0x18] sm:$0xff] %v1136_v54 }
 0x178 PF: > { %p11_p11 = scmp.ge.s32.totalorder %s1343_s19, 6   ;;  %s1526_s15 = smov %s1292_s16 }
 0x179   : > { %s1527_s16 = smov %s1352_s22  ;;  %s1528_s17 = smov %s1343_s19 }
 0x17a   :  { %13 = sbr.rel (!%p11_p11) target bundleno = 2 (0x2), region = 101 }

// kernel: encoder_forward.9
= control target key start
LH: loop header
LB: loop body
LE: loop exit
PB: predicated region body
PF: predicated region fallthrough
CT: control target
= control target key end

     0   :  { %s643_s0 = inlined_call_operand.vmem [shape: bf16[8,512], index: 0, kind: input, shape index: {}]   ;;  %s644_s1 = inlined_call_operand.vmem [shape: bf16[512,128], index: 1, kind: input, shape index: {}]   ;;  %s645_s2 = inlined_call_operand.hbm [shape: f32[8,128], index: 2, kind: output, shape index: {}]  }
   0x1   :  { %v462_v0 = vld [vmem:[%s644_s1 + $0x78] sm:$0xff]   ;;  %v466_v4 = vld [vmem:[%s644_s1 + $0x70] sm:$0xff]   ;;  %v470_v8 = vld [vmem:[%s644_s1 + $0x68] sm:$0xff]  }
   0x2   :  { %v463_v1 = vld [vmem:[%s644_s1 + $0xf8] sm:$0xff]   ;;  %417 = vmatprep.subr.bf16.mxu0 %v462_v0  ;;  %v467_v5 = vld [vmem:[%s644_s1 + $0xf0] sm:$0xff]   ;;  %v471_v9 = vld [vmem:[%s644_s1 + $0xe8] sm:$0xff]  }
   0x3   :  { %v464_v2 = vld [vmem:[%s644_s1 + $0x38] sm:$0xff]   ;;  %439 = vmatprep.subr.bf16.mxu1 %v463_v1  ;;  %v468_v6 = vld [vmem:[%s644_s1 + $0x30] sm:$0xff]   ;;  %v472_v10 = vld [vmem:[%s644_s1 + $0x28] sm:$0xff]  }
   0x4   :  { %v465_v3 = vld [vmem:[%s644_s1 + $0xb8] sm:$0xff]   ;;  %418 = vmatpush3.bf16.msra.mxu0 %v464_v2  ;;  %v469_v7 = vld [vmem:[%s644_s1 + $0xb0] sm:$0xff]   ;;  %v473_v11 = vld [vmem:[%s644_s1 + $0xa8] sm:$0xff]  }
   0x5   :  { %440 = vmatpush3.bf16.msra.mxu1 %v465_v3  ;;  %419 = vmatprep.subr.bf16.mxu0 %v466_v4  ;;  %v474_v12 = vld [vmem:[%s644_s1 + $0x60] sm:$0xff]   ;;  %v478_v16 = vld [vmem:[%s644_s1 + $0x58] sm:$0xff]   ;;  %v482_v20 = vld [vmem:[%s644_s1 + $0x50] sm:$0xff]  }
   0x6   :  { %441 = vmatprep.subr.bf16.mxu1 %v467_v5  ;;  %v475_v13 = vld [vmem:[%s644_s1 + $0xe0] sm:$0xff]   ;;  %v479_v17 = vld [vmem:[%s644_s1 + $0xd8] sm:$0xff]   ;;  %v483_v21 = vld [vmem:[%s644_s1 + $0xd0] sm:$0xff]  }
   0x7   :  { %v476_v14 = vld [vmem:[%s644_s1 + $0x20] sm:$0xff]   ;;  %v480_v18 = vld [vmem:[%s644_s1 + $0x18] sm:$0xff]   ;;  %v484_v22 = vld [vmem:[%s644_s1 + $0x10] sm:$0xff]  }
   0x8   :  { %420 = vmatpush3.bf16.msra.mxu0 %v468_v6  ;;  %v477_v15 = vld [vmem:[%s644_s1 + $0xa0] sm:$0xff]   ;;  %v481_v19 = vld [vmem:[%s644_s1 + $0x98] sm:$0xff]   ;;  %v485_v23 = vld [vmem:[%s644_s1 + $0x90] sm:$0xff]  }
   0x9   :  { %442 = vmatpush3.bf16.msra.mxu1 %v469_v7  ;;  %421 = vmatprep.subr.bf16.mxu0 %v470_v8  ;;  %v486_v24 = vld [vmem:[%s644_s1 + $0x48] sm:$0xff]   ;;  %v490_v28 = vld [vmem:[%s644_s1 + $0x40] sm:$0xff]  }
   0xa   :  { %443 = vmatprep.subr.bf16.mxu1 %v471_v9  ;;  %v487_v25 = vld [vmem:[%s644_s1 + $0xc8] sm:$0xff]   ;;  %v491_v29 = vld [vmem:[%s644_s1 + $0xc0] sm:$0xff]  }
   0xb   :  { %v488_v26 = vld [vmem:[%s644_s1 + $0x8] sm:$0xff]   ;;  %v492_v30 = vld [vmem:[%s644_s1] sm:$0xff]  }
   0xc   :  { %422 = vmatpush3.bf16.msra.mxu0 %v472_v10  ;;  %v489_v27 = vld [vmem:[%s644_s1 + $0x88] sm:$0xff]   ;;  %v493_v31 = vld [vmem:[%s644_s1 + $0x80] sm:$0xff]  }
   0xd   :  { %444 = vmatpush3.bf16.msra.mxu1 %v473_v11  ;;  %423 = vmatprep.subr.bf16.mxu0 %v474_v12  ;;  %v13_v32 = vld [vmem:[%s643_s0] sm:$0xff]  ;;  %v14_v33 = vld [vmem:[%s643_s0 + $0x8] sm:$0xff] }
   0xe   :  { %445 = vmatprep.subr.bf16.mxu1 %v475_v13 }
  0x10   :  { %424 = vmatpush3.bf16.msra.mxu0 %v476_v14 }
  0x11   :  { %446 = vmatpush3.bf16.msra.mxu1 %v477_v15  ;;  %425 = vmatprep.subr.bf16.mxu0 %v478_v16 }
  0x12   :  { %447 = vmatprep.subr.bf16.mxu1 %v479_v17 }
  0x14   :  { %426 = vmatpush3.bf16.msra.mxu0 %v480_v18 }
  0x15   :  { %448 = vmatpush3.bf16.msra.mxu1 %v481_v19  ;;  %427 = vmatprep.subr.bf16.mxu0 %v482_v20 }
  0x16   :  { %449 = vmatprep.subr.bf16.mxu1 %v483_v21 }
  0x18   :  { %428 = vmatpush3.bf16.msra.mxu0 %v484_v22 }
  0x19   :  { %450 = vmatpush3.bf16.msra.mxu1 %v485_v23  ;;  %429 = vmatprep.subr.bf16.mxu0 %v486_v24 }
  0x1a   :  { %451 = vmatprep.subr.bf16.mxu1 %v487_v25 }
  0x1c   :  { %430 = vmatpush3.bf16.msra.mxu0 %v488_v26 }
  0x1d   :  { %452 = vmatpush3.bf16.msra.mxu1 %v489_v27  ;;  %431 = vmatprep.subr.bf16.mxu0 %v490_v28 }
  0x1e   :  { %453 = vmatprep.subr.bf16.mxu1 %v491_v29 }
  0x20   :  { %432 = vmatpush3.bf16.msra.mxu0 %v492_v30 }
  0x21   :  { %7 = vsyncpa [#allocation3], 0  ;;  %454 = vmatpush3.bf16.msra.mxu1 %v493_v31  ;;  %v381_v34 = vcombine.low %v13_v32, %v13_v32  ;;  %v382_v35 = vcombine.high %v13_v32, %v13_v32  ;;  %v383_v36 = vcombine.low %v14_v33, %v14_v33  ;;  %v384_v37 = vcombine.high %v14_v33, %v14_v33  ;;  %s522_s0 = smov [#allocation2]  }
  0x22   :  { %s373_s1 = sshll.u32 %s522_s0, 4  ;;  %s374_s1 = int_to_ptr.vmem [resolvable:$true] %s373_s1 }
  0x23   :  { %317 = vmatprep.mubr.bf16.mxu0 %v382_v35  ;;  %357 = vmatprep.mubr.bf16.mxu1 %v384_v37  ;;  %s500_s21 = scalar_lea.vmem %s374_s1, 128  ;;  %p505_p1 = scmp.lt.s32.totalorder %s374_s1, %s374_s1 }
  0x24   :  { %318 = vmatmul.mubr.bf16.vlgmr.msra.gmra.mxu0 %v381_v34  ;;  %358 = vmatmul.mubr.bf16.vlgmr.msra.gmra.mxu1 %v383_v36  ;;  %p501_p0 = scmp.ne.s32.totalorder %s374_s1, %s500_s21  ;;  %p506_p2 = scmp.lt.s32.totalorder %s500_s21, %s500_s21 }
  0x26   :  { %p507_p3 = por %p506_p2, %p505_p1 }
  0x28   :  { %p508_p4 = pnand %p507_p3, %p501_p0 }
  0xe4   :  { %v433_v38 = vpop.f32.mrf.mxu0  ;;  %v455_v39 = vpop.f32.mrf.mxu1 }
  0xe6   :  { %v434_v40 = vpop.f32.mrf.mxu0  ;;  %v456_v41 = vpop.f32.mrf.mxu1 }
  0xe7   :  { %v435_v42 = vadd.f32 %v434_v40, %v433_v38  ;;  %v457_v43 = vadd.f32 %v456_v41, %v455_v39 }
  0xe8   :  { %v436_v44 = vpop.f32.mrf.mxu0  ;;  %v458_v45 = vpop.f32.mrf.mxu1 }
  0xe9   :  { %v360_v46 = vadd.f32 %v457_v43, %v435_v42 }
  0xea   :  { %v437_v47 = vpop.f32.mrf.mxu0  ;;  %v459_v48 = vpop.f32.mrf.mxu1 }
  0xeb   :  { %498 = vtanh.f32 %v360_v46 }
  0xf8   :  { %v499_v49 = vpop.eup %498 }
  0xf9   :  { %366 = vst [vmem:[#allocation2] sm:$0xff] %v499_v49 }
  0xfa   :  { %511 = shalt.err (!%p508_p4)
}
  0xfb   :  { %376 = dma.vmem_to_hbm [thread:$0]  %s374_s1, 128, %s645_s2, [#allocation3]  }
  0xfc   :  { %520 = dma.done.wait [#allocation3], 128  }
  0xfd   :  { %521 = vsyncadd [#allocation3], 4294967168 }
  0xfe   :  { %380 = vsyncpa [#allocation3], 1 }

// kernel: encoder_forward.8
= control target key start
LH: loop header
LB: loop body
LE: loop exit
PB: predicated region body
PF: predicated region fallthrough
CT: control target
= control target key end

     0   :  { %s1790_s15 = smov 0   ;;  %s1999_s0 = inlined_call_operand.vmem [shape: bf16[8,4096], index: 0, kind: input, shape index: {}]   ;;  %s2000_s1 = inlined_call_operand.vmem [shape: bf16[4096,512], index: 1, kind: input, shape index: {}]   ;;  %s2001_s2 = inlined_call_operand.vmem [shape: f32[1,512], index: 2, kind: input, shape index: {}]   ;;  %s2002_s3 = inlined_call_operand.vmem [shape: f32[1,512], index: 3, kind: input, shape index: {}]   ;;  %s2003_s4 = inlined_call_operand.vmem [shape: bf16[8,512], index: 4, kind: output, shape index: {}]  }
   0x1 LB: > { %s1796_s16 = sadd.s32 4294967295, %s1762_s15   ;;  %p1396_p0 = scmp.ge.s32.totalorder %s1762_s15, 1  ;;  %s1762_s15 = sphi %s1790_s15, %s14_s15  }
   0x2   : > { %p170_p1 = scmp.lt.s32.totalorder %s1762_s15, 9 }
   0x4   : > { %p171_p2 = pnand %p1396_p0, %p170_p1 }
   0x5   : > { %s1397_s17 = sshll.u32 (!%p171_p2), %s1796_s16, 2  ;;  %s1399_s18 = sshll.u32 (!%p171_p2), %s1796_s16, 6 }
   0x6   : > { %174 = sbr.rel (%p171_p2) target bundleno = 406 (0x196), region = 36  ;;  %p198_p3 = scmp.lt.s32.totalorder (!%p171_p2), %s1397_s17, 31 }
   0x7   : > { %p204_p4 = scmp.lt.s32.totalorder (!%p171_p2), %s1399_s18, 511  ;;  %p1402_p5 = scmp.ne.s32.totalorder (!%p171_p2), %s1796_s16, 0 }
   0xb   : > { %s2005_s17 = smov (!%p198_p3, %s1397_s17), 31  ;;  %s2007_s18 = smov (!%p204_p4, %s1399_s18), 511 }
   0xc   : > { %s1398_s19 = sshll.u32 %s2005_s17, 2  ;;  %s1540_s23 = sshll.u32 %s2007_s18, 4 }
   0xd   : > { %s1805_s22 = scalar_lea.vmem %s1999_s0, %s1398_s19  ;;  %s1810_s26 = scalar_lea.vmem %s2000_s1, %s1540_s23 }
   0xe   : > { %213 = sbr.rel (%p1402_p5) target bundleno = 22 (0x16), region = 40 }
  0x13   : > { %v1764_v0 = vmov 0.0  }
  0x14   : > { %214 = vst [vmem:[#allocation2 + $0x10] sm:$0xff] %v1764_v0  ;;  %215 = vst [vmem:[#allocation2] sm:$0xff] %v1764_v0 }
  0x15   : > { %216 = vst [vmem:[#allocation2 + $0x18] sm:$0xff] %v1764_v0  ;;  %217 = vst [vmem:[#allocation2 + $0x8] sm:$0xff] %v1764_v0 }
  0x16 PF: > { %v1552_v1 = vld [vmem:[%s1810_s26 + $0xe4] ss:$16 sps:$4 sm:$0xff]   ;;  %v1556_v3 = vld [vmem:[%s1810_s26 + $0xe0] ss:$16 sps:$4 sm:$0xff]   ;;  %v223_v49 = vld [vmem:[%s1805_s22 + $0x8] sm:$0xff]  ;;  %p1535_p6 = scmp.ne.s32.totalorder %s1796_s16, 7 }
  0x17   : > { %v1554_v2 = vld [vmem:[%s1810_s26 + $0x2e4] ss:$16 sps:$4 sm:$0xff]   ;;  %1006 = vmatprep.subr.bf16.mxu0 %v1552_v1  ;;  %v1557_v4 = vld [vmem:[%s1810_s26 + $0x2e0] ss:$16 sps:$4 sm:$0xff]   ;;  %v1406_v52 = vcombine.high %v223_v49, %v223_v49 }
  0x18   : > { %1047 = vmatprep.subr.bf16.mxu1 %v1554_v2  ;;  %v1558_v5 = vld [vmem:[%s1810_s26 + $0xc4] ss:$16 sps:$4 sm:$0xff]   ;;  %1007 = vmatpush1.bf16.msra.mxu0 %v1556_v3  ;;  %v1562_v7 = vld [vmem:[%s1810_s26 + $0xc0] ss:$16 sps:$4 sm:$0xff]  }
  0x19   : > { %1048 = vmatpush1.bf16.msra.mxu1 %v1557_v4  ;;  %v1560_v6 = vld [vmem:[%s1810_s26 + $0x2c4] ss:$16 sps:$4 sm:$0xff]   ;;  %1008 = vmatprep.subr.bf16.mxu0 %v1558_v5  ;;  %v1563_v8 = vld [vmem:[%s1810_s26 + $0x2c0] ss:$16 sps:$4 sm:$0xff]   ;;  %v1654_v5 = vld [vmem:[%s1810_s26 + $0xec] ss:$16 sps:$4 sm:$0xff]  }
  0x1a   : > { %1049 = vmatprep.subr.bf16.mxu1 %v1560_v6  ;;  %v1564_v9 = vld [vmem:[%s1810_s26 + $0xa4] ss:$16 sps:$4 sm:$0xff]   ;;  %v1568_v11 = vld [vmem:[%s1810_s26 + $0xa0] ss:$16 sps:$4 sm:$0xff]   ;;  %1079 = vmatprep.mubr.bf16.mxu1 %v1406_v52  ;;  %v1657_v6 = vld [vmem:[%s1810_s26 + $0x2ec] ss:$16 sps:$4 sm:$0xff]  }
  0x1b   : > { %v1566_v10 = vld [vmem:[%s1810_s26 + $0x2a4] ss:$16 sps:$4 sm:$0xff]   ;;  %v1569_v12 = vld [vmem:[%s1810_s26 + $0x2a0] ss:$16 sps:$4 sm:$0xff]  }
  0x1c   : > { %1009 = vmatpush1.bf16.msra.mxu0 %v1562_v7  ;;  %v1570_v13 = vld [vmem:[%s1810_s26 + $0x84] ss:$16 sps:$4 sm:$0xff]   ;;  %v1574_v15 = vld [vmem:[%s1810_s26 + $0x80] ss:$16 sps:$4 sm:$0xff]  }
  0x1d   : > { %1050 = vmatpush1.bf16.msra.mxu1 %v1563_v8  ;;  %1010 = vmatprep.subr.bf16.mxu0 %v1564_v9  ;;  %v1572_v14 = vld [vmem:[%s1810_s26 + $0x284] ss:$16 sps:$4 sm:$0xff]   ;;  %v1575_v16 = vld [vmem:[%s1810_s26 + $0x280] ss:$16 sps:$4 sm:$0xff]   ;;  %v1886_v8 = vcombine.low %v223_v49, %v223_v49  ;;  %v1652_v9 = vld [vmem:[%s1810_s26 + $0xe8] ss:$16 sps:$4 sm:$0xff]  }
  0x1e   : > { %1051 = vmatprep.subr.bf16.mxu1 %v1566_v10  ;;  %v1576_v17 = vld [vmem:[%s1810_s26 + $0x64] ss:$16 sps:$4 sm:$0xff]   ;;  %v1580_v19 = vld [vmem:[%s1810_s26 + $0x60] ss:$16 sps:$4 sm:$0xff]   ;;  %v1655_v10 = vld [vmem:[%s1810_s26 + $0x2e8] ss:$16 sps:$4 sm:$0xff]  }
  0x1f   : > { %v1578_v18 = vld [vmem:[%s1810_s26 + $0x264] ss:$16 sps:$4 sm:$0xff]   ;;  %v1581_v20 = vld [vmem:[%s1810_s26 + $0x260] ss:$16 sps:$4 sm:$0xff]   ;;  %v1712_v49 = vld [vmem:[%s1810_s26 + $0x1a8] ss:$16 sps:$4 sm:$0xff]  }
  0x20   : > { %1011 = vmatpush1.bf16.msra.mxu0 %v1568_v11  ;;  %v1582_v21 = vld [vmem:[%s1810_s26 + $0x44] ss:$16 sps:$4 sm:$0xff]   ;;  %v1586_v23 = vld [vmem:[%s1810_s26 + $0x40] ss:$16 sps:$4 sm:$0xff]   ;;  %v1660_v11 = vld [vmem:[%s1810_s26 + $0xcc] ss:$16 sps:$4 sm:$0xff]  }
  0x21   : > { %1052 = vmatpush1.bf16.msra.mxu1 %v1569_v12  ;;  %1012 = vmatprep.subr.bf16.mxu0 %v1570_v13  ;;  %v1584_v22 = vld [vmem:[%s1810_s26 + $0x244] ss:$16 sps:$4 sm:$0xff]   ;;  %v1587_v24 = vld [vmem:[%s1810_s26 + $0x240] ss:$16 sps:$4 sm:$0xff]   ;;  %v1663_v12 = vld [vmem:[%s1810_s26 + $0x2cc] ss:$16 sps:$4 sm:$0xff]  }
  0x22   : > { %1053 = vmatprep.subr.bf16.mxu1 %v1572_v14  ;;  %v1588_v25 = vld [vmem:[%s1810_s26 + $0x24] ss:$16 sps:$4 sm:$0xff]   ;;  %v1592_v27 = vld [vmem:[%s1810_s26 + $0x20] ss:$16 sps:$4 sm:$0xff]   ;;  %v1658_v13 = vld [vmem:[%s1810_s26 + $0xc8] ss:$16 sps:$4 sm:$0xff]  }
  0x23   : > { %v1590_v26 = vld [vmem:[%s1810_s26 + $0x224] ss:$16 sps:$4 sm:$0xff]   ;;  %v1593_v28 = vld [vmem:[%s1810_s26 + $0x220] ss:$16 sps:$4 sm:$0xff]   ;;  %v1661_v14 = vld [vmem:[%s1810_s26 + $0x2c8] ss:$16 sps:$4 sm:$0xff]  }
  0x24   : > { %1013 = vmatpush1.bf16.msra.mxu0 %v1574_v15  ;;  %v1594_v29 = vld [vmem:[%s1810_s26 + $0x4] ss:$16 sps:$4 sm:$0xff]   ;;  %v1598_v31 = vld [vmem:[%s1810_s26] ss:$16 sps:$4 sm:$0xff]   ;;  %v1666_v15 = vld [vmem:[%s1810_s26 + $0xac] ss:$16 sps:$4 sm:$0xff]  }
  0x25   : > { %1054 = vmatpush1.bf16.msra.mxu1 %v1575_v16  ;;  %1014 = vmatprep.subr.bf16.mxu0 %v1576_v17  ;;  %v1596_v30 = vld [vmem:[%s1810_s26 + $0x204] ss:$16 sps:$4 sm:$0xff]   ;;  %v1599_v32 = vld [vmem:[%s1810_s26 + $0x200] ss:$16 sps:$4 sm:$0xff]   ;;  %v1669_v16 = vld [vmem:[%s1810_s26 + $0x2ac] ss:$16 sps:$4 sm:$0xff]  }
  0x26   : > { %1055 = vmatprep.subr.bf16.mxu1 %v1578_v18  ;;  %v1600_v33 = vld [vmem:[%s1810_s26 + $0x1e4] ss:$16 sps:$4 sm:$0xff]   ;;  %v1604_v35 = vld [vmem:[%s1810_s26 + $0x1e0] ss:$16 sps:$4 sm:$0xff]   ;;  %v1664_v17 = vld [vmem:[%s1810_s26 + $0xa8] ss:$16 sps:$4 sm:$0xff]  }
  0x27   : > { %v1602_v34 = vld [vmem:[%s1810_s26 + $0x3e4] ss:$16 sps:$4 sm:$0xff]   ;;  %v1605_v36 = vld [vmem:[%s1810_s26 + $0x3e0] ss:$16 sps:$4 sm:$0xff]   ;;  %v1667_v18 = vld [vmem:[%s1810_s26 + $0x2a8] ss:$16 sps:$4 sm:$0xff]  }
  0x28   : > { %1015 = vmatpush1.bf16.msra.mxu0 %v1580_v19  ;;  %v1606_v37 = vld [vmem:[%s1810_s26 + $0x1c4] ss:$16 sps:$4 sm:$0xff]   ;;  %v1610_v39 = vld [vmem:[%s1810_s26 + $0x1c0] ss:$16 sps:$4 sm:$0xff]   ;;  %v1672_v19 = vld [vmem:[%s1810_s26 + $0x8c] ss:$16 sps:$4 sm:$0xff]  }
  0x29   : > { %1056 = vmatpush1.bf16.msra.mxu1 %v1581_v20  ;;  %1016 = vmatprep.subr.bf16.mxu0 %v1582_v21  ;;  %v1608_v38 = vld [vmem:[%s1810_s26 + $0x3c4] ss:$16 sps:$4 sm:$0xff]   ;;  %v1611_v40 = vld [vmem:[%s1810_s26 + $0x3c0] ss:$16 sps:$4 sm:$0xff]   ;;  %v1675_v20 = vld [vmem:[%s1810_s26 + $0x28c] ss:$16 sps:$4 sm:$0xff]  }
  0x2a   : > { %1057 = vmatprep.subr.bf16.mxu1 %v1584_v22  ;;  %v1612_v41 = vld [vmem:[%s1810_s26 + $0x1a4] ss:$16 sps:$4 sm:$0xff]   ;;  %v1616_v43 = vld [vmem:[%s1810_s26 + $0x1a0] ss:$16 sps:$4 sm:$0xff]   ;;  %v1670_v21 = vld [vmem:[%s1810_s26 + $0x88] ss:$16 sps:$4 sm:$0xff]  }
  0x2b   : > { %v1614_v42 = vld [vmem:[%s1810_s26 + $0x3a4] ss:$16 sps:$4 sm:$0xff]   ;;  %v1617_v44 = vld [vmem:[%s1810_s26 + $0x3a0] ss:$16 sps:$4 sm:$0xff]   ;;  %v1673_v22 = vld [vmem:[%s1810_s26 + $0x288] ss:$16 sps:$4 sm:$0xff]  }
  0x2c   : > { %1017 = vmatpush1.bf16.msra.mxu0 %v1586_v23  ;;  %v1618_v45 = vld [vmem:[%s1810_s26 + $0x184] ss:$16 sps:$4 sm:$0xff]   ;;  %v1622_v50 = vld [vmem:[%s1810_s26 + $0x180] ss:$16 sps:$4 sm:$0xff]   ;;  %v1678_v23 = vld [vmem:[%s1810_s26 + $0x6c] ss:$16 sps:$4 sm:$0xff]  }
  0x2d   : > { %1058 = vmatpush1.bf16.msra.mxu1 %v1587_v24  ;;  %1018 = vmatprep.subr.bf16.mxu0 %v1588_v25  ;;  %v1620_v46 = vld [vmem:[%s1810_s26 + $0x384] ss:$16 sps:$4 sm:$0xff]   ;;  %v1623_v51 = vld [vmem:[%s1810_s26 + $0x380] ss:$16 sps:$4 sm:$0xff]   ;;  %v1681_v24 = vld [vmem:[%s1810_s26 + $0x26c] ss:$16 sps:$4 sm:$0xff]  }
  0x2e   : > { %1059 = vmatprep.subr.bf16.mxu1 %v1590_v26  ;;  %v222_v47 = vld [vmem:[%s1805_s22] sm:$0xff]  ;;  %v1676_v25 = vld [vmem:[%s1810_s26 + $0x68] ss:$16 sps:$4 sm:$0xff]  }
  0x2f   : > { %v1860_v48 = vcombine.high %v222_v47, %v222_v47  ;;  %v1624_v53 = vld [vmem:[%s1810_s26 + $0x164] ss:$16 sps:$4 sm:$0xff]   ;;  %v1628_v55 = vld [vmem:[%s1810_s26 + $0x160] ss:$16 sps:$4 sm:$0xff]   ;;  %v1884_v7 = vcombine.low %v222_v47, %v222_v47  ;;  %v1679_v26 = vld [vmem:[%s1810_s26 + $0x268] ss:$16 sps:$4 sm:$0xff]  }
  0x30   : > { %1019 = vmatpush1.bf16.msra.mxu0 %v1592_v27  ;;  %v1626_v54 = vld [vmem:[%s1810_s26 + $0x364] ss:$16 sps:$4 sm:$0xff]   ;;  %v1629_v56 = vld [vmem:[%s1810_s26 + $0x360] ss:$16 sps:$4 sm:$0xff]   ;;  %v1684_v27 = vld [vmem:[%s1810_s26 + $0x4c] ss:$16 sps:$4 sm:$0xff]  }
  0x31   : > { %1060 = vmatpush1.bf16.msra.mxu1 %v1593_v28  ;;  %1020 = vmatprep.subr.bf16.mxu0 %v1594_v29  ;;  %v1630_v57 = vld [vmem:[%s1810_s26 + $0x144] ss:$16 sps:$4 sm:$0xff]   ;;  %v1634_v59 = vld [vmem:[%s1810_s26 + $0x140] ss:$16 sps:$4 sm:$0xff]   ;;  %v1687_v28 = vld [vmem:[%s1810_s26 + $0x24c] ss:$16 sps:$4 sm:$0xff]  }
  0x32   : > { %1061 = vmatprep.subr.bf16.mxu1 %v1596_v30  ;;  %1038 = vmatprep.mubr.bf16.mxu0 %v1860_v48  ;;  %v1632_v58 = vld [vmem:[%s1810_s26 + $0x344] ss:$16 sps:$4 sm:$0xff]   ;;  %v1635_v60 = vld [vmem:[%s1810_s26 + $0x340] ss:$16 sps:$4 sm:$0xff]   ;;  %v1682_v29 = vld [vmem:[%s1810_s26 + $0x48] ss:$16 sps:$4 sm:$0xff]  }
  0x33   : > { %v1636_v61 = vld [vmem:[%s1810_s26 + $0x124] ss:$16 sps:$4 sm:$0xff]   ;;  %v1640_v63 = vld [vmem:[%s1810_s26 + $0x120] ss:$16 sps:$4 sm:$0xff]   ;;  %v1685_v30 = vld [vmem:[%s1810_s26 + $0x248] ss:$16 sps:$4 sm:$0xff]  }
  0x34   : > { %1021 = vmatpush1.bf16.msra.mxu0 %v1598_v31  ;;  %v1638_v62 = vld [vmem:[%s1810_s26 + $0x324] ss:$16 sps:$4 sm:$0xff]   ;;  %v1641_v0 = vld [vmem:[%s1810_s26 + $0x320] ss:$16 sps:$4 sm:$0xff]   ;;  %v1690_v31 = vld [vmem:[%s1810_s26 + $0x2c] ss:$16 sps:$4 sm:$0xff]  }
  0x35   : > { %1062 = vmatpush1.bf16.msra.mxu1 %v1599_v32  ;;  %1022 = vmatprep.subr.bf16.mxu0 %v1600_v33  ;;  %v1642_v1 = vld [vmem:[%s1810_s26 + $0x104] ss:$16 sps:$4 sm:$0xff]   ;;  %v1646_v3 = vld [vmem:[%s1810_s26 + $0x100] ss:$16 sps:$4 sm:$0xff]   ;;  %v1693_v32 = vld [vmem:[%s1810_s26 + $0x22c] ss:$16 sps:$4 sm:$0xff]  }
  0x36   : > { %1063 = vmatprep.subr.bf16.mxu1 %v1602_v34  ;;  %v1644_v2 = vld [vmem:[%s1810_s26 + $0x304] ss:$16 sps:$4 sm:$0xff]   ;;  %v1647_v4 = vld [vmem:[%s1810_s26 + $0x300] ss:$16 sps:$4 sm:$0xff]   ;;  %v1688_v33 = vld [vmem:[%s1810_s26 + $0x28] ss:$16 sps:$4 sm:$0xff]  }
  0x37   : > { %v1691_v34 = vld [vmem:[%s1810_s26 + $0x228] ss:$16 sps:$4 sm:$0xff]   ;;  %v1714_v47 = vld [vmem:[%s1810_s26 + $0x1ac] ss:$16 sps:$4 sm:$0xff]  }
  0x38   : > { %1023 = vmatpush2.bf16.msra.mxu0 %v1604_v35  ;;  %v1696_v35 = vld [vmem:[%s1810_s26 + $0xc] ss:$16 sps:$4 sm:$0xff]  }
  0x39   : > { %1064 = vmatpush2.bf16.msra.mxu1 %v1605_v36  ;;  %1024 = vmatprep.subr.bf16.mxu0 %v1606_v37  ;;  %v1699_v36 = vld [vmem:[%s1810_s26 + $0x20c] ss:$16 sps:$4 sm:$0xff]   ;;  %v1694_v37 = vld [vmem:[%s1810_s26 + $0x8] ss:$16 sps:$4 sm:$0xff]  }
  0x3a   : > { %1065 = vmatprep.subr.bf16.mxu1 %v1608_v38  ;;  %v1697_v38 = vld [vmem:[%s1810_s26 + $0x208] ss:$16 sps:$4 sm:$0xff]  }
  0x3c   : > { %1025 = vmatpush2.bf16.msra.mxu0 %v1610_v39  ;;  %v1702_v39 = vld [vmem:[%s1810_s26 + $0x1ec] ss:$16 sps:$4 sm:$0xff]  }
  0x3d   : > { %1066 = vmatpush2.bf16.msra.mxu1 %v1611_v40  ;;  %1026 = vmatprep.subr.bf16.mxu0 %v1612_v41  ;;  %v1705_v40 = vld [vmem:[%s1810_s26 + $0x3ec] ss:$16 sps:$4 sm:$0xff]   ;;  %v1700_v41 = vld [vmem:[%s1810_s26 + $0x1e8] ss:$16 sps:$4 sm:$0xff]  }
  0x3e   : > { %1067 = vmatprep.subr.bf16.mxu1 %v1614_v42  ;;  %v1703_v42 = vld [vmem:[%s1810_s26 + $0x3e8] ss:$16 sps:$4 sm:$0xff]  }
  0x40   : > { %1027 = vmatpush2.bf16.msra.mxu0 %v1616_v43  ;;  %v1708_v43 = vld [vmem:[%s1810_s26 + $0x1cc] ss:$16 sps:$4 sm:$0xff]  }
  0x41   : > { %1068 = vmatpush2.bf16.msra.mxu1 %v1617_v44  ;;  %1028 = vmatprep.subr.bf16.mxu0 %v1618_v45  ;;  %v1711_v44 = vld [vmem:[%s1810_s26 + $0x3cc] ss:$16 sps:$4 sm:$0xff]   ;;  %v1706_v45 = vld [vmem:[%s1810_s26 + $0x1c8] ss:$16 sps:$4 sm:$0xff]  }
  0x42   : > { %1069 = vmatprep.subr.bf16.mxu1 %v1620_v46  ;;  %v1709_v46 = vld [vmem:[%s1810_s26 + $0x3c8] ss:$16 sps:$4 sm:$0xff]  }
  0x44   : > { %1029 = vmatpush2.bf16.msra.mxu0 %v1622_v50  ;;  %v1715_v50 = vld [vmem:[%s1810_s26 + $0x3a8] ss:$16 sps:$4 sm:$0xff]  }
  0x45   : > { %1070 = vmatpush2.bf16.msra.mxu1 %v1623_v51  ;;  %1030 = vmatprep.subr.bf16.mxu0 %v1624_v53  ;;  %v1720_v51 = vld [vmem:[%s1810_s26 + $0x18c] ss:$16 sps:$4 sm:$0xff]   ;;  %v1718_v53 = vld [vmem:[%s1810_s26 + $0x188] ss:$16 sps:$4 sm:$0xff]  }
  0x46   : > { %1071 = vmatprep.subr.bf16.mxu1 %v1626_v54  ;;  %v1721_v54 = vld [vmem:[%s1810_s26 + $0x388] ss:$16 sps:$4 sm:$0xff]  }
  0x48   : > { %1031 = vmatpush2.bf16.msra.mxu0 %v1628_v55  ;;  %v1726_v55 = vld [vmem:[%s1810_s26 + $0x16c] ss:$16 sps:$4 sm:$0xff]  }
  0x49   : > { %1072 = vmatpush2.bf16.msra.mxu1 %v1629_v56  ;;  %1032 = vmatprep.subr.bf16.mxu0 %v1630_v57  ;;  %v1729_v56 = vld [vmem:[%s1810_s26 + $0x36c] ss:$16 sps:$4 sm:$0xff]   ;;  %v1724_v57 = vld [vmem:[%s1810_s26 + $0x168] ss:$16 sps:$4 sm:$0xff]  }
  0x4a   : > { %1073 = vmatprep.subr.bf16.mxu1 %v1632_v58  ;;  %v1727_v58 = vld [vmem:[%s1810_s26 + $0x368] ss:$16 sps:$4 sm:$0xff]  }
  0x4c   : > { %1033 = vmatpush2.bf16.msra.mxu0 %v1634_v59  ;;  %v1732_v59 = vld [vmem:[%s1810_s26 + $0x14c] ss:$16 sps:$4 sm:$0xff]  }
  0x4d   : > { %1074 = vmatpush2.bf16.msra.mxu1 %v1635_v60  ;;  %1034 = vmatprep.subr.bf16.mxu0 %v1636_v61  ;;  %v1735_v60 = vld [vmem:[%s1810_s26 + $0x34c] ss:$16 sps:$4 sm:$0xff]   ;;  %v1730_v61 = vld [vmem:[%s1810_s26 + $0x148] ss:$16 sps:$4 sm:$0xff]  }
  0x4e   : > { %1075 = vmatprep.subr.bf16.mxu1 %v1638_v62  ;;  %v1733_v62 = vld [vmem:[%s1810_s26 + $0x348] ss:$16 sps:$4 sm:$0xff]  }
  0x50   : > { %1035 = vmatpush2.bf16.msra.mxu0 %v1640_v63  ;;  %v1738_v63 = vld [vmem:[%s1810_s26 + $0x12c] ss:$16 sps:$4 sm:$0xff]  }
  0x51   : > { %1076 = vmatpush2.bf16.msra.mxu1 %v1641_v0  ;;  %1036 = vmatprep.subr.bf16.mxu0 %v1642_v1  ;;  %v1741_v0 = vld [vmem:[%s1810_s26 + $0x32c] ss:$16 sps:$4 sm:$0xff]   ;;  %v1736_v1 = vld [vmem:[%s1810_s26 + $0x128] ss:$16 sps:$4 sm:$0xff]  }
  0x52   : > { %1077 = vmatprep.subr.bf16.mxu1 %v1644_v2  ;;  %v1739_v2 = vld [vmem:[%s1810_s26 + $0x328] ss:$16 sps:$4 sm:$0xff]  }
  0x54   : > { %1037 = vmatpush2.bf16.msra.mxu0 %v1646_v3  ;;  %v1744_v3 = vld [vmem:[%s1810_s26 + $0x10c] ss:$16 sps:$4 sm:$0xff]  }
  0x55   : > { %1078 = vmatpush2.bf16.msra.mxu1 %v1647_v4  ;;  %1088 = vmatprep.subr.bf16.mxu0 %v1654_v5  ;;  %v1747_v4 = vld [vmem:[%s1810_s26 + $0x30c] ss:$16 sps:$4 sm:$0xff]   ;;  %v1742_v5 = vld [vmem:[%s1810_s26 + $0x108] ss:$16 sps:$4 sm:$0xff]  }
  0x56   : > { %1129 = vmatprep.subr.bf16.mxu1 %v1657_v6  ;;  %v1745_v6 = vld [vmem:[%s1810_s26 + $0x308] ss:$16 sps:$4 sm:$0xff]  }
  0x57   : > { %1039 = vmatmul.mubr.bf16.vlgmr.msra.gmra.mxu0 %v1884_v7 }
  0x58   : > { %1080 = vmatmul.mubr.bf16.vlgmr.msra.gmra.mxu1 %v1886_v8  ;;  %1089 = vmatpush1.bf16.msra.mxu0 %v1652_v9 }
  0x59   : > { %1130 = vmatpush1.bf16.msra.mxu1 %v1655_v10  ;;  %1090 = vmatprep.subr.bf16.mxu0 %v1660_v11  ;;  %v218_v10 = vld [vmem:[#allocation2 + $0x10] sm:$0xff] }
  0x5a   : > { %1131 = vmatprep.subr.bf16.mxu1 %v1663_v12  ;;  %1120 = vmatprep.mubr.bf16.mxu0 %v1860_v48  ;;  %v1717_v48 = vld [vmem:[%s1810_s26 + $0x3ac] ss:$16 sps:$4 sm:$0xff]  }
  0x5b   : > { %1161 = vmatprep.mubr.bf16.mxu1 %v1406_v52  ;;  %v1723_v52 = vld [vmem:[%s1810_s26 + $0x38c] ss:$16 sps:$4 sm:$0xff]  }
  0x5c   : > { %1091 = vmatpush1.bf16.msra.mxu0 %v1658_v13 }
  0x5d   : > { %1132 = vmatpush1.bf16.msra.mxu1 %v1661_v14  ;;  %1092 = vmatprep.subr.bf16.mxu0 %v1666_v15  ;;  %v219_v14 = vld [vmem:[#allocation2] sm:$0xff] }
  0x5e   : > { %1133 = vmatprep.subr.bf16.mxu1 %v1669_v16 }
  0x60   : > { %1093 = vmatpush1.bf16.msra.mxu0 %v1664_v17 }
  0x61   : > { %1134 = vmatpush1.bf16.msra.mxu1 %v1667_v18  ;;  %1094 = vmatprep.subr.bf16.mxu0 %v1672_v19 }
  0x62   : > { %1135 = vmatprep.subr.bf16.mxu1 %v1675_v20 }
  0x64   : > { %1095 = vmatpush1.bf16.msra.mxu0 %v1670_v21 }
  0x65   : > { %1136 = vmatpush1.bf16.msra.mxu1 %v1673_v22  ;;  %1096 = vmatprep.subr.bf16.mxu0 %v1678_v23 }
  0x66   : > { %1137 = vmatprep.subr.bf16.mxu1 %v1681_v24 }
  0x68   : > { %1097 = vmatpush1.bf16.msra.mxu0 %v1676_v25 }
  0x69   : > { %1138 = vmatpush1.bf16.msra.mxu1 %v1679_v26  ;;  %1098 = vmatprep.subr.bf16.mxu0 %v1684_v27  ;;  %v221_v26 = vld [vmem:[#allocation2 + $0x8] sm:$0xff] }
  0x6a   : > { %1139 = vmatprep.subr.bf16.mxu1 %v1687_v28 }
  0x6c   : > { %1099 = vmatpush1.bf16.msra.mxu0 %v1682_v29 }
  0x6d   : > { %1140 = vmatpush1.bf16.msra.mxu1 %v1685_v30  ;;  %1100 = vmatprep.subr.bf16.mxu0 %v1690_v31 }
  0x6e   : > { %1141 = vmatprep.subr.bf16.mxu1 %v1693_v32 }
  0x70   : > { %1101 = vmatpush1.bf16.msra.mxu0 %v1688_v33 }
  0x71   : > { %1142 = vmatpush1.bf16.msra.mxu1 %v1691_v34  ;;  %1102 = vmatprep.subr.bf16.mxu0 %v1696_v35 }
  0x72   : > { %1143 = vmatprep.subr.bf16.mxu1 %v1699_v36 }
  0x74   : > { %1103 = vmatpush1.bf16.msra.mxu0 %v1694_v37 }
  0x75   : > { %1144 = vmatpush1.bf16.msra.mxu1 %v1697_v38  ;;  %1104 = vmatprep.subr.bf16.mxu0 %v1702_v39 }
  0x76   : > { %1145 = vmatprep.subr.bf16.mxu1 %v1705_v40 }
  0x78   : > { %1105 = vmatpush2.bf16.msra.mxu0 %v1700_v41 }
  0x79   : > { %1146 = vmatpush2.bf16.msra.mxu1 %v1703_v42  ;;  %1106 = vmatprep.subr.bf16.mxu0 %v1708_v43 }
  0x7a   : > { %1147 = vmatprep.subr.bf16.mxu1 %v1711_v44 }
  0x7c   : > { %1107 = vmatpush2.bf16.msra.mxu0 %v1706_v45 }
  0x7d   : > { %1148 = vmatpush2.bf16.msra.mxu1 %v1709_v46  ;;  %1108 = vmatprep.subr.bf16.mxu0 %v1714_v47 }
  0x7e   : > { %1149 = vmatprep.subr.bf16.mxu1 %v1717_v48 }
  0x80   : > { %1109 = vmatpush2.bf16.msra.mxu0 %v1712_v49 }
  0x81   : > { %1150 = vmatpush2.bf16.msra.mxu1 %v1715_v50  ;;  %1110 = vmatprep.subr.bf16.mxu0 %v1720_v51 }
  0x82   : > { %1151 = vmatprep.subr.bf16.mxu1 %v1723_v52 }
  0x84   : > { %1111 = vmatpush2.bf16.msra.mxu0 %v1718_v53 }
  0x85   : > { %1152 = vmatpush2.bf16.msra.mxu1 %v1721_v54  ;;  %1112 = vmatprep.subr.bf16.mxu0 %v1726_v55 }
  0x86   : > { %1153 = vmatprep.subr.bf16.mxu1 %v1729_v56 }
  0x88   : > { %1113 = vmatpush2.bf16.msra.mxu0 %v1724_v57 }
  0x89   : > { %1154 = vmatpush2.bf16.msra.mxu1 %v1727_v58  ;;  %1114 = vmatprep.subr.bf16.mxu0 %v1732_v59 }
  0x8a   : > { %1155 = vmatprep.subr.bf16.mxu1 %v1735_v60 }
  0x8c   : > { %1115 = vmatpush2.bf16.msra.mxu0 %v1730_v61 }
  0x8d   : > { %1156 = vmatpush2.bf16.msra.mxu1 %v1733_v62  ;;  %1116 = vmatprep.subr.bf16.mxu0 %v1738_v63 }
  0x8e   : > { %1157 = vmatprep.subr.bf16.mxu1 %v1741_v0 }
  0x90   : > { %1117 = vmatpush2.bf16.msra.mxu0 %v1736_v1 }
  0x91   : > { %1158 = vmatpush2.bf16.msra.mxu1 %v1739_v2  ;;  %1118 = vmatprep.subr.bf16.mxu0 %v1744_v3 }
  0x92   : > { %1159 = vmatprep.subr.bf16.mxu1 %v1747_v4 }
  0x94   : > { %1119 = vmatpush2.bf16.msra.mxu0 %v1742_v5 }
  0x95   : > { %1160 = vmatpush2.bf16.msra.mxu1 %v1745_v6 }
  0x97   : > { %1121 = vmatmul.mubr.bf16.vlgmr.msra.gmra.mxu0 %v1884_v7  ;;  %v220_v7 = vld [vmem:[#allocation2 + $0x18] sm:$0xff] }
  0x98   : > { %1162 = vmatmul.mubr.bf16.vlgmr.msra.gmra.mxu1 %v1886_v8 }
 0x117   : > { %v1040_v9 = vpop.f32.mrf.mxu0 }
 0x118   : > { %v1081_v11 = vpop.f32.mrf.mxu1 }
 0x119   : > { %v1082_v12 = vadd.f32 %v1081_v11, %v1040_v9  ;;  %v1042_v13 = vpop.f32.mrf.mxu0 }
 0x11a   : > { %v1083_v15 = vpop.f32.mrf.mxu1 }
 0x11b   : > { %v1170_v16 = vadd.f32 %v1082_v12, %v218_v10  ;;  %v1084_v17 = vadd.f32 %v1083_v15, %v1042_v13  ;;  %v1044_v18 = vpop.f32.mrf.mxu0 }
 0x11c   : > { %v1085_v19 = vpop.f32.mrf.mxu1 }
 0x11d   : > { %1174 = vst [vmem:[#allocation2 + $0x10] sm:$0xff] %v1170_v16  ;;  %v1171_v20 = vadd.f32 %v1084_v17, %v219_v14  ;;  %v1045_v21 = vpop.f32.mrf.mxu0 }
 0x11e   : > { %v1086_v22 = vpop.f32.mrf.mxu1 }
 0x11f   : > { %1175 = vst [vmem:[#allocation2] sm:$0xff] %v1171_v20 }
 0x157   : > { %v1122_v23 = vpop.f32.mrf.mxu0 }
 0x158   : > { %v1163_v24 = vpop.f32.mrf.mxu1 }
 0x159   : > { %v1164_v8 = vadd.f32 %v1163_v24, %v1122_v23  ;;  %v1124_v25 = vpop.f32.mrf.mxu0 }
 0x15a   : > { %v1165_v27 = vpop.f32.mrf.mxu1 }
 0x15b   : > { %v1172_v28 = vadd.f32 %v1164_v8, %v220_v7  ;;  %v1166_v29 = vadd.f32 %v1165_v27, %v1124_v25  ;;  %v1126_v30 = vpop.f32.mrf.mxu0  ;;  %1181 = sbr.rel (%p1535_p6) target bundleno = 406 (0x196), region = 44 }
 0x15c   : > { %v1167_v31 = vpop.f32.mrf.mxu1 }
 0x15d   : > { %1176 = vst [vmem:[#allocation2 + $0x18] sm:$0xff] %v1172_v28  ;;  %v1173_v32 = vadd.f32 %v1166_v29, %v221_v26  ;;  %v1127_v33 = vpop.f32.mrf.mxu0 }
 0x15e   : > { %v1168_v34 = vpop.f32.mrf.mxu1 }
 0x15f   : > { %1177 = vst [vmem:[#allocation2 + $0x8] sm:$0xff] %v1173_v32 }
 0x160   : > { %v1956_v35 = vld [vmem:[#allocation2 + $0x10] sm:$0xff]  ;;  %v1958_v36 = vld [vmem:[#allocation2] sm:$0xff] }
 0x161   : > { %v1186_v37 = vrot.slane %v1956_v35, 4  ;;  %v1192_v38 = vrot.slane %v1958_v36, 4  ;;  %v1215_v39 = vmul.f32 %v1956_v35, %v1956_v35  ;;  %v1216_v40 = vmul.f32 %v1958_v36, %v1958_v36 }
 0x163   : > { %v1187_v45 = vadd.f32 %v1186_v37, %v1956_v35  ;;  %v1193_v46 = vadd.f32 %v1192_v38, %v1958_v36  ;;  %v1219_v47 = vrot.slane %v1215_v39, 4  ;;  %v1225_v48 = vrot.slane %v1216_v40, 4 }
 0x164   : > { %v1966_v41 = vld [vmem:[#allocation2 + $0x18] sm:$0xff] }
 0x165   : > { %v1198_v43 = vrot.slane %v1966_v41, 4  ;;  %v1217_v51 = vmul.f32 %v1966_v41, %v1966_v41  ;;  %v1188_v52 = vrot.slane %v1187_v45, 2  ;;  %v1194_v53 = vrot.slane %v1193_v46, 2 }
 0x166   : > { %v1968_v42 = vld [vmem:[#allocation2 + $0x8] sm:$0xff]  ;;  %v1220_v54 = vadd.f32 %v1219_v47, %v1215_v39  ;;  %v1226_v55 = vadd.f32 %v1225_v48, %v1216_v40 }
 0x167   : > { %v1204_v44 = vrot.slane %v1968_v42, 4  ;;  %v1199_v49 = vadd.f32 %v1198_v43, %v1966_v41  ;;  %v1189_v56 = vadd.f32 %v1188_v52, %v1187_v45  ;;  %v1195_v57 = vadd.f32 %v1194_v53, %v1193_v46 }
 0x168   : > { %v1221_v58 = vrot.slane %v1220_v54, 2  ;;  %v1227_v59 = vrot.slane %v1226_v55, 2  ;;  %v1218_v62 = vmul.f32 %v1968_v42, %v1968_v42  ;;  %v1231_v63 = vrot.slane %v1217_v51, 4 }
 0x169   : > { %v1205_v50 = vadd.f32 %v1204_v44, %v1968_v42  ;;  %v1200_v60 = vrot.slane %v1199_v49, 2  ;;  %v1190_v0 = vrot.slane %v1189_v56, 1  ;;  %v1196_v1 = vrot.slane %v1195_v57, 1 }
 0x16a   : > { %v1222_v2 = vadd.f32 %v1221_v58, %v1220_v54  ;;  %v1228_v3 = vadd.f32 %v1227_v59, %v1226_v55  ;;  %v1232_v6 = vadd.f32 %v1231_v63, %v1217_v51  ;;  %v1237_v9 = vrot.slane %v1218_v62, 4  ;;  %v1271_v54 = vld [vmem:[%s2001_s2] sm:$0xf] }
 0x16b   : > { %v1206_v61 = vrot.slane %v1205_v50, 2  ;;  %v1201_v4 = vadd.f32 %v1200_v60, %v1199_v49  ;;  %v1191_v10 = vadd.f32 %v1190_v0, %v1189_v56  ;;  %v1197_v11 = vadd.f32 %v1196_v1, %v1195_v57  ;;  %v1297_v58 = vld [vmem:[%s2002_s3] sm:$0xf] }
 0x16c   : > { %v1223_v12 = vrot.slane %v1222_v2, 1  ;;  %v1229_v13 = vrot.slane %v1228_v3, 1  ;;  %v1233_v16 = vrot.slane %v1232_v6, 2  ;;  %v1238_v17 = vadd.f32 %v1237_v9, %v1218_v62 }
 0x16d   : > { %v1207_v5 = vadd.f32 %v1206_v61, %v1205_v50  ;;  %v1202_v14 = vrot.slane %v1201_v4, 1  ;;  %v1211_v18 = vmul.f32 0.125, %v1191_v10  ;;  %v1212_v19 = vmul.f32 0.125, %v1197_v11 }
 0x16e   : > { %v1224_v20 = vadd.f32 %v1223_v12, %v1222_v2  ;;  %v1230_v21 = vadd.f32 %v1229_v13, %v1228_v3  ;;  %v1234_v7 = vadd.f32 %v1233_v16, %v1232_v6  ;;  %v1239_v24 = vrot.slane %v1238_v17, 2 }
 0x16f   : > { %v1208_v15 = vrot.slane %v1207_v5, 1  ;;  %v1203_v22 = vadd.f32 %v1202_v14, %v1201_v4  ;;  %v1247_v26 = vmul.f32 %v1211_v18, %v1211_v18  ;;  %v1248_v27 = vmul.f32 %v1212_v19, %v1212_v19 }
 0x170   : > { %v1243_v8 = vmul.f32 0.125, %v1224_v20  ;;  %v1244_v25 = vmul.f32 0.125, %v1230_v21  ;;  %v1235_v32 = vrot.slane %v1234_v7, 1  ;;  %v1240_v33 = vadd.f32 %v1239_v24, %v1238_v17 }
 0x171   : > { %v1209_v23 = vadd.f32 %v1208_v15, %v1207_v5  ;;  %v1213_v28 = vmul.f32 0.125, %v1203_v22  ;;  %v1273_v43 = vlaneseq  ;;  %v1255_v56 = vsub.f32 %v1956_v35, %v1211_v18 }
 0x172   : > { %v1251_v30 = vsub.f32 %v1243_v8, %v1247_v26  ;;  %v1252_v31 = vsub.f32 %v1244_v25, %v1248_v27  ;;  %v1236_v39 = vadd.f32 %v1235_v32, %v1234_v7  ;;  %v1241_v40 = vrot.slane %v1240_v33, 1 }
 0x173   : > { %v1214_v29 = vmul.f32 0.125, %v1209_v23  ;;  %v1249_v34 = vmul.f32 %v1213_v28, %v1213_v28  ;;  %v1274_v49 = vshrl.u32 %v1273_v43, 7  ;;  %v1256_v57 = vsub.f32 %v1958_v36, %v1212_v19 }
 0x174   : > { %v1259_v37 = vadd.f32 1e-05, %v1251_v30  ;;  %v1260_v38 = vadd.f32 1e-05, %v1252_v31  ;;  %v1242_v44 = vadd.f32 %v1241_v40, %v1240_v33  ;;  %v1245_v45 = vmul.f32 0.125, %v1236_v39 }
 0x175   : > { %v1250_v46 = vmul.f32 %v1214_v29, %v1214_v29  ;;  %v1275_v53 = vsub.s32 0, %v1274_v49  ;;  %v1279_v55 = vsub.s32 1, %v1274_v49  ;;  %v1283_v1 = vsub.s32 2, %v1274_v49 }
 0x176   : > { %1748 = vrsqrt.f32 %v1259_v37  ;;  %v1246_v47 = vmul.f32 0.125, %v1242_v44  ;;  %v1253_v48 = vsub.f32 %v1245_v45, %v1249_v34  ;;  %v1287_v4 = vsub.s32 3, %v1274_v49 }
 0x177   : > { %1750 = vrsqrt.f32 %v1260_v38  ;;  %v1276_v59 = vrot.slane %v1271_v54, %v1275_v53  ;;  %v1280_v61 = vrot.slane %v1271_v54, %v1279_v55  ;;  %v1302_v0 = vrot.slane %v1297_v58, %v1275_v53 }
 0x178   : > { %v1254_v50 = vsub.f32 %v1246_v47, %v1250_v46  ;;  %v1261_v51 = vadd.f32 1e-05, %v1253_v48  ;;  %v1306_v3 = vrot.slane %v1297_v58, %v1279_v55  ;;  %v1257_v6 = vsub.f32 %v1966_v41, %v1213_v28 }
 0x179   : > { %v1258_v36 = vsub.f32 %v1968_v42, %v1214_v29  ;;  %v1284_v10 = vrot.slane %v1271_v54, %v1283_v1  ;;  %v1288_v13 = vrot.slane %v1271_v54, %v1287_v4  ;;  %v1310_v16 = vrot.slane %v1297_v58, %v1283_v1 }
 0x17a   : > { %v1262_v52 = vadd.f32 1e-05, %v1254_v50  ;;  %1752 = vrsqrt.f32 %v1261_v51  ;;  %v1314_v22 = vrot.slane %v1297_v58, %v1287_v4 }
 0x17c   : > { %1754 = vrsqrt.f32 %v1262_v52 }
 0x183   : > { %v1749_v60 = vpop.eup %1748 }
 0x184   : > { %v1751_v62 = vpop.eup %1750  ;;  %v1267_v63 = vmul.f32 %v1749_v60, %v1255_v56 }
 0x185   : > { %v1268_v2 = vmul.f32 %v1751_v62, %v1256_v57 }
 0x186   : > { %v1293_v5 = vmul.f32 %v1276_v59, %v1267_v63 }
 0x187   : > { %v1294_v35 = vmul.f32 %v1280_v61, %v1268_v2  ;;  %v1753_v11 = vpop.eup %1752 }
 0x188   : > { %v1319_v9 = vadd.f32 %v1302_v0, %v1293_v5  ;;  %v1269_v15 = vmul.f32 %v1753_v11, %v1257_v6 }
 0x189   : > { %v1320_v12 = vadd.f32 %v1306_v3, %v1294_v35  ;;  %v1755_v17 = vpop.eup %1754 }
 0x18a   : > { %vm1323_vm0 = vcmp.ge.f32.partialorder %v1319_v9, 0.0  ;;  %v1327_v14 = vmul.f32 0.01, %v1319_v9  ;;  %v1270_v20 = vmul.f32 %v1755_v17, %v1258_v36  ;;  %v1295_v21 = vmul.f32 %v1284_v10, %v1269_v15 }
 0x18b   : > { %vm1324_vm1 = vcmp.ge.f32.partialorder %v1320_v12, 0.0  ;;  %v1328_v18 = vmul.f32 0.01, %v1320_v12 }
 0x18c   : > { %v1331_v19 = vsel %vm1323_vm0, %v1319_v9, %v1327_v14  ;;  %v1296_v7 = vmul.f32 %v1288_v13, %v1270_v20  ;;  %v1321_v24 = vadd.f32 %v1310_v16, %v1295_v21 }
 0x18d   : > { %v1332_v41 = vsel %vm1324_vm1, %v1320_v12, %v1328_v18 }
 0x18e   : > { %v1541_v23 = vpack.c.bf16 %v1332_v41, %v1331_v19  ;;  %v1322_v42 = vadd.f32 %v1314_v22, %v1296_v7  ;;  %vm1325_vm2 = vcmp.ge.f32.partialorder %v1321_v24, 0.0  ;;  %v1329_v8 = vmul.f32 0.01, %v1321_v24 }
 0x190   : > { %1351 = vst [vmem:[%s2003_s4] sm:$0xff] %v1541_v23  ;;  %vm1326_vm3 = vcmp.ge.f32.partialorder %v1322_v42, 0.0  ;;  %v1330_v25 = vmul.f32 0.01, %v1322_v42  ;;  %v1333_v26 = vsel %vm1325_vm2, %v1321_v24, %v1329_v8 }
 0x192   : > { %v1334_v27 = vsel %vm1326_vm3, %v1322_v42, %v1330_v25 }
 0x193   : > { %v1542_v28 = vpack.c.bf16 %v1334_v27, %v1333_v26 }
 0x195   : > { %1352 = vst [vmem:[%s2003_s4 + $0x8] sm:$0xff] %v1542_v28 }
 0x196 PF: > { %s14_s15 = sadd.s32 1, %s1762_s15  }
 0x197   : > { %p11_p7 = scmp.ge.s32.totalorder %s14_s15, 10  }
 0x199   :  { %13 = sbr.rel (!%p11_p7) target bundleno = 1 (0x1), region = 73 }

</bundles_post_ra>
